<compile_context>
chip_gen: v7x
topology: tpu7x:2x2x1
jax: 0.10.0
libtpu: 0.0.40
codegen_flags: <defaults>
</compile_context>

<pallas_src>
import jax
import jax.numpy as jnp
import numpy as np
from jax.experimental import pallas as pl
from jax.experimental.pallas import tpu as pltpu

NUM_CLASSES = 21   # hard-coded `21` in the PyTorch module
CHANNEL = 1024     # hard-coded `chennel = 1024` in the PyTorch module
LANE_PAD = 128     # lane-dense padded output width (>= NUM_CLASSES)


def _colar_static_kernel(
    sf_ref,                 # (NC*N, C) bf16  all exemplars, flattened over classes
    k_ref, v_ref,           # (B, D) f32      last-frame k / v projections (hoisted to wrapper)
    wek_ref, bek_ref,       # (C, D) bf16, (1, D) f32   conv1_3_Ek
    wev_ref, bev_ref,       # (C, D) bf16, (1, D) f32   conv1_3_Ev
    ww_ref,                 # (1, D) f32      conv2_1_W weight
    bw_ref,                 # (1, 1) f32      conv2_1_W bias   (SMEM scalar)
    wo_ref, bo_ref,         # (2D, 128) bf16, (1, 128) f32     conv2_1 (zero-padded to 128 lanes)
    out_ref,                # (B, 128) f32
):
    f32 = jnp.float32
    NCN, _ = sf_ref.shape
    NC = NUM_CLASSES
    N = NCN // NC
    B, D = k_ref.shape

    # ---- channel-normalized last-frame key (cosine-similarity numerator) ---------------
    k = k_ref[...]
    kh = k * jax.lax.rsqrt(jnp.maximum(jnp.sum(k * k, axis=-1, keepdims=True), 1e-16))

    # ---- Ek / Ev for ALL classes: two big bf16 MXU matmuls, f32 accumulation ------------
    sf = sf_ref[...]                                                             # bf16
    ek = jnp.dot(sf, wek_ref[...], preferred_element_type=f32) + bek_ref[...]    # (NCN, D)
    ev = jnp.dot(sf, wev_ref[...], preferred_element_type=f32) + bev_ref[...]    # (NCN, D)
    ekh = ek * jax.lax.rsqrt(jnp.maximum(jnp.sum(ek * ek, axis=-1, keepdims=True), 1e-16))

    # ---- cosine similarity of every exemplar vs every batch row: (B, NCN) ---------------
    cos = jax.lax.dot_general(kh, ekh, (((1,), (1,)), ((), ())),
                              preferred_element_type=f32)

    # block-structured exemplar<->class pooling masks (keeps everything 2D, no reshapes)
    r = jax.lax.broadcasted_iota(jnp.int32, (NCN, NC), 0)
    c = jax.lax.broadcasted_iota(jnp.int32, (NCN, NC), 1)
    e2c = ((r >= c * N) & (r < (c + 1) * N)).astype(f32)          # (NCN, NC) pool exemplars->class
    rc = jax.lax.broadcasted_iota(jnp.int32, (NC, NCN), 0)
    cc = jax.lax.broadcasted_iota(jnp.int32, (NC, NCN), 1)
    c2e = ((cc >= rc * N) & (cc < (rc + 1) * N)).astype(f32)      # (NC, NCN) broadcast class->exemplars

    # ---- per-class softmax over exemplars ------------------------------------------------
    e = jnp.exp(cos - jnp.max(cos, axis=-1, keepdims=True))                     # (B, NCN)
    den = jnp.dot(e, e2c, preferred_element_type=f32)                           # (B, NC)
    den_b = jnp.dot(den, c2e, preferred_element_type=f32)                       # (B, NCN)
    w = e * pl.reciprocal(den_b, approx=True)                                   # exemplar weights

    # ---- class logits (conv2_1_W): fw[b,c] = sum_n w * (Ev . ww) + bw  (MXU, no XLU) ----
    evw = jax.lax.dot_general(ww_ref[...], ev, (((1,), (1,)), ((), ())),
                              preferred_element_type=f32)                       # (1, NCN)
    fw = jnp.dot(w * evw, e2c, preferred_element_type=f32) + bw_ref[0, 0]       # (B, NC)

    # ---- softmax over the 21 classes -----------------------------------------------------
    fe = jnp.exp(fw - jnp.max(fw, axis=-1, keepdims=True))
    fwsm = fe * pl.reciprocal(jnp.sum(fe, axis=-1, keepdims=True), approx=True) # (B, NC)

    # ---- feature_E = sum_c fwsm[c] * (class-c exemplar-weighted Ev): single matmul ------
    comb = w * jnp.dot(fwsm, c2e, preferred_element_type=f32)                   # (B, NCN)
    feat = jnp.dot(comb, ev, preferred_element_type=f32)                        # (B, D)

    # ---- concat + ReLU + final 1x1 conv, as a split matmul over the two concat halves ---
    wo = wo_ref[...]                                                            # (2D, 128) bf16
    rv = jnp.maximum(v_ref[...], 0.0).astype(jnp.bfloat16)
    rf = jnp.maximum(feat, 0.0).astype(jnp.bfloat16)
    out_ref[...] = (jnp.dot(rv, wo[:D, :], preferred_element_type=f32)
                    + jnp.dot(rf, wo[D:, :], preferred_element_type=f32)
                    + bo_ref[...])


def colar_static_forward(x, static, params):
    """x: (B, T, C), static: (NUM_CLASSES, N, C). Returns (B, 21, 1) float32."""
    B, T, C = x.shape
    NC, N, _ = static.shape
    D = params["wk"].shape[1]

    # Last frame + hoisted k/v 1x1 convs: keeps the two (C, D) f32 weight matrices out of the
    # kernel entirely (they would otherwise be the dominant, double-buffered VMEM cost).
    x_last = x[:, -1, :]
    k = x_last @ params["wk"] + params["bk"]                     # (B, D) f32
    v = x_last @ params["wv"] + params["bv"]                     # (B, D) f32

    # All exemplars flattened (and cast to bf16) so the kernel batches every class into one
    # projection matmul with half the HBM traffic / VMEM footprint.
    sf = static.reshape(NC * N, C).astype(jnp.bfloat16)

    # bf16 weight storage for the in-kernel matmuls (f32 accumulation on the MXU).
    wek = params["wek"].astype(jnp.bfloat16)
    wev = params["wev"].astype(jnp.bfloat16)

    # Lane-dense output: pad the 21-class projection to 128 lanes, slice after the kernel.
    wo_p = jnp.pad(params["wo"], ((0, 0), (0, LANE_PAD - NC))).astype(jnp.bfloat16)
    bo_p = jnp.pad(params["bo"], ((0, 0), (0, LANE_PAD - NC)))

    vmem = pl.BlockSpec(memory_space=pltpu.MemorySpace.VMEM)
    smem = pl.BlockSpec(memory_space=pltpu.MemorySpace.SMEM)

    out = pl.pallas_call(
        _colar_static_kernel,
        out_shape=jax.ShapeDtypeStruct((B, LANE_PAD), jnp.float32),
        in_specs=[vmem, vmem, vmem,           # sf, k, v
                  vmem, vmem, vmem, vmem,     # wek, bek, wev, bev
                  vmem, smem,                 # ww, bw (scalar in SMEM)
                  vmem, vmem],                # wo (padded), bo (padded)
        out_specs=vmem,
        compiler_params=pltpu.CompilerParams(vmem_limit_bytes=64 * 1024 * 1024),
    )(sf, k, v, wek, params["bek"], wev, params["bev"],
      params["ww"], params["bw"], wo_p, bo_p)

    return out[:, :NC, None]                                     # (B, 21, 1)


def init_params(key, C, D, NC):
    """Deterministic synthetic parameters (PyTorch-Conv1d-style uniform init)."""
    ks = jax.random.split(key, 12)

    def u(k, shape, fan_in):
        bound = 1.0 / np.sqrt(fan_in)
        return jax.random.uniform(k, shape, jnp.float32, -bound, bound)

    return dict(
        wk=u(ks[0], (C, D), C),   bk=u(ks[1], (1, D), C),
        wv=u(ks[2], (C, D), C),   bv=u(ks[3], (1, D), C),
        wek=u(ks[4], (C, D), C),  bek=u(ks[5], (1, D), C),
        wev=u(ks[6], (C, D), C),  bev=u(ks[7], (1, D), C),
        ww=u(ks[8], (1, D), D),   bw=u(ks[9], (1, 1), D),
        wo=u(ks[10], (2 * D, NC), 2 * D), bo=u(ks[11], (1, NC), 2 * D),
    )


def colar_static_reference(x, static, params):
    """Pure-JAX f32 reference with the PyTorch module's math (for verification)."""
    x_last = x[:, -1, :]
    k = x_last @ params["wk"] + params["bk"]
    v = x_last @ params["wv"] + params["bv"]
    kh = k / jnp.maximum(jnp.sqrt(jnp.sum(k * k, -1, keepdims=True)), 1e-8)
    ek = jnp.einsum("inc,cd->ind", static, params["wek"]) + params["bek"]
    ev = jnp.einsum("inc,cd->ind", static, params["wev"]) + params["bev"]
    ekh = ek / jnp.maximum(jnp.sqrt(jnp.sum(ek * ek, -1, keepdims=True)), 1e-8)
    cos = jnp.einsum("bd,ind->ibn", kh, ekh)                       # (21, B, N)
    w = jax.nn.softmax(cos, axis=-1)
    s = jnp.einsum("ibn,ind->ibd", w, ev)                          # (21, B, D)
    fw = jnp.sum(s * params["ww"][None], axis=-1) + params["bw"][0, 0]   # (21, B)
    fwsm = jax.nn.softmax(fw, axis=0)                              # softmax over 21 classes
    feat = jnp.sum(s * fwsm[:, :, None], axis=0)                   # (B, D)
    cat = jnp.maximum(jnp.concatenate([v, feat], axis=-1), 0.0)
    out = cat @ params["wo"] + params["bo"]
    return out[:, :, None]


if __name__ == "__main__":
    B, T, C, N = 2, 8, 32, 8                                       # small synthetic shapes
    key = jax.random.PRNGKey(0)
    kx, ks, kp = jax.random.split(key, 3)
    x = jax.random.normal(kx, (B, T, C), jnp.float32)
    static = jax.random.normal(ks, (NUM_CLASSES, N, C), jnp.float32)
    params = init_params(kp, C, CHANNEL, NUM_CLASSES)

    out = jax.block_until_ready(colar_static_forward(x, static, params))
    ref = jax.block_until_ready(colar_static_reference(x, static, params))

    assert out.shape == (B, NUM_CLASSES, 1), out.shape
    np.testing.assert_allclose(np.asarray(out), np.asarray(ref), rtol=3e-2, atol=3e-2)
    print("KERNEL_OK")
</pallas_src>

<mosaic_0001>
module attributes {stable_mosaic.version = 11 : i64} {
  func.func @_colar_static_kernel(%arg0: memref<168x32xbf16, #tpu.memory_space<vmem>>, %arg1: memref<2x1024xf32, #tpu.memory_space<vmem>>, %arg2: memref<2x1024xf32, #tpu.memory_space<vmem>>, %arg3: memref<32x1024xbf16, #tpu.memory_space<vmem>>, %arg4: memref<1x1024xf32, #tpu.memory_space<vmem>>, %arg5: memref<32x1024xbf16, #tpu.memory_space<vmem>>, %arg6: memref<1x1024xf32, #tpu.memory_space<vmem>>, %arg7: memref<1x1024xf32, #tpu.memory_space<vmem>>, %arg8: memref<1x1xf32, #tpu.memory_space<smem>>, %arg9: memref<2048x128xbf16, #tpu.memory_space<vmem>>, %arg10: memref<1x128xf32, #tpu.memory_space<vmem>>, %arg11: memref<2x128xf32, #tpu.memory_space<vmem>>) attributes {dimension_semantics = [], scalar_prefetch = 0 : i64, scratch_operands = 0 : i64, tpu.core_type = #tpu.core_type<tc>} {
    %c0 = arith.constant 0 : index
    %c0_0 = arith.constant 0 : index
    %0 = vector.load %arg1[%c0, %c0_0] : memref<2x1024xf32, #tpu.memory_space<vmem>>, vector<2x1024xf32>
    %1 = arith.mulf %0, %0 : vector<2x1024xf32>
    %cst = arith.constant dense<0.000000e+00> : vector<2xf32>
    %2 = vector.multi_reduction <add>, %1, %cst [1] : vector<2x1024xf32> to vector<2xf32>
    %3 = vector.shape_cast %2 : vector<2xf32> to vector<2x1xf32>
    %cst_1 = arith.constant 1.000000e-16 : f32
    %4 = vector.broadcast %cst_1 : f32 to vector<2x1xf32>
    %5 = arith.maximumf %3, %4 : vector<2x1xf32>
    %6 = math.rsqrt %5 : vector<2x1xf32>
    %7 = vector.broadcast %6 : vector<2x1xf32> to vector<2x1024xf32>
    %8 = arith.mulf %0, %7 : vector<2x1024xf32>
    %c0_2 = arith.constant 0 : index
    %c0_3 = arith.constant 0 : index
    %9 = vector.load %arg0[%c0_2, %c0_3] : memref<168x32xbf16, #tpu.memory_space<vmem>>, vector<168x32xbf16>
    %c0_4 = arith.constant 0 : index
    %c0_5 = arith.constant 0 : index
    %10 = vector.load %arg3[%c0_4, %c0_5] : memref<32x1024xbf16, #tpu.memory_space<vmem>>, vector<32x1024xbf16>
    %cst_6 = arith.constant dense<0.000000e+00> : vector<168x1024xf32>
    %11 = tpu.matmul %9, %10, %cst_6 {dimension_numbers = #tpu.dot_dimension_numbers<[1], [0], [0], [1], [0, 0, 1, 1], [], []>} : vector<168x32xbf16>, vector<32x1024xbf16>, vector<168x1024xf32> -> vector<168x1024xf32>
    %c0_7 = arith.constant 0 : index
    %c0_8 = arith.constant 0 : index
    %12 = vector.load %arg4[%c0_7, %c0_8] : memref<1x1024xf32, #tpu.memory_space<vmem>>, vector<1x1024xf32>
    %13 = vector.broadcast %12 : vector<1x1024xf32> to vector<168x1024xf32>
    %14 = arith.addf %11, %13 : vector<168x1024xf32>
    %c0_9 = arith.constant 0 : index
    %c0_10 = arith.constant 0 : index
    %15 = vector.load %arg5[%c0_9, %c0_10] : memref<32x1024xbf16, #tpu.memory_space<vmem>>, vector<32x1024xbf16>
    %cst_11 = arith.constant dense<0.000000e+00> : vector<168x1024xf32>
    %16 = tpu.matmul %9, %15, %cst_11 {dimension_numbers = #tpu.dot_dimension_numbers<[1], [0], [0], [1], [0, 0, 1, 1], [], []>} : vector<168x32xbf16>, vector<32x1024xbf16>, vector<168x1024xf32> -> vector<168x1024xf32>
    %c0_12 = arith.constant 0 : index
    %c0_13 = arith.constant 0 : index
    %17 = vector.load %arg6[%c0_12, %c0_13] : memref<1x1024xf32, #tpu.memory_space<vmem>>, vector<1x1024xf32>
    %18 = vector.broadcast %17 : vector<1x1024xf32> to vector<168x1024xf32>
    %19 = arith.addf %16, %18 : vector<168x1024xf32>
    %20 = arith.mulf %14, %14 : vector<168x1024xf32>
    %cst_14 = arith.constant dense<0.000000e+00> : vector<168xf32>
    %21 = vector.multi_reduction <add>, %20, %cst_14 [1] : vector<168x1024xf32> to vector<168xf32>
    %22 = vector.shape_cast %21 : vector<168xf32> to vector<168x1xf32>
    %cst_15 = arith.constant 1.000000e-16 : f32
    %23 = vector.broadcast %cst_15 : f32 to vector<168x1xf32>
    %24 = arith.maximumf %22, %23 : vector<168x1xf32>
    %25 = math.rsqrt %24 : vector<168x1xf32>
    %26 = vector.broadcast %25 : vector<168x1xf32> to vector<168x1024xf32>
    %27 = arith.mulf %14, %26 : vector<168x1024xf32>
    %cst_16 = arith.constant dense<0.000000e+00> : vector<2x168xf32>
    %28 = tpu.matmul %8, %27, %cst_16 {dimension_numbers = #tpu.dot_dimension_numbers<[1], [1], [0], [0], [0, 0, 1, 0], [], []>} : vector<2x1024xf32>, vector<168x1024xf32>, vector<2x168xf32> -> vector<2x168xf32>
    %29 = tpu.iota {dimensions = array<i32: 0>} : vector<168x21xi32>
    %30 = tpu.iota {dimensions = array<i32: 1>} : vector<168x21xi32>
    %c8_i32 = arith.constant 8 : i32
    %31 = vector.broadcast %c8_i32 : i32 to vector<168x21xi32>
    %32 = arith.muli %30, %31 : vector<168x21xi32>
    %33 = arith.cmpi sge, %29, %32 : vector<168x21xi32>
    %c1_i32 = arith.constant 1 : i32
    %34 = vector.broadcast %c1_i32 : i32 to vector<168x21xi32>
    %35 = arith.addi %30, %34 : vector<168x21xi32>
    %c8_i32_17 = arith.constant 8 : i32
    %36 = vector.broadcast %c8_i32_17 : i32 to vector<168x21xi32>
    %37 = arith.muli %35, %36 : vector<168x21xi32>
    %38 = arith.cmpi slt, %29, %37 : vector<168x21xi32>
    %39 = arith.andi %33, %38 : vector<168x21xi1>
    %40 = arith.extui %39 : vector<168x21xi1> to vector<168x21xi32>
    %41 = arith.sitofp %40 : vector<168x21xi32> to vector<168x21xf32>
    %42 = tpu.iota {dimensions = array<i32: 0>} : vector<21x168xi32>
    %43 = tpu.iota {dimensions = array<i32: 1>} : vector<21x168xi32>
    %c8_i32_18 = arith.constant 8 : i32
    %44 = vector.broadcast %c8_i32_18 : i32 to vector<21x168xi32>
    %45 = arith.muli %42, %44 : vector<21x168xi32>
    %46 = arith.cmpi sge, %43, %45 : vector<21x168xi32>
    %c1_i32_19 = arith.constant 1 : i32
    %47 = vector.broadcast %c1_i32_19 : i32 to vector<21x168xi32>
    %48 = arith.addi %42, %47 : vector<21x168xi32>
    %c8_i32_20 = arith.constant 8 : i32
    %49 = vector.broadcast %c8_i32_20 : i32 to vector<21x168xi32>
    %50 = arith.muli %48, %49 : vector<21x168xi32>
    %51 = arith.cmpi slt, %43, %50 : vector<21x168xi32>
    %52 = arith.andi %46, %51 : vector<21x168xi1>
    %53 = arith.extui %52 : vector<21x168xi1> to vector<21x168xi32>
    %54 = arith.sitofp %53 : vector<21x168xi32> to vector<21x168xf32>
    %cst_21 = arith.constant dense<0xFF800000> : vector<2xf32>
    %55 = vector.multi_reduction <maximumf>, %28, %cst_21 [1] : vector<2x168xf32> to vector<2xf32>
    %56 = vector.shape_cast %55 : vector<2xf32> to vector<2x1xf32>
    %57 = vector.broadcast %56 : vector<2x1xf32> to vector<2x168xf32>
    %58 = arith.subf %28, %57 : vector<2x168xf32>
    %59 = math.exp %58 : vector<2x168xf32>
    %cst_22 = arith.constant dense<0.000000e+00> : vector<2x21xf32>
    %60 = tpu.matmul %59, %41, %cst_22 {dimension_numbers = #tpu.dot_dimension_numbers<[1], [0], [0], [1], [0, 0, 1, 1], [], []>} : vector<2x168xf32>, vector<168x21xf32>, vector<2x21xf32> -> vector<2x21xf32>
    %cst_23 = arith.constant dense<0.000000e+00> : vector<2x168xf32>
    %61 = tpu.matmul %60, %54, %cst_23 {dimension_numbers = #tpu.dot_dimension_numbers<[1], [0], [0], [1], [0, 0, 1, 1], [], []>} : vector<2x21xf32>, vector<21x168xf32>, vector<2x168xf32> -> vector<2x168xf32>
    %62 = tpu.reciprocal %61 {approx = true} : vector<2x168xf32> -> vector<2x168xf32>
    %63 = arith.mulf %59, %62 : vector<2x168xf32>
    %c0_24 = arith.constant 0 : index
    %c0_25 = arith.constant 0 : index
    %64 = vector.load %arg7[%c0_24, %c0_25] : memref<1x1024xf32, #tpu.memory_space<vmem>>, vector<1x1024xf32>
    %cst_26 = arith.constant dense<0.000000e+00> : vector<1x168xf32>
    %65 = tpu.matmul %64, %19, %cst_26 {dimension_numbers = #tpu.dot_dimension_numbers<[1], [1], [0], [0], [0, 0, 1, 0], [], []>} : vector<1x1024xf32>, vector<168x1024xf32>, vector<1x168xf32> -> vector<1x168xf32>
    %66 = vector.broadcast %65 : vector<1x168xf32> to vector<2x168xf32>
    %67 = arith.mulf %63, %66 : vector<2x168xf32>
    %cst_27 = arith.constant dense<0.000000e+00> : vector<2x21xf32>
    %68 = tpu.matmul %67, %41, %cst_27 {dimension_numbers = #tpu.dot_dimension_numbers<[1], [0], [0], [1], [0, 0, 1, 1], [], []>} : vector<2x168xf32>, vector<168x21xf32>, vector<2x21xf32> -> vector<2x21xf32>
    %c0_28 = arith.constant 0 : index
    %c0_29 = arith.constant 0 : index
    %69 = memref.load %arg8[%c0_28, %c0_29] : memref<1x1xf32, #tpu.memory_space<smem>>
    %70 = vector.broadcast %69 : f32 to vector<2x21xf32>
    %71 = arith.addf %68, %70 : vector<2x21xf32>
    %cst_30 = arith.constant dense<0xFF800000> : vector<2xf32>
    %72 = vector.multi_reduction <maximumf>, %71, %cst_30 [1] : vector<2x21xf32> to vector<2xf32>
    %73 = vector.shape_cast %72 : vector<2xf32> to vector<2x1xf32>
    %74 = vector.broadcast %73 : vector<2x1xf32> to vector<2x21xf32>
    %75 = arith.subf %71, %74 : vector<2x21xf32>
    %76 = math.exp %75 : vector<2x21xf32>
    %cst_31 = arith.constant dense<0.000000e+00> : vector<2xf32>
    %77 = vector.multi_reduction <add>, %76, %cst_31 [1] : vector<2x21xf32> to vector<2xf32>
    %78 = vector.shape_cast %77 : vector<2xf32> to vector<2x1xf32>
    %79 = tpu.reciprocal %78 {approx = true} : vector<2x1xf32> -> vector<2x1xf32>
    %80 = vector.broadcast %79 : vector<2x1xf32> to vector<2x21xf32>
    %81 = arith.mulf %76, %80 : vector<2x21xf32>
    %cst_32 = arith.constant dense<0.000000e+00> : vector<2x168xf32>
    %82 = tpu.matmul %81, %54, %cst_32 {dimension_numbers = #tpu.dot_dimension_numbers<[1], [0], [0], [1], [0, 0, 1, 1], [], []>} : vector<2x21xf32>, vector<21x168xf32>, vector<2x168xf32> -> vector<2x168xf32>
    %83 = arith.mulf %63, %82 : vector<2x168xf32>
    %cst_33 = arith.constant dense<0.000000e+00> : vector<2x1024xf32>
    %84 = tpu.matmul %83, %19, %cst_33 {dimension_numbers = #tpu.dot_dimension_numbers<[1], [0], [0], [1], [0, 0, 1, 1], [], []>} : vector<2x168xf32>, vector<168x1024xf32>, vector<2x1024xf32> -> vector<2x1024xf32>
    %c0_34 = arith.constant 0 : index
    %c0_35 = arith.constant 0 : index
    %85 = vector.load %arg9[%c0_34, %c0_35] : memref<2048x128xbf16, #tpu.memory_space<vmem>>, vector<2048x128xbf16>
    %c0_36 = arith.constant 0 : index
    %c0_37 = arith.constant 0 : index
    %86 = vector.load %arg2[%c0_36, %c0_37] : memref<2x1024xf32, #tpu.memory_space<vmem>>, vector<2x1024xf32>
    %cst_38 = arith.constant 0.000000e+00 : f32
    %87 = vector.broadcast %cst_38 : f32 to vector<2x1024xf32>
    %88 = arith.maximumf %86, %87 : vector<2x1024xf32>
    %89 = arith.truncf %88 : vector<2x1024xf32> to vector<2x1024xbf16>
    %cst_39 = arith.constant 0.000000e+00 : f32
    %90 = vector.broadcast %cst_39 : f32 to vector<2x1024xf32>
    %91 = arith.maximumf %84, %90 : vector<2x1024xf32>
    %92 = arith.truncf %91 : vector<2x1024xf32> to vector<2x1024xbf16>
    %93 = vector.extract_strided_slice %85 {offsets = [0, 0], sizes = [1024, 128], strides = [1, 1]} : vector<2048x128xbf16> to vector<1024x128xbf16>
    %cst_40 = arith.constant dense<0.000000e+00> : vector<2x128xf32>
    %94 = tpu.matmul %89, %93, %cst_40 {dimension_numbers = #tpu.dot_dimension_numbers<[1], [0], [0], [1], [0, 0, 1, 1], [], []>} : vector<2x1024xbf16>, vector<1024x128xbf16>, vector<2x128xf32> -> vector<2x128xf32>
    %95 = vector.extract_strided_slice %85 {offsets = [1024, 0], sizes = [1024, 128], strides = [1, 1]} : vector<2048x128xbf16> to vector<1024x128xbf16>
    %cst_41 = arith.constant dense<0.000000e+00> : vector<2x128xf32>
    %96 = tpu.matmul %92, %95, %cst_41 {dimension_numbers = #tpu.dot_dimension_numbers<[1], [0], [0], [1], [0, 0, 1, 1], [], []>} : vector<2x1024xbf16>, vector<1024x128xbf16>, vector<2x128xf32> -> vector<2x128xf32>
    %97 = arith.addf %94, %96 : vector<2x128xf32>
    %c0_42 = arith.constant 0 : index
    %c0_43 = arith.constant 0 : index
    %98 = vector.load %arg10[%c0_42, %c0_43] : memref<1x128xf32, #tpu.memory_space<vmem>>, vector<1x128xf32>
    %99 = vector.broadcast %98 : vector<1x128xf32> to vector<2x128xf32>
    %100 = arith.addf %97, %99 : vector<2x128xf32>
    %c0_44 = arith.constant 0 : index
    %c0_45 = arith.constant 0 : index
    %101 = vector.load %arg11[%c0_44, %c0_45] : memref<2x128xf32, #tpu.memory_space<vmem>>, vector<2x128xf32>
    tpu.vector_store %arg11[%c0_44, %c0_45], %100 {strides = array<i32>} : memref<2x128xf32, #tpu.memory_space<vmem>>, vector<2x128xf32>,
    return
  }
}

</mosaic_0001>

<bundles_post_ra>
// kernel: tpu_custom_call.1
= control target key start
LH: loop header
LB: loop body
LE: loop exit
PB: predicated region body
PF: predicated region fallthrough
CT: control target
= control target key end

     0   :  { %17 = vsyncpa [#allocation4], 0  ;;  %s10663_s0 = inlined_call_operand.hbm [shape: bf16[168,32], index: 0, kind: input, shape index: {}]   ;;  %s10664_s1 = inlined_call_operand.hbm [shape: f32[2,1024], index: 1, kind: input, shape index: {}]   ;;  %s10665_s2 = inlined_call_operand.hbm [shape: f32[2,1024], index: 2, kind: input, shape index: {}]   ;;  %s10666_s3 = inlined_call_operand.hbm [shape: bf16[32,1024], index: 3, kind: input, shape index: {}]   ;;  %s10667_s4 = inlined_call_operand.hbm [shape: f32[1,1024], index: 4, kind: input, shape index: {}]   ;;  %s10668_s5 = inlined_call_operand.hbm [shape: bf16[32,1024], index: 5, kind: input, shape index: {}]   ;;  %s10669_s6 = inlined_call_operand.hbm [shape: f32[1,1024], index: 6, kind: input, shape index: {}]   ;;  %s10670_s7 = inlined_call_operand.hbm [shape: f32[1,1024], index: 7, kind: input, shape index: {}]   ;;  %s10671_s8 = inlined_call_operand.<no memory space> [shape: f32[1,1], index: 8, kind: input, shape index: {}]   ;;  %s10672_s9 = inlined_call_operand.hbm [shape: bf16[2048,128], index: 9, kind: input, shape index: {}]   ;;  %s10673_s10 = inlined_call_operand.hbm [shape: f32[1,128], index: 10, kind: input, shape index: {}]   ;;  %s10674_s11 = inlined_call_operand.hbm [shape: f32[2,128], index: 11, kind: output, shape index: {}]  }
   0x1   :  { %18 = vsyncpa [#allocation7], 0 }
   0x2   :  { %19 = vsyncpa [#allocation10], 0 }
   0x3   :  { %20 = vsyncpa [#allocation13], 0 }
   0x4   :  { %21 = vsyncpa [#allocation16], 0 }
   0x5   :  { %22 = vsyncpa [#allocation19], 0 }
   0x6   :  { %23 = vsyncpa [#allocation5], 0  ;;  %s6813_s17 = smov [#allocation6]   ;;  %s6814_s19 = smov [#allocation9]  }
   0x7   :  { %s42_s18 = sshll.u32 %s6813_s17, 4  ;;  %s61_s20 = sshll.u32 %s6814_s19, 4  ;;  %s43_s18 = int_to_ptr.vmem [resolvable:$true] %s42_s18  ;;  %s6895_s20 = int_to_ptr.vmem [resolvable:$true] %s61_s20 }
   0x8   :  { %s6557_s23 = scalar_lea.hbm %s10664_s1, 256 }
   0x9   :  { %p6558_p0 = scmp.ne.s32.totalorder %s10664_s1, %s6557_s23  ;;  %p6561_p1 = scmp.lt.u32.totalorder %s6557_s23, %s10664_s1 }
   0xb   :  { %p6563_p2 = pnand %p6561_p1, %p6558_p0 }
   0xd   :  { %6566 = shalt.err (!%p6563_p2)
}
   0xe   :  { %s6567_s28 = scalar_lea.vmem %s43_s18, 256  ;;  %p6572_p4 = scmp.lt.s32.totalorder %s43_s18, %s43_s18 }
   0xf   :  { %p6568_p3 = scmp.ne.s32.totalorder %s43_s18, %s6567_s28  ;;  %p6573_p5 = scmp.lt.s32.totalorder %s6567_s28, %s6567_s28 }
  0x11   :  { %p6574_p6 = por %p6573_p5, %p6572_p4 }
  0x13   :  { %p6575_p7 = pnand %p6574_p6, %p6568_p3 }
  0x15   :  { %6578 = shalt.err (!%p6575_p7)
}
  0x16   :  { %45 = dma.hbm_to_vmem [thread:$0]  %s10664_s1, 256, %s43_s18, [#allocation7]  }
  0x17   :  { %s6579_s14 = scalar_lea.hbm %s10666_s3, 2048 }
  0x18   :  { %p6580_p8 = scmp.ne.s32.totalorder %s10666_s3, %s6579_s14  ;;  %p6583_p9 = scmp.lt.u32.totalorder %s6579_s14, %s10666_s3 }
  0x1a   :  { %p6585_p10 = pnand %p6583_p9, %p6580_p8 }
  0x1c   :  { %6588 = shalt.err (!%p6585_p10)
}
  0x1d   :  { %s6589_s21 = scalar_lea.vmem %s6895_s20, 2048  ;;  %p6594_p12 = scmp.lt.s32.totalorder %s6895_s20, %s6895_s20 }
  0x1e   :  { %p6590_p11 = scmp.ne.s32.totalorder %s6895_s20, %s6589_s21  ;;  %p6595_p13 = scmp.lt.s32.totalorder %s6589_s21, %s6589_s21 }
  0x20   :  { %p6596_p0 = por %p6595_p13, %p6594_p12 }
  0x22   :  { %p6597_p1 = pnand %p6596_p0, %p6590_p11 }
  0x24   :  { %6600 = shalt.err (!%p6597_p1)
}
  0x25   :  { %s6815_s1 = smov 512   ;;  %s6816_s18 = smov 32  }
  0x26   :  { %67 = dma.hbm_to_vmem [thread:$0]  %s10666_s3, 2048, %s6895_s20, [#allocation10], %s6815_s1, %s6815_s1, %s6816_s18  }
  0x27   :  { %s6817_s24 = smov [#allocation12]   ;;  %s6818_s26 = smov [#allocation15]  }
  0x28   :  { %s83_s25 = sshll.u32 %s6817_s24, 4  ;;  %s106_s27 = sshll.u32 %s6818_s26, 4  ;;  %s84_s25 = int_to_ptr.vmem [resolvable:$true] %s83_s25  ;;  %s107_s27 = int_to_ptr.vmem [resolvable:$true] %s106_s27 }
  0x29   :  { %s6601_s30 = scalar_lea.hbm %s10668_s5, 2048 }
  0x2a   :  { %p6602_p2 = scmp.ne.s32.totalorder %s10668_s5, %s6601_s30  ;;  %p6605_p3 = scmp.lt.u32.totalorder %s6601_s30, %s10668_s5 }
  0x2c   :  { %p6607_p4 = pnand %p6605_p3, %p6602_p2 }
  0x2e   :  { %6610 = shalt.err (!%p6607_p4)
}
  0x2f   :  { %s6611_s3 = scalar_lea.vmem %s84_s25, 2048  ;;  %p6616_p6 = scmp.lt.s32.totalorder %s84_s25, %s84_s25 }
  0x30   :  { %p6612_p5 = scmp.ne.s32.totalorder %s84_s25, %s6611_s3  ;;  %p6617_p7 = scmp.lt.s32.totalorder %s6611_s3, %s6611_s3 }
  0x32   :  { %p6618_p8 = por %p6617_p7, %p6616_p6 }
  0x34   :  { %p6619_p9 = pnand %p6618_p8, %p6612_p5 }
  0x36   :  { %6622 = shalt.err (!%p6619_p9)
}
  0x37   :  { %89 = dma.hbm_to_vmem [thread:$0]  %s10668_s5, 2048, %s84_s25, [#allocation13], %s6815_s1, %s6815_s1, %s6816_s18  }
  0x38   :  { %s6623_s21 = scalar_lea.hbm %s10670_s7, 128 }
  0x39   :  { %p6624_p10 = scmp.ne.s32.totalorder %s10670_s7, %s6623_s21  ;;  %p6627_p11 = scmp.lt.u32.totalorder %s6623_s21, %s10670_s7 }
  0x3b   :  { %p6629_p12 = pnand %p6627_p11, %p6624_p10 }
  0x3d   :  { %6632 = shalt.err (!%p6629_p12)
}
  0x3e   :  { %s6633_s28 = scalar_lea.vmem %s107_s27, 128  ;;  %p6638_p0 = scmp.lt.s32.totalorder %s107_s27, %s107_s27 }
  0x3f   :  { %p6634_p13 = scmp.ne.s32.totalorder %s107_s27, %s6633_s28  ;;  %p6639_p1 = scmp.lt.s32.totalorder %s6633_s28, %s6633_s28 }
  0x41   :  { %p6640_p2 = por %p6639_p1, %p6638_p0 }
  0x43   :  { %p6641_p3 = pnand %p6640_p2, %p6634_p13 }
  0x45   :  { %6644 = shalt.err (!%p6641_p3)
}
  0x46   :  { %109 = dma.hbm_to_vmem [thread:$0]  %s10670_s7, 128, %s107_s27, [#allocation16]  }
  0x47   :  { %s6819_s18 = smov [#allocation3]   ;;  %s6645_s12 = scalar_lea.hbm %s10663_s0, 1344 }
  0x48   :  { %s29_s25 = sshll.u32 %s6819_s18, 4  ;;  %p6646_p4 = scmp.ne.s32.totalorder %s10663_s0, %s6645_s12  ;;  %s30_s25 = int_to_ptr.vmem [resolvable:$true] %s29_s25 }
  0x49   :  { %p6649_p5 = scmp.lt.u32.totalorder %s6645_s12, %s10663_s0 }
  0x4b   :  { %p6651_p6 = pnand %p6649_p5, %p6646_p4 }
  0x4d   :  { %6654 = shalt.err (!%p6651_p6)
}
  0x4e   :  { %s6655_s20 = scalar_lea.vmem %s30_s25, 1344  ;;  %p6660_p8 = scmp.lt.s32.totalorder %s30_s25, %s30_s25 }
  0x4f   :  { %p6656_p7 = scmp.ne.s32.totalorder %s30_s25, %s6655_s20  ;;  %p6661_p9 = scmp.lt.s32.totalorder %s6655_s20, %s6655_s20 }
  0x51   :  { %p6662_p10 = por %p6661_p9, %p6660_p8 }
  0x53   :  { %p6663_p11 = pnand %p6662_p10, %p6656_p7 }
  0x55   :  { %6666 = shalt.err (!%p6663_p11)
}
  0x56   :  { %s6820_s7 = smov 64   ;;  %s6821_s27 = smov 4  }
  0x57   :  { %35 = dma.hbm_to_vmem [thread:$0]  %s10663_s0, 1344, %s30_s25, [#allocation4], %s6820_s7, %s6820_s7, %s6821_s27  }
  0x58   :  { %s6822_s19 = smov [#allocation8]   ;;  %s6823_s22 = smov [#allocation11]  }
  0x59   :  { %s52_s21 = sshll.u32 %s6822_s19, 4  ;;  %s74_s23 = sshll.u32 %s6823_s22, 4  ;;  %s53_s21 = int_to_ptr.vmem [resolvable:$true] %s52_s21  ;;  %s75_s23 = int_to_ptr.vmem [resolvable:$true] %s74_s23 }
  0x5a   :  { %s6667_s28 = scalar_lea.hbm %s10665_s2, 256 }
  0x5b   :  { %p6668_p12 = scmp.ne.s32.totalorder %s10665_s2, %s6667_s28  ;;  %p6671_p13 = scmp.lt.u32.totalorder %s6667_s28, %s10665_s2 }
  0x5d   :  { %p6673_p0 = pnand %p6671_p13, %p6668_p12 }
  0x5f   :  { %6676 = shalt.err (!%p6673_p0)
}
  0x60   :  { %s6677_s0 = scalar_lea.vmem %s53_s21, 256  ;;  %p6682_p2 = scmp.lt.s32.totalorder %s53_s21, %s53_s21 }
  0x61   :  { %p6678_p1 = scmp.ne.s32.totalorder %s53_s21, %s6677_s0  ;;  %p6683_p3 = scmp.lt.s32.totalorder %s6677_s0, %s6677_s0 }
  0x63   :  { %p6684_p4 = por %p6683_p3, %p6682_p2 }
  0x65   :  { %p6685_p5 = pnand %p6684_p4, %p6678_p1 }
  0x67   :  { %6688 = shalt.err (!%p6685_p5)
}
  0x68   :  { %55 = dma.hbm_to_vmem [thread:$0]  %s10665_s2, 256, %s53_s21, [#allocation7]  }
  0x69   :  { %s6689_s14 = scalar_lea.hbm %s10667_s4, 128 }
  0x6a   :  { %p6690_p6 = scmp.ne.s32.totalorder %s10667_s4, %s6689_s14  ;;  %p6693_p7 = scmp.lt.u32.totalorder %s6689_s14, %s10667_s4 }
  0x6c   :  { %p6695_p8 = pnand %p6693_p7, %p6690_p6 }
  0x6e   :  { %6698 = shalt.err (!%p6695_p8)
}
  0x6f   :  { %s6699_s17 = scalar_lea.vmem %s75_s23, 128  ;;  %p6704_p10 = scmp.lt.s32.totalorder %s75_s23, %s75_s23 }
  0x70   :  { %p6700_p9 = scmp.ne.s32.totalorder %s75_s23, %s6699_s17  ;;  %p6705_p11 = scmp.lt.s32.totalorder %s6699_s17, %s6699_s17 }
  0x72   :  { %p6706_p12 = por %p6705_p11, %p6704_p10 }
  0x74   :  { %p6707_p13 = pnand %p6706_p12, %p6700_p9 }
  0x76   :  { %6710 = shalt.err (!%p6707_p13)
}
  0x77   :  { %77 = dma.hbm_to_vmem [thread:$0]  %s10667_s4, 128, %s75_s23, [#allocation10]  }
  0x78   :  { %s6824_s21 = smov [#allocation14]   ;;  %s6825_s24 = smov [#allocation17]  }
  0x79   :  { %s96_s22 = sshll.u32 %s6824_s21, 4  ;;  %s117_s26 = sshll.u32 %s6825_s24, 4  ;;  %s97_s22 = int_to_ptr.vmem [resolvable:$true] %s96_s22  ;;  %s118_s26 = int_to_ptr.vmem [resolvable:$true] %s117_s26 }
  0x7a   :  { %s6711_s1 = scalar_lea.hbm %s10669_s6, 128 }
  0x7b   :  { %p6712_p0 = scmp.ne.s32.totalorder %s10669_s6, %s6711_s1  ;;  %p6715_p1 = scmp.lt.u32.totalorder %s6711_s1, %s10669_s6 }
  0x7d   :  { %p6717_p2 = pnand %p6715_p1, %p6712_p0 }
  0x7f   :  { %6720 = shalt.err (!%p6717_p2)
}
  0x80   :  { %s6721_s4 = scalar_lea.vmem %s97_s22, 128  ;;  %p6726_p4 = scmp.lt.s32.totalorder %s97_s22, %s97_s22 }
  0x81   :  { %p6722_p3 = scmp.ne.s32.totalorder %s97_s22, %s6721_s4  ;;  %p6727_p5 = scmp.lt.s32.totalorder %s6721_s4, %s6721_s4 }
  0x83   :  { %p6728_p6 = por %p6727_p5, %p6726_p4 }
  0x85   :  { %p6729_p7 = pnand %p6728_p6, %p6722_p3 }
  0x87   :  { %6732 = shalt.err (!%p6729_p7)
}
  0x88   :  { %99 = dma.hbm_to_vmem [thread:$0]  %s10669_s6, 128, %s97_s22, [#allocation13]  }
  0x89   :  { %s6733_s14 = scalar_lea.hbm %s10672_s9, 16384 }
  0x8a   :  { %p6734_p8 = scmp.ne.s32.totalorder %s10672_s9, %s6733_s14  ;;  %p6737_p9 = scmp.lt.u32.totalorder %s6733_s14, %s10672_s9 }
  0x8c   :  { %p6739_p10 = pnand %p6737_p9, %p6734_p8 }
  0x8e   :  { %6742 = shalt.err (!%p6739_p10)
}
  0x8f   :  { %s6743_s17 = scalar_lea.vmem %s118_s26, 16384  ;;  %p6748_p12 = scmp.lt.s32.totalorder %s118_s26, %s118_s26 }
  0x90   :  { %p6744_p11 = scmp.ne.s32.totalorder %s118_s26, %s6743_s17  ;;  %p6749_p13 = scmp.lt.s32.totalorder %s6743_s17, %s6743_s17 }
  0x92   :  { %p6750_p0 = por %p6749_p13, %p6748_p12 }
  0x94   :  { %p6751_p1 = pnand %p6750_p0, %p6744_p11 }
  0x96   :  { %6754 = shalt.err (!%p6751_p1)
}
  0x97   :  { %123 = dma.hbm_to_vmem [thread:$0]  %s10672_s9, 16384, %s118_s26, [#allocation16], %s6820_s7, %s6820_s7, %s6821_s27  }
  0x98   :  { %s6826_s19 = smov [#allocation18]   ;;  %s6755_s28 = scalar_lea.hbm %s10673_s10, 16 }
  0x99   :  { %s130_s21 = sshll.u32 %s6826_s19, 4  ;;  %p6756_p2 = scmp.ne.s32.totalorder %s10673_s10, %s6755_s28  ;;  %s131_s21 = int_to_ptr.vmem [resolvable:$true] %s130_s21 }
  0x9a   :  { %p6759_p3 = scmp.lt.u32.totalorder %s6755_s28, %s10673_s10 }
  0x9c   :  { %p6761_p4 = pnand %p6759_p3, %p6756_p2 }
  0x9e   :  { %6764 = shalt.err (!%p6761_p4)
}
  0x9f   :  { %s6765_s0 = scalar_lea.vmem %s131_s21, 16  ;;  %s6769_s9 = scalar_lea.vmem %s131_s21, 32 }
  0xa0   :  { %p6766_p5 = scmp.ne.s32.totalorder %s131_s21, %s6765_s0  ;;  %p6770_p6 = scmp.lt.s32.totalorder %s131_s21, %s131_s21 }
  0xa1   :  { %p6771_p7 = scmp.lt.s32.totalorder %s6769_s9, %s6765_s0 }
  0xa3   :  { %p6772_p8 = por %p6771_p7, %p6770_p6 }
  0xa5   :  { %p6773_p9 = pnand %p6772_p8, %p6766_p5 }
  0xa7   :  { %6776 = shalt.err (!%p6773_p9)
}
  0xa8   :  { %133 = dma.hbm_to_vmem [thread:$0]  %s10673_s10, 16, %s131_s21, [#allocation19]  }
  0xa9   :  { %6799 = dma.done.wait [#allocation4], 1344  }
  0xaa   :  { %6800 = vsyncadd [#allocation4], 4294965952 }
  0xab   :  { %6801 = dma.done.wait [#allocation7], 512  }
  0xac   :  { %6802 = vsyncadd [#allocation7], 4294966784 }
  0xad   :  { %6803 = dma.done.wait [#allocation10], 2176  }
  0xae   :  { %6804 = vsyncadd [#allocation10], 4294965120 }
  0xaf   :  { %6805 = dma.done.wait [#allocation13], 2176  }
  0xb0   :  { %6806 = vsyncadd [#allocation13], 4294965120 }
  0xb1   :  { %6807 = dma.done.wait [#allocation16], 16512  }
  0xb2   :  { %6808 = vsyncadd [#allocation16], 4294950784 }
  0xb3   :  { %6809 = dma.done.wait [#allocation19], 16  }
  0xb4   :  { %6810 = vsyncadd [#allocation19], 4294967280  ;;  %v10676_v0 = vmov 0   ;;  %v265_v1 = vld [vmem:[#allocation9] sm:$0xff]  ;;  %v266_v8 = vld [vmem:[#allocation9 + $0x8] sm:$0xff]  ;;  %vm456_vm0 = vcmask 261120  }
  0xb5   :  { %522 = vmatprep.mubr.bf16.mxu0 %v10676_v0  ;;  %673 = vmatprep.mubr.bf16.mxu1 %v10676_v0  ;;  %v269_v2 = vld [vmem:[#allocation9 + $0x20] sm:$0xff]  ;;  %v270_v9 = vld [vmem:[#allocation9 + $0x28] sm:$0xff]  ;;  %v268_v16 = vld [vmem:[#allocation9 + $0x18] sm:$0xff]  ;;  %vm10953_vm1 = vcmask 1041408  }
  0xb6   :  { %v273_v3 = vld [vmem:[#allocation9 + $0x40] sm:$0xff]  ;;  %v5238_v4 = vcombine.high %v265_v1, %v269_v2  ;;  %v5237_v5 = vcombine.low %v265_v1, %v269_v2  ;;  %v5239_v10 = vcombine.low %v266_v8, %v270_v9  ;;  %v5240_v11 = vcombine.high %v266_v8, %v270_v9  ;;  %v274_v12 = vld [vmem:[#allocation9 + $0x48] sm:$0xff]  ;;  %v272_v18 = vld [vmem:[#allocation9 + $0x38] sm:$0xff] }
  0xb7   :  { %v277_v6 = vld [vmem:[#allocation9 + $0x60] sm:$0xff]  ;;  %v278_v13 = vld [vmem:[#allocation9 + $0x68] sm:$0xff]  ;;  %v5244_v20 = vcombine.high %v268_v16, %v272_v18  ;;  %v5243_v21 = vcombine.low %v268_v16, %v272_v18  ;;  %v7034_v22 = vld [vmem:[#allocation3 + $0x8] sm:$0xff]  }
  0xb8   :  { %v5246_v7 = vcombine.high %v273_v3, %v277_v6  ;;  %490 = vmatprep.subr.bf16.mxu0 %v5238_v4  ;;  %v5245_v14 = vcombine.low %v273_v3, %v277_v6  ;;  %v5248_v15 = vcombine.high %v274_v12, %v278_v13  ;;  %6299 = vmatprep.subr.bf16.mxu1 %v5240_v11  ;;  %v7030_v19 = vld [vmem:[#allocation3] sm:$0xff]   ;;  %v276_v23 = vld [vmem:[#allocation9 + $0x58] sm:$0xff]  ;;  %v7048_v32 = vld [vmem:[#allocation3 + $0x18] sm:$0xff]  }
  0xb9   :  { %491 = vmatpush1.bf16.msra.mxu0 %v5237_v5  ;;  %6301 = vmatpush1.bf16.msra.mxu1 %v5239_v10  ;;  %v5247_v17 = vcombine.low %v274_v12, %v278_v13  ;;  %v280_v24 = vld [vmem:[#allocation9 + $0x78] sm:$0xff]  ;;  %v267_v27 = vld [vmem:[#allocation9 + $0x10] sm:$0xff]  ;;  %v7082_v36 = vld [vmem:[#allocation3 + $0x38] sm:$0xff]  }
  0xba   :  { %492 = vmatprep.subr.bf16.mxu0 %v5246_v7  ;;  %6300 = vmatprep.subr.bf16.mxu1 %v5248_v15  ;;  %v5252_v25 = vcombine.high %v276_v23, %v280_v24  ;;  %v5251_v26 = vcombine.low %v276_v23, %v280_v24  ;;  %v271_v28 = vld [vmem:[#allocation9 + $0x30] sm:$0xff]  ;;  %v7040_v31 = vld [vmem:[#allocation3 + $0x10] sm:$0xff]   ;;  %10995 = vst [vmem:[#allocation28_spill] sm:$0xff] %v7082_v36  ;;  %v1054_v44 = vld [vmem:[#allocation12] sm:$0xff]  ;;  %v10675_v23 = vlaneseq }
  0xbb   :  { %v5241_v29 = vcombine.low %v267_v27, %v271_v28  ;;  %v5242_v30 = vcombine.high %v267_v27, %v271_v28  ;;  %v7056_v33 = vld [vmem:[#allocation3 + $0x20] sm:$0xff]   ;;  %v7064_v34 = vld [vmem:[#allocation3 + $0x28] sm:$0xff]   ;;  %v7072_v35 = vld [vmem:[#allocation3 + $0x30] sm:$0xff]  }
  0xbc   :  { %v7088_v37 = vld [vmem:[#allocation3 + $0x40] sm:$0xff]   ;;  %v7096_v38 = vld [vmem:[#allocation3 + $0x48] sm:$0xff]   ;;  %v7104_v39 = vld [vmem:[#allocation3 + $0x50] ss:$0 sps:$4 sm:$0xff]  }
  0xbd   :  { %493 = vmatpush1.bf16.msra.mxu0 %v5245_v14  ;;  %6302 = vmatpush1.bf16.msra.mxu1 %v5247_v17  ;;  %10996 = vst [vmem:[#allocation29_spill] sm:$0xff] %v7088_v37  ;;  %10997 = vst [vmem:[#allocation30_spill] sm:$0xff] %v7096_v38  ;;  %v275_v40 = vld [vmem:[#allocation9 + $0x50] sm:$0xff]  ;;  %v1058_v45 = vld [vmem:[#allocation12 + $0x20] sm:$0xff] }
  0xbe   :  { %631 = vmatprep.subr.bf16.mxu0 %v5240_v11  ;;  %913 = vmatprep.subr.bf16.mxu1 %v5244_v20  ;;  %10998 = vst [vmem:[#allocation31_spill] sm:$0xff] %v7104_v39  ;;  %v279_v41 = vld [vmem:[#allocation9 + $0x70] sm:$0xff]  ;;  %v5297_v46 = vcombine.low %v1054_v44, %v1058_v45  ;;  %v5298_v47 = vcombine.high %v1054_v44, %v1058_v45  ;;  %v1062_v3 = vld [vmem:[#allocation12 + $0x40] sm:$0xff] }
  0xbf   :  { %v5250_v42 = vcombine.high %v275_v40, %v279_v41  ;;  %v5249_v43 = vcombine.low %v275_v40, %v279_v41  ;;  %v1066_v4 = vld [vmem:[#allocation12 + $0x60] sm:$0xff] }
  0xc0   :  { %5253 = vmatmul.mubr.msk.bf16.vlgmr.msra.gmra.mrb[0].mxu0 %vm456_vm0, %v7030_v19  ;;  %5265 = vmatmul.mubr.msk.bf16.vlgmr.msra.gmra.mrb[0].mxu1 %vm456_vm0, %v7034_v22  ;;  %v5305_v7 = vcombine.low %v1062_v3, %v1066_v4 }
  0xc1   :  { %632 = vmatpush1.bf16.msra.mxu0 %v5239_v10  ;;  %532 = vmatprep.mubr.bf16.mxu0 %v10676_v0  ;;  %v5306_v10 = vcombine.high %v1062_v3, %v1066_v4 }
  0xc2   :  { %633 = vmatprep.subr.bf16.mxu0 %v5248_v15  ;;  %683 = vmatprep.mubr.bf16.mxu1 %v10676_v0 }
  0xc3   :  { %914 = vmatpush1.bf16.msra.mxu1 %v5243_v21 }
  0xc4   :  { %915 = vmatprep.subr.bf16.mxu1 %v5252_v25 }
  0xc5   :  { %634 = vmatpush1.bf16.msra.mxu0 %v5247_v17 }
  0xc6   :  { %772 = vmatprep.subr.bf16.mxu0 %v5242_v30 }
  0xc7   :  { %916 = vmatpush1.bf16.msra.mxu1 %v5251_v26 }
  0xc8   :  { %5254 = vmatmul.mubr.msk.bf16.gmra.mrb[4].mxu0 %vm456_vm0, %v7034_v22  ;;  %5266 = vmatmul.mubr.msk.bf16.gmra.mrb[4].mxu1 %vm456_vm0, %v7040_v31 }
  0xc9   :  { %542 = vmatprep.mubr.bf16.mxu0 %v10676_v0  ;;  %693 = vmatprep.mubr.bf16.mxu1 %v10676_v0 }
  0xd0   :  { %5255 = vmatmul.mubr.msk.bf16.gmra.mrb[8].mxu0 %vm456_vm0, %v7040_v31  ;;  %5267 = vmatmul.mubr.msk.bf16.gmra.mrb[8].mxu1 %vm456_vm0, %v7048_v32 }
  0xd1   :  { %552 = vmatprep.mubr.bf16.mxu0 %v10676_v0  ;;  %703 = vmatprep.mubr.bf16.mxu1 %v10676_v0 }
  0xd8   :  { %5256 = vmatmul.mubr.msk.bf16.gmra.mrb[12].mxu0 %vm456_vm0, %v7048_v32  ;;  %5268 = vmatmul.mubr.msk.bf16.gmra.mrb[12].mxu1 %vm456_vm0, %v7056_v33 }
  0xd9   :  { %562 = vmatprep.mubr.bf16.mxu0 %v10676_v0  ;;  %713 = vmatprep.mubr.bf16.mxu1 %v10676_v0 }
  0xe0   :  { %5257 = vmatmul.mubr.msk.bf16.gmra.mrb[16].mxu0 %vm456_vm0, %v7056_v33  ;;  %5269 = vmatmul.mubr.msk.bf16.gmra.mrb[16].mxu1 %vm456_vm0, %v7064_v34 }
  0xe1   :  { %572 = vmatprep.mubr.bf16.mxu0 %v10676_v0  ;;  %723 = vmatprep.mubr.bf16.mxu1 %v10676_v0 }
  0xe8   :  { %5258 = vmatmul.mubr.msk.bf16.gmra.mrb[20].mxu0 %vm456_vm0, %v7064_v34  ;;  %5270 = vmatmul.mubr.msk.bf16.gmra.mrb[20].mxu1 %vm456_vm0, %v7072_v35 }
  0xe9   :  { %582 = vmatprep.mubr.bf16.mxu0 %v10676_v0  ;;  %733 = vmatprep.mubr.bf16.mxu1 %v10676_v0 }
  0xf0   :  { %5259 = vmatmul.mubr.msk.bf16.gmra.mrb[24].mxu0 %vm456_vm0, %v7072_v35  ;;  %5271 = vmatmul.mubr.msk.bf16.gmra.mrb[24].mxu1 %vm456_vm0, %v7082_v36 }
  0xf1   :  { %592 = vmatprep.mubr.bf16.mxu0 %v10676_v0  ;;  %743 = vmatprep.mubr.bf16.mxu1 %v10676_v0 }
  0xf8   :  { %5260 = vmatmul.mubr.msk.bf16.gmra.mrb[28].mxu0 %vm456_vm0, %v7082_v36  ;;  %5272 = vmatmul.mubr.msk.bf16.gmra.mrb[28].mxu1 %vm456_vm0, %v7088_v37 }
  0xf9   :  { %602 = vmatprep.mubr.bf16.mxu0 %v10676_v0  ;;  %753 = vmatprep.mubr.bf16.mxu1 %v10676_v0 }
 0x100   :  { %5261 = vmatmul.mubr.msk.bf16.gmra.mrb[32].mxu0 %vm456_vm0, %v7088_v37  ;;  %5273 = vmatmul.mubr.msk.bf16.gmra.mrb[32].mxu1 %vm456_vm0, %v7096_v38 }
 0x101   :  { %612 = vmatprep.mubr.bf16.mxu0 %v10676_v0  ;;  %763 = vmatprep.mubr.bf16.mxu1 %v10676_v0 }
 0x108   :  { %5262 = vmatmul.mubr.msk.bf16.gmra.mrb[36].mxu0 %vm456_vm0, %v7096_v38  ;;  %5274 = vmatmul.mubr.msk.bf16.gmra.mrb[36].mxu1 %vm456_vm0, %v7104_v39 }
 0x109   :  { %622 = vmatprep.mubr.bf16.mxu0 %v10676_v0  ;;  %945 = vmatprep.mubr.bf16.mxu1 %v10676_v0 }
 0x110   :  { %5263 = vmatmul.mubr.msk.bf16.gmra.mrb[40].mxu0 %vm456_vm0, %v7104_v39  ;;  %5286 = vmatmul.mubr.msk.bf16.vlgmr.msra.gmra.mrb[40].mxu1 %vm456_vm0, %v7030_v19 }
 0x111   :  { %663 = vmatprep.mubr.bf16.mxu0 %v10676_v0  ;;  %955 = vmatprep.mubr.bf16.mxu1 %v10676_v0 }
 0x118   :  { %5264 = vmatmul.mubr.msk.bf16.vlgmr.msra.gmra.mrb[44].mxu0 %vm456_vm0, %v7030_v19  ;;  %5287 = vmatmul.mubr.msk.bf16.gmra.mrb[44].mxu1 %vm456_vm0, %v7034_v22 }
 0x119   :  { %773 = vmatpush1.bf16.msra.mxu0 %v5241_v29  ;;  %804 = vmatprep.mubr.bf16.mxu0 %v10676_v0  ;;  %v7267_v29 = vshrl.u32 %v10675_v23, 7 }
 0x11a   :  { %774 = vmatprep.subr.bf16.mxu0 %v5250_v42  ;;  %965 = vmatprep.mubr.bf16.mxu1 %v10676_v0  ;;  %v281_v42 = vld [vmem:[#allocation11] sm:$0xff] }
 0x11b   :  { %10999 = vst [vmem:[#allocation32_spill] sm:$0xff] %v7267_v29  ;;  %v7274_v41 = vsub.s32 0, %v7267_v29  ;;  %v7295_v4 = vsub.s32 1, %v7267_v29  ;;  %v7305_v23 = vsub.s32 3, %v7267_v29 }
 0x11d   :  { %775 = vmatpush1.bf16.msra.mxu0 %v5249_v43  ;;  %11000 = vst [vmem:[#allocation33_spill] sm:$0xff] %v7274_v41  ;;  %v7292_v3 = vrot.slane %v281_v42, %v7274_v41  ;;  %11003 = vst [vmem:[#allocation36_spill] sm:$0xff] %v7295_v4 }
 0x11e   :  { %1192 = vmatprep.subr.bf16.mxu0 %v5298_v47  ;;  %11007 = vst [vmem:[#allocation40_spill] sm:$0xff] %v7305_v23 }
 0x120   :  { %5275 = vmatmul.mubr.msk.bf16.vlgmr.msra.gmra.mrb[48].mxu0 %vm456_vm0, %v7030_v19  ;;  %5288 = vmatmul.mubr.msk.bf16.gmra.mrb[48].mxu1 %vm456_vm0, %v7040_v31 }
 0x121   :  { %814 = vmatprep.mubr.bf16.mxu0 %v10676_v0  ;;  %975 = vmatprep.mubr.bf16.mxu1 %v10676_v0 }
 0x122   :  { %1193 = vmatpush1.bf16.msra.mxu0 %v5297_v46 }
 0x123   :  { %1194 = vmatprep.subr.bf16.mxu0 %v5306_v10 }
 0x126   :  { %1195 = vmatpush1.bf16.msra.mxu0 %v5305_v7 }
 0x128   :  { %5276 = vmatmul.mubr.msk.bf16.gmra.mrb[52].mxu0 %vm456_vm0, %v7034_v22  ;;  %5289 = vmatmul.mubr.msk.bf16.gmra.mrb[52].mxu1 %vm456_vm0, %v7048_v32 }
 0x129   :  { %824 = vmatprep.mubr.bf16.mxu0 %v10676_v0  ;;  %985 = vmatprep.mubr.bf16.mxu1 %v10676_v0 }
 0x130   :  { %5277 = vmatmul.mubr.msk.bf16.gmra.mrb[56].mxu0 %vm456_vm0, %v7040_v31  ;;  %5290 = vmatmul.mubr.msk.bf16.gmra.mrb[56].mxu1 %vm456_vm0, %v7056_v33 }
 0x131   :  { %834 = vmatprep.mubr.bf16.mxu0 %v10676_v0  ;;  %995 = vmatprep.mubr.bf16.mxu1 %v10676_v0 }
 0x138   :  { %5278 = vmatmul.mubr.msk.bf16.gmra.mrb[60].mxu0 %vm456_vm0, %v7048_v32  ;;  %5291 = vmatmul.mubr.msk.bf16.gmra.mrb[60].mxu1 %vm456_vm0, %v7064_v34 }
 0x139   :  { %844 = vmatprep.mubr.bf16.mxu0 %v10676_v0  ;;  %1005 = vmatprep.mubr.bf16.mxu1 %v10676_v0 }
 0x140   :  { %5279 = vmatmul.mubr.msk.bf16.gmra.mrb[64].mxu0 %vm456_vm0, %v7056_v33  ;;  %5292 = vmatmul.mubr.msk.bf16.gmra.mrb[64].mxu1 %vm456_vm0, %v7072_v35 }
 0x141   :  { %854 = vmatprep.mubr.bf16.mxu0 %v10676_v0  ;;  %1015 = vmatprep.mubr.bf16.mxu1 %v10676_v0 }
 0x148   :  { %5280 = vmatmul.mubr.msk.bf16.gmra.mrb[68].mxu0 %vm456_vm0, %v7064_v34  ;;  %5293 = vmatmul.mubr.msk.bf16.gmra.mrb[68].mxu1 %vm456_vm0, %v7082_v36 }
 0x149   :  { %864 = vmatprep.mubr.bf16.mxu0 %v10676_v0  ;;  %1025 = vmatprep.mubr.bf16.mxu1 %v10676_v0 }
 0x150   :  { %5281 = vmatmul.mubr.msk.bf16.gmra.mrb[72].mxu0 %vm456_vm0, %v7072_v35  ;;  %5294 = vmatmul.mubr.msk.bf16.gmra.mrb[72].mxu1 %vm456_vm0, %v7088_v37 }
 0x151   :  { %874 = vmatprep.mubr.bf16.mxu0 %v10676_v0  ;;  %1035 = vmatprep.mubr.bf16.mxu1 %v10676_v0 }
 0x158   :  { %5282 = vmatmul.mubr.msk.bf16.gmra.mrb[76].mxu0 %vm456_vm0, %v7082_v36  ;;  %5295 = vmatmul.mubr.msk.bf16.gmra.mrb[76].mxu1 %vm456_vm0, %v7096_v38  ;;  %v7344_v36 = vrot.slane %v281_v42, %v7305_v23 }
 0x159   :  { %884 = vmatprep.mubr.bf16.mxu0 %v10676_v0  ;;  %1045 = vmatprep.mubr.bf16.mxu1 %v10676_v0 }
 0x160   :  { %5283 = vmatmul.mubr.msk.bf16.gmra.mrb[80].mxu0 %vm456_vm0, %v7088_v37  ;;  %5296 = vmatmul.mubr.msk.bf16.gmra.mrb[80].mxu1 %vm456_vm0, %v7104_v39 }
 0x161   :  { %894 = vmatprep.mubr.bf16.mxu0 %v10676_v0  ;;  %1365 = vmatprep.mubr.bf16.mxu1 %v10676_v0 }
 0x168   :  { %5284 = vmatmul.mubr.msk.bf16.gmra.mrb[84].mxu0 %vm456_vm0, %v7096_v38  ;;  %v7318_v38 = vrot.slane %v281_v42, %v7295_v4 }
 0x169   :  { %904 = vmatprep.mubr.bf16.mxu0 %v10676_v0 }
 0x170   :  { %5285 = vmatmul.mubr.msk.bf16.gmra.mrb[88].mxu0 %vm456_vm0, %v7104_v39  ;;  %v7311_v39 = vsub.s32 5, %v7267_v29 }
 0x171   :  { %1224 = vmatprep.mubr.bf16.mxu0 %v10676_v0 }
 0x172   :  { %11009 = vst [vmem:[#allocation42_spill] sm:$0xff] %v7311_v39 }
 0x178   :  { %5313 = vmatmul.mubr.msk.bf16.vlgmr.msra.gmra.mrb[92].mxu0 %vm456_vm0, %v7030_v19 }
 0x179   :  { %1234 = vmatprep.mubr.bf16.mxu0 %v10676_v0 }
 0x180   :  { %5314 = vmatmul.mubr.msk.bf16.gmra.mrb[96].mxu0 %vm456_vm0, %v7034_v22 }
 0x181   :  { %1244 = vmatprep.mubr.bf16.mxu0 %v10676_v0 }
 0x188   :  { %5315 = vmatmul.mubr.msk.bf16.gmra.mrb[100].mxu0 %vm456_vm0, %v7040_v31  ;;  %v7300_v31 = vsub.s32 2, %v7267_v29 }
 0x189   :  { %1254 = vmatprep.mubr.bf16.mxu0 %v10676_v0  ;;  %v7308_v0 = vsub.s32 4, %v7267_v29 }
 0x18a   :  { %11005 = vst [vmem:[#allocation38_spill] sm:$0xff] %v7300_v31 }
 0x18b   :  { %11008 = vst [vmem:[#allocation41_spill] sm:$0xff] %v7308_v0  ;;  %v7364_v23 = vrot.slane %v281_v42, %v7308_v0 }
 0x18d   :  { %11024 = vst [vmem:[#allocation56_spill] sm:$0xff] %v7364_v23 }
 0x190   :  { %5316 = vmatmul.mubr.msk.bf16.gmra.mrb[104].mxu0 %vm456_vm0, %v7048_v32 }
 0x193   :  { %v7184_v48 = vpop.f32.mrb[0].mxu0  ;;  %v7190_v51 = vpop.f32.mrb[0].mxu1 }
 0x194   :  { %v7186_v49 = vpop.f32.mrb[1].mxu0  ;;  %v7194_v53 = vpop.f32.mrb[1].mxu1  ;;  %v7315_v41 = vadd.f32 %v7184_v48, %v7292_v3 }
 0x195   :  { %v7188_v50 = vpop.f32.mrb[2].mxu0  ;;  %v7196_v54 = vpop.f32.mrb[2].mxu1 }
 0x196   :  { %v7192_v52 = vpop.f32.mrb[3].mxu0  ;;  %v7198_v55 = vpop.f32.mrb[3].mxu1  ;;  %11010 = vst [vmem:[#allocation43_spill] sm:$0xff] %v7315_v41 }
 0x19b   :  { %v7200_v56 = vpop.f32.mrb[4].mxu0  ;;  %v7206_v59 = vpop.f32.mrb[4].mxu1 }
 0x19c   :  { %v7202_v57 = vpop.f32.mrb[5].mxu0  ;;  %v7210_v61 = vpop.f32.mrb[5].mxu1  ;;  %v7337_v48 = vadd.f32 %v7200_v56, %v7292_v3 }
 0x19d   :  { %v7204_v58 = vpop.f32.mrb[6].mxu0  ;;  %v7212_v62 = vpop.f32.mrb[6].mxu1  ;;  %v7341_v4 = vadd.f32 %v7202_v57, %v7318_v38 }
 0x19e   :  { %v7208_v60 = vpop.f32.mrb[7].mxu0  ;;  %v7214_v63 = vpop.f32.mrb[7].mxu1  ;;  %11015 = vst [vmem:[#allocation48_spill] sm:$0xff] %v7337_v48  ;;  %v7353_v32 = vadd.f32 %v7204_v58, %v7292_v3  ;;  %v7375_v58 = vadd.f32 %v7186_v49, %v7318_v38 }
 0x19f   :  { %11016 = vst [vmem:[#allocation49_spill] sm:$0xff] %v7341_v4  ;;  %v7357_v56 = vadd.f32 %v7208_v60, %v7318_v38 }
 0x1a0   :  { %11020 = vst [vmem:[#allocation52_spill] sm:$0xff] %v7353_v32  ;;  %11026 = vst [vmem:[#allocation58_spill] sm:$0xff] %v7375_v58 }
 0x1a1   :  { %11021 = vst [vmem:[#allocation53_spill] sm:$0xff] %v7357_v56 }
 0x1a3   :  { %v7216_v1 = vpop.f32.mrb[8].mxu0  ;;  %v7222_v6 = vpop.f32.mrb[8].mxu1 }
 0x1a4   :  { %v7218_v2 = vpop.f32.mrb[9].mxu0  ;;  %v7226_v9 = vpop.f32.mrb[9].mxu1  ;;  %v7395_v49 = vadd.f32 %v7216_v1, %v7292_v3 }
 0x1a5   :  { %v7220_v5 = vpop.f32.mrb[10].mxu0  ;;  %v7228_v11 = vpop.f32.mrb[10].mxu1 }
 0x1a6   :  { %v7224_v8 = vpop.f32.mrb[11].mxu0  ;;  %v7230_v12 = vpop.f32.mrb[11].mxu1  ;;  %11031 = vst [vmem:[#allocation63_spill] sm:$0xff] %v7395_v49 }
 0x1ab   :  { %v7232_v13 = vpop.f32.mrb[12].mxu0  ;;  %v7240_v16 = vpop.f32.mrb[12].mxu1 }
 0x1ac   :  { %v7234_v14 = vpop.f32.mrb[13].mxu0  ;;  %v7245_v18 = vpop.f32.mrb[13].mxu1 }
 0x1ad   :  { %v7238_v15 = vpop.f32.mrb[14].mxu0  ;;  %v7247_v20 = vpop.f32.mrb[14].mxu1 }
 0x1ae   :  { %v7243_v17 = vpop.f32.mrb[15].mxu0  ;;  %v7249_v21 = vpop.f32.mrb[15].mxu1 }
 0x1b3   :  { %v7251_v24 = vpop.f32.mrb[16].mxu0  ;;  %v7259_v26 = vpop.f32.mrb[16].mxu1 }
 0x1b4   :  { %v7253_v25 = vpop.f32.mrb[17].mxu0  ;;  %v7264_v28 = vpop.f32.mrb[17].mxu1 }
 0x1b5   :  { %v7257_v19 = vpop.f32.mrb[18].mxu0  ;;  %v7269_v30 = vpop.f32.mrb[18].mxu1 }
 0x1b6   :  { %v7262_v27 = vpop.f32.mrb[19].mxu0  ;;  %v7271_v40 = vpop.f32.mrb[19].mxu1 }
 0x1bb   :  { %v7276_v22 = vpop.f32.mrb[20].mxu0  ;;  %v7284_v45 = vpop.f32.mrb[20].mxu1 }
 0x1bc   :  { %v7278_v43 = vpop.f32.mrb[21].mxu0  ;;  %11001 = vst [vmem:[#allocation34_spill] sm:$0xff] %v7284_v45  ;;  %v7289_v47 = vpop.f32.mrb[21].mxu1 }
 0x1bd   :  { %v7282_v44 = vpop.f32.mrb[22].mxu0  ;;  %11002 = vst [vmem:[#allocation35_spill] sm:$0xff] %v7289_v47  ;;  %v7297_v7 = vpop.f32.mrb[22].mxu1  ;;  %v7329_v47 = vrot.slane %v281_v42, %v7300_v31 }
 0x1be   :  { %v7287_v46 = vpop.f32.mrb[23].mxu0  ;;  %11004 = vst [vmem:[#allocation37_spill] sm:$0xff] %v7297_v7  ;;  %v7302_v10 = vpop.f32.mrb[23].mxu1  ;;  %v7326_v7 = vsub.s32 7, %v7267_v29 }
 0x1bf   :  { %11006 = vst [vmem:[#allocation39_spill] sm:$0xff] %v7302_v10  ;;  %v7323_v10 = vsub.s32 6, %v7267_v29  ;;  %v7391_v0 = vadd.f32 %v7190_v51, %v7329_v47  ;;  %v1773_v51 = vmul.f32 %v7341_v4, %v7341_v4  ;;  %v7413_v1 = vadd.f32 %v7196_v54, %v7329_v47  ;;  %v1060_v4 = vld [vmem:[#allocation12 + $0x30] sm:$0xff] }
 0x1c0   :  { %11013 = vst [vmem:[#allocation46_spill] sm:$0xff] %v7326_v7  ;;  %v7429_v54 = vadd.f32 %v7194_v53, %v7344_v36  ;;  %v7447_v53 = vadd.f32 %v7212_v62, %v7329_v47 }
 0x1c1   :  { %11012 = vst [vmem:[#allocation45_spill] sm:$0xff] %v7323_v10  ;;  %11030 = vst [vmem:[#allocation62_spill] sm:$0xff] %v7391_v0 }
 0x1c2   :  { %11035 = vst [vmem:[#allocation67_spill] sm:$0xff] %v7413_v1  ;;  %11038 = vst [vmem:[#allocation70_spill] sm:$0xff] %v7429_v54 }
 0x1c3   :  { %v7320_v37 = vpop.f32.mrb[24].mxu0  ;;  %v7348_v31 = vpop.f32.mrb[24].mxu1  ;;  %11042 = vst [vmem:[#allocation74_spill] sm:$0xff] %v7447_v53 }
 0x1c4   :  { %11011 = vst [vmem:[#allocation44_spill] sm:$0xff] %v7320_v37  ;;  %v7331_v45 = vpop.f32.mrb[25].mxu0  ;;  %11018 = vst [vmem:[#allocation51_spill] sm:$0xff] %v7348_v31  ;;  %v11019_v37 = vmov 0   ;;  %v7361_v57 = vpop.f32.mrb[25].mxu1  ;;  %v7371_v31 = vmul.f32 %v7315_v41, %v7315_v41  ;;  %v7399_v41 = vadd.f32 %v7218_v2, %v7318_v38  ;;  %v1780_v2 = vmul.f32 %v7353_v32, %v7353_v32 }
 0x1c5   :  { %11014 = vst [vmem:[#allocation47_spill] sm:$0xff] %v7331_v45  ;;  %v7346_v29 = vpop.f32.mrb[26].mxu0  ;;  %1264 = vmatprep.mubr.bf16.mxu0 %v11019_v37  ;;  %11023 = vst [vmem:[#allocation55_spill] sm:$0xff] %v7361_v57  ;;  %v7377_v60 = vpop.f32.mrb[26].mxu1  ;;  %v7383_v57 = vrot.slane %v281_v42, %v7326_v7  ;;  %v1781_v7 = vmul.f32 %v7357_v56, %v7357_v56  ;;  %v7433_v32 = vadd.f32 %v7198_v55, %v7344_v36 }
 0x1c6   :  { %11017 = vst [vmem:[#allocation50_spill] sm:$0xff] %v7346_v29  ;;  %v7359_v45 = vpop.f32.mrb[27].mxu0  ;;  %v7367_v29 = vrot.slane %v281_v42, %v7311_v39  ;;  %v7387_v39 = vadd.f32 %v7188_v50, %v7292_v3  ;;  %11032 = vst [vmem:[#allocation64_spill] sm:$0xff] %v7399_v41  ;;  %v1772_v50 = vmul.f32 %v7337_v48, %v7337_v48  ;;  %5317 = vmatmul.mubr.msk.bf16.gmra.mrb[108].mxu0 %vm456_vm0, %v7056_v33 }
 0x1c7   :  { %11022 = vst [vmem:[#allocation54_spill] sm:$0xff] %v7359_v45  ;;  %v7380_v45 = vrot.slane %v281_v42, %v7323_v10  ;;  %11028 = vst [vmem:[#allocation60_spill] sm:$0xff] %v7383_v57  ;;  %v7401_v10 = vpop.f32.mrb[27].mxu1  ;;  %v7405_v42 = vadd.f32 %v7192_v52, %v7318_v38  ;;  %v7421_v52 = vadd.f32 %v7220_v5, %v7292_v3  ;;  %v1056_v57 = vld [vmem:[#allocation12 + $0x10] sm:$0xff]  ;;  %1274 = vmatprep.mubr.bf16.mxu0 %v11019_v37 }
 0x1c8   :  { %11025 = vst [vmem:[#allocation57_spill] sm:$0xff] %v7367_v29  ;;  %11029 = vst [vmem:[#allocation61_spill] sm:$0xff] %v7387_v39  ;;  %v7425_v48 = vadd.f32 %v7224_v8, %v7318_v38  ;;  %v7437_v56 = vadd.f32 %v7206_v59, %v7329_v47  ;;  %v5301_v29 = vcombine.low %v1056_v57, %v1060_v4 }
 0x1c9   :  { %11027 = vst [vmem:[#allocation59_spill] sm:$0xff] %v7380_v45  ;;  %11033 = vst [vmem:[#allocation65_spill] sm:$0xff] %v7401_v10  ;;  %v1788_v8 = vmul.f32 %v7395_v49, %v7395_v49  ;;  %v1789_v45 = vmul.f32 %v7399_v41, %v7399_v41  ;;  %v5302_v55 = vcombine.high %v1056_v57, %v1060_v4 }
 0x1ca   :  { %11034 = vst [vmem:[#allocation66_spill] sm:$0xff] %v7405_v42  ;;  %11036 = vst [vmem:[#allocation68_spill] sm:$0xff] %v7421_v52  ;;  %v1757_v59 = vmul.f32 %v7375_v58, %v7375_v58  ;;  %v1774_v49 = vmul.f32 %v7391_v0, %v7391_v0  ;;  %v1782_v41 = vmul.f32 %v7413_v1, %v7413_v1 }
 0x1cb   :  { %11037 = vst [vmem:[#allocation69_spill] sm:$0xff] %v7425_v48  ;;  %11039 = vst [vmem:[#allocation71_spill] sm:$0xff] %v7433_v32  ;;  %v7439_v5 = vpop.f32.mrb[28].mxu0  ;;  %v7463_v10 = vpop.f32.mrb[28].mxu1  ;;  %v1942_v4 = vadd.f32 %v1773_v51, %v1772_v50  ;;  %v1951_v33 = vadd.f32 %v1781_v7, %v1780_v2  ;;  %v1796_v57 = vmul.f32 %v7421_v52, %v7421_v52  ;;  %1474 = vmatprep.subr.bf16.mxu0 %v5302_v55 }
 0x1cc   :  { %11040 = vst [vmem:[#allocation72_spill] sm:$0xff] %v7437_v56  ;;  %11041 = vst [vmem:[#allocation73_spill] sm:$0xff] %v7439_v5  ;;  %v7449_v23 = vpop.f32.mrb[29].mxu0  ;;  %v1764_v5 = vmul.f32 %v7387_v39, %v7387_v39  ;;  %v1797_v39 = vmul.f32 %v7425_v48, %v7425_v48  ;;  %v7472_v0 = vpop.f32.mrb[29].mxu1  ;;  %v1765_v1 = vmul.f32 %v7405_v42, %v7405_v42  ;;  %1475 = vmatpush1.bf16.msra.mxu0 %v5301_v29 }
 0x1cd   :  { %v7461_v62 = vpop.f32.mrb[30].mxu0  ;;  %11043 = vst [vmem:[#allocation75_spill] sm:$0xff] %v7463_v10  ;;  %v1775_v10 = vmul.f32 %v7429_v54, %v7429_v54  ;;  %v1783_v7 = vmul.f32 %v7433_v32, %v7433_v32  ;;  %v7482_v50 = vadd.f32 %v7210_v61, %v7344_v36  ;;  %v7484_v51 = vpop.f32.mrb[30].mxu1  ;;  %v1960_v2 = vadd.f32 %v1789_v45, %v1788_v8 }
 0x1ce   :  { %v7470_v58 = vpop.f32.mrb[31].mxu0  ;;  %v1790_v55 = vmul.f32 %v7437_v56, %v7437_v56  ;;  %v1798_v52 = vmul.f32 %v7447_v53, %v7447_v53  ;;  %v7492_v48 = vadd.f32 %v7214_v63, %v7344_v36  ;;  %v7494_v54 = vpop.f32.mrb[31].mxu1  ;;  %v7498_v61 = vadd.f32 %v7232_v13, %v7292_v3  ;;  %5318 = vmatmul.mubr.msk.bf16.gmra.mrb[112].mxu0 %vm456_vm0, %v7064_v34 }
 0x1cf   :  { %11044 = vst [vmem:[#allocation76_spill] sm:$0xff] %v7482_v50  ;;  %v7502_v29 = vadd.f32 %v7234_v14, %v7318_v38  ;;  %v7506_v45 = vadd.f32 %v7238_v15, %v7292_v3  ;;  %v7510_v8 = vadd.f32 %v7243_v17, %v7318_v38  ;;  %v1943_v63 = vadd.f32 %v1942_v4, %v1774_v49 }
 0x1d0   :  { %11045 = vst [vmem:[#allocation77_spill] sm:$0xff] %v7492_v48  ;;  %11046 = vst [vmem:[#allocation78_spill] sm:$0xff] %v7498_v61  ;;  %v1952_v53 = vadd.f32 %v1951_v33, %v1782_v41  ;;  %v1969_v56 = vadd.f32 %v1797_v39, %v1796_v57  ;;  %v7514_v32 = vadd.f32 %v7222_v6, %v7329_v47  ;;  %1284 = vmatprep.mubr.bf16.mxu0 %v11019_v37 }
 0x1d1   :  { %11047 = vst [vmem:[#allocation79_spill] sm:$0xff] %v7502_v29  ;;  %11048 = vst [vmem:[#allocation80_spill] sm:$0xff] %v7506_v45  ;;  %v7517_v13 = vadd.f32 %v1757_v59, %v7371_v31  ;;  %v7519_v14 = vadd.f32 %v1765_v1, %v1764_v5  ;;  %v1791_v15 = vmul.f32 %v7482_v50, %v7482_v50 }
 0x1d2   :  { %11049 = vst [vmem:[#allocation81_spill] sm:$0xff] %v7510_v8  ;;  %11050 = vst [vmem:[#allocation82_spill] sm:$0xff] %v7514_v32  ;;  %v7525_v42 = vadd.f32 %v7226_v9, %v7344_v36  ;;  %v1961_v41 = vadd.f32 %v1960_v2, %v1790_v55  ;;  %v1799_v39 = vmul.f32 %v7492_v48, %v7492_v48 }
 0x1d3   :  { %v7527_v17 = vpop.f32.mrb[32].mxu0  ;;  %v7533_v6 = vadd.f32 %v7228_v11, %v7329_v47  ;;  %v7537_v31 = vadd.f32 %v7230_v12, %v7344_v36  ;;  %v1804_v9 = vmul.f32 %v7498_v61, %v7498_v61  ;;  %v1805_v1 = vmul.f32 %v7502_v29, %v7502_v29  ;;  %v7553_v12 = vpop.f32.mrb[32].mxu1 }
 0x1d4   :  { %11051 = vst [vmem:[#allocation83_spill] sm:$0xff] %v7525_v42  ;;  %v7539_v49 = vpop.f32.mrb[33].mxu0  ;;  %v1812_v5 = vmul.f32 %v7506_v45, %v7506_v45  ;;  %v1813_v11 = vmul.f32 %v7510_v8, %v7510_v8  ;;  %v7556_v4 = vadd.f32 %v1943_v63, %v1775_v10  ;;  %v7558_v34 = vadd.f32 %v1952_v53, %v1783_v7  ;;  %v7564_v55 = vpop.f32.mrb[33].mxu1  ;;  %v1064_v45 = vld [vmem:[#allocation12 + $0x50] sm:$0xff] }
 0x1d5   :  { %11052 = vst [vmem:[#allocation84_spill] sm:$0xff] %v7533_v6  ;;  %11053 = vst [vmem:[#allocation85_spill] sm:$0xff] %v7537_v31  ;;  %v7551_v59 = vpop.f32.mrb[34].mxu0  ;;  %v1970_v33 = vadd.f32 %v1969_v56, %v1798_v52  ;;  %v1806_v57 = vmul.f32 %v7514_v32, %v7514_v32  ;;  %v1068_v8 = vld [vmem:[#allocation12 + $0x70] sm:$0xff]  ;;  %v1807_v61 = vmul.f32 %v7525_v42, %v7525_v42  ;;  %v7580_v52 = vpop.f32.mrb[34].mxu1 }
 0x1d6   :  { %v7562_v2 = vpop.f32.mrb[35].mxu0  ;;  %11055 = vst [vmem:[#allocation87_spill] sm:$0xff] %v7564_v55  ;;  %v7570_v29 = vadd.f32 %v7251_v24, %v7292_v3  ;;  %v7574_v10 = vadd.f32 %v7253_v25, %v7318_v38  ;;  %v7578_v56 = vadd.f32 %v7257_v19, %v7292_v3  ;;  %11059 = vst [vmem:[#allocation91_spill] sm:$0xff] %v7580_v52  ;;  %v7592_v25 = vpop.f32.mrb[35].mxu1  ;;  %5319 = vmatmul.mubr.msk.bf16.gmra.mrb[116].mxu0 %vm456_vm0, %v7072_v35 }
 0x1d7   :  { %11054 = vst [vmem:[#allocation86_spill] sm:$0xff] %v7562_v2  ;;  %v7582_v53 = vadd.f32 %v1961_v41, %v1791_v15  ;;  %v1814_v7 = vmul.f32 %v7533_v6, %v7533_v6  ;;  %v1815_v63 = vmul.f32 %v7537_v31, %v7537_v31  ;;  %v7590_v24 = vadd.f32 %v7262_v27, %v7318_v38 }
 0x1d8   :  { %11056 = vst [vmem:[#allocation88_spill] sm:$0xff] %v7570_v29  ;;  %11057 = vst [vmem:[#allocation89_spill] sm:$0xff] %v7574_v10  ;;  %v1978_v32 = vadd.f32 %v1805_v1, %v1804_v9  ;;  %v1987_v42 = vadd.f32 %v1813_v11, %v1812_v5  ;;  %v5309_v19 = vcombine.low %v1064_v45, %v1068_v8  ;;  %v6828_v5 = vmov 1983009808   ;;  %1294 = vmatprep.mubr.bf16.mxu0 %v11019_v37 }
 0x1d9   :  { %11058 = vst [vmem:[#allocation90_spill] sm:$0xff] %v7578_v56  ;;  %11060 = vst [vmem:[#allocation92_spill] sm:$0xff] %v7590_v24  ;;  %v7594_v48 = vadd.f32 %v1970_v33, %v1799_v39  ;;  %v7598_v15 = vadd.f32 %v7240_v16, %v7329_v47  ;;  %v7602_v41 = vadd.f32 %v7245_v18, %v7344_v36  ;;  %v173_v11 = vunpack.c.l.s4 %v6828_v5 }
 0x1da   :  { %11061 = vst [vmem:[#allocation93_spill] sm:$0xff] %v7592_v25  ;;  %v5310_v6 = vcombine.high %v1064_v45, %v1068_v8  ;;  %v1820_v27 = vmul.f32 %v7570_v29, %v7570_v29  ;;  %v1821_v31 = vmul.f32 %v7574_v10, %v7574_v10  ;;  %v1828_v9 = vmul.f32 %v7578_v56, %v7578_v56  ;;  %v11091_v10 = vld [vmem:[#allocation35_spill] sm:$0xff] }
 0x1db   :  { %11062 = vst [vmem:[#allocation94_spill] sm:$0xff] %v7598_v15  ;;  %11063 = vst [vmem:[#allocation95_spill] sm:$0xff] %v7602_v41  ;;  %v7612_v39 = vadd.f32 %v7247_v20, %v7329_v47  ;;  %v7614_v16 = vpop.f32.mrb[36].mxu0  ;;  %v1829_v18 = vmul.f32 %v7590_v24, %v7590_v24  ;;  %v7620_v45 = vadd.f32 %v7276_v22, %v7292_v3  ;;  %v7636_v24 = vpop.f32.mrb[36].mxu1 }
 0x1dc   :  { %11065 = vst [vmem:[#allocation97_spill] sm:$0xff] %v7614_v16  ;;  %v7624_v8 = vadd.f32 %v7278_v43, %v7318_v38  ;;  %v7626_v1 = vpop.f32.mrb[37].mxu0  ;;  %1476 = vmatprep.subr.bf16.mxu0 %v5310_v6  ;;  %v1979_v20 = vadd.f32 %v1978_v32, %v1806_v57  ;;  %v1988_v33 = vadd.f32 %v1987_v42, %v1814_v7  ;;  %11071 = vst [vmem:[#allocation103_spill] sm:$0xff] %v7636_v24  ;;  %v7655_v42 = vpop.f32.mrb[37].mxu1 }
 0x1dd   :  { %11064 = vst [vmem:[#allocation96_spill] sm:$0xff] %v7612_v39  ;;  %11066 = vst [vmem:[#allocation98_spill] sm:$0xff] %v7620_v45  ;;  %v7632_v56 = vadd.f32 %v7249_v21, %v7344_v36  ;;  %v7634_v22 = vpop.f32.mrb[38].mxu0  ;;  %1477 = vmatpush1.bf16.msra.mxu0 %v5309_v19  ;;  %v1822_v43 = vmul.f32 %v7598_v15, %v7598_v15  ;;  %v7643_v6 = vadd.f32 %v7282_v44, %v7292_v3 }
 0x1de   :  { %11067 = vst [vmem:[#allocation99_spill] sm:$0xff] %v7624_v8  ;;  %11068 = vst [vmem:[#allocation100_spill] sm:$0xff] %v7626_v1  ;;  %v7647_v35 = vadd.f32 %v7287_v46, %v7318_v38  ;;  %v7651_v21 = vadd.f32 %v7259_v26, %v7329_v47  ;;  %v7653_v32 = vpop.f32.mrb[39].mxu0  ;;  %v1996_v57 = vadd.f32 %v1821_v31, %v1820_v27  ;;  %v769_v46 = vpop.f32.mrb[38].mxu1  ;;  %v174_v31 = vunpack.c.0.s8 %v173_v11 }
 0x1df   :  { %11069 = vst [vmem:[#allocation101_spill] sm:$0xff] %v7632_v56  ;;  %11070 = vst [vmem:[#allocation102_spill] sm:$0xff] %v7634_v22  ;;  %v1823_v7 = vmul.f32 %v7602_v41, %v7602_v41  ;;  %v1830_v44 = vmul.f32 %v7612_v39, %v7612_v39  ;;  %v7663_v19 = vadd.f32 %v7264_v28, %v7344_v36  ;;  %v770_v29 = vpop.f32.mrb[39].mxu1 }
 0x1e0   :  { %11072 = vst [vmem:[#allocation104_spill] sm:$0xff] %v7643_v6  ;;  %11073 = vst [vmem:[#allocation105_spill] sm:$0xff] %v7647_v35  ;;  %v2005_v5 = vadd.f32 %v1829_v18, %v1828_v9  ;;  %v1836_v26 = vmul.f32 %v7620_v45, %v7620_v45  ;;  %v1837_v15 = vmul.f32 %v7624_v8, %v7624_v8  ;;  %v165_v9 = vld [vmem:[#allocation6] sm:$0xff] }
 0x1e1   :  { %11074 = vst [vmem:[#allocation106_spill] sm:$0xff] %v7651_v21  ;;  %11075 = vst [vmem:[#allocation107_spill] sm:$0xff] %v7653_v32  ;;  %v7669_v27 = vadd.f32 %v1979_v20, %v1807_v61  ;;  %v7671_v41 = vadd.f32 %v1988_v33, %v1815_v63  ;;  %v1831_v39 = vmul.f32 %v7632_v56, %v7632_v56  ;;  %v11082_v33 = vld [vmem:[#allocation47_spill] sm:$0xff]  ;;  %v11086_v56 = vld [vmem:[#allocation32_spill] sm:$0xff] }
 0x1e2   :  { %11076 = vst [vmem:[#allocation108_spill] sm:$0xff] %v7655_v42  ;;  %11077 = vst [vmem:[#allocation109_spill] sm:$0xff] %v7663_v19  ;;  %v7677_v28 = vadd.f32 %v7269_v30, %v7329_v47  ;;  %v1844_v18 = vmul.f32 %v7643_v6, %v7643_v6  ;;  %v1845_v46 = vmul.f32 %v7647_v35, %v7647_v35  ;;  %v11080_v30 = vld [vmem:[#allocation44_spill] sm:$0xff]  ;;  %v11097_v42 = vld [vmem:[#allocation50_spill] sm:$0xff] }
 0x1e3   :  { %v1838_v61 = vmul.f32 %v7651_v21, %v7651_v21  ;;  %v7687_v29 = vadd.f32 %v7271_v40, %v7344_v36  ;;  %v1997_v63 = vadd.f32 %v1996_v57, %v1822_v43  ;;  %v1839_v11 = vmul.f32 %v7663_v19, %v7663_v19  ;;  %v7699_v6 = vpop.f32.mrb[40].mxu0  ;;  %v11088_v57 = vld [vmem:[#allocation28_spill] sm:$0xff]  ;;  %v11089_v19 = vld [vmem:[#allocation34_spill] sm:$0xff] }
 0x1e4   :  { %11078 = vst [vmem:[#allocation110_spill] sm:$0xff] %v7677_v28  ;;  %v7693_v20 = vadd.f32 %v11080_v30, %v7292_v3  ;;  %v7697_v45 = vadd.f32 %v11082_v33, %v7318_v38  ;;  %11084 = vst [vmem:[#allocation112_spill] sm:$0xff] %v7699_v6  ;;  %v2006_v35 = vadd.f32 %v2005_v5, %v1830_v44  ;;  %v7701_v8 = vpop.f32.mrb[41].mxu0  ;;  %5320 = vmatmul.mubr.msk.bf16.gmra.mrb[120].mxu0 %vm456_vm0, %v11088_v57 }
 0x1e5   :  { %11079 = vst [vmem:[#allocation111_spill] sm:$0xff] %v7687_v29  ;;  %v2014_v21 = vadd.f32 %v1837_v15, %v1836_v26  ;;  %11085 = vst [vmem:[#allocation113_spill] sm:$0xff] %v7701_v8  ;;  %v167_v40 = vmul.f32 %v165_v9, %v165_v9  ;;  %v7704_v43 = vsub.s32 %v174_v31, %v11086_v56  ;;  %v11093_v15 = vld [vmem:[#allocation37_spill] sm:$0xff]  ;;  %v628_v26 = vpop.f32.mrb[42].mxu0  ;;  %v7722_v31 = vpop.f32.mrb[40].mxu1  ;;  %1304 = vmatprep.mubr.bf16.mxu0 %v11019_v37 }
 0x1e6   :  { %11081 = vst [vmem:[#allocation44_spill] sm:$0xff] %v7693_v20  ;;  %11083 = vst [vmem:[#allocation47_spill] sm:$0xff] %v7697_v45  ;;  %v1846_v30 = vmul.f32 %v7677_v28, %v7677_v28  ;;  %v7712_v33 = vadd.f32 %v11089_v19, %v7329_v47  ;;  %v7716_v44 = vadd.f32 %v11091_v10, %v7344_v36  ;;  %v11095_v19 = vld [vmem:[#allocation39_spill] sm:$0xff]  ;;  %v629_v28 = vpop.f32.mrb[43].mxu0  ;;  %v7731_v10 = vpop.f32.mrb[41].mxu1 }
 0x1e7   :  { %11087 = vst [vmem:[#allocation114_spill] sm:$0xff] %v7704_v43  ;;  %v7720_v5 = vadd.f32 %v11093_v15, %v7329_v47  ;;  %v2023_v9 = vadd.f32 %v1845_v46, %v1844_v18  ;;  %v1847_v57 = vmul.f32 %v7687_v29, %v7687_v29  ;;  %v7729_v56 = vadd.f32 %v11095_v19, %v7344_v36  ;;  %v11099_v46 = vld [vmem:[#allocation54_spill] sm:$0xff]  ;;  %v7745_v19 = vpop.f32.mrb[42].mxu1 }
 0x1e8   :  { %11090 = vst [vmem:[#allocation28_spill] sm:$0xff] %v7712_v33  ;;  %11092 = vst [vmem:[#allocation34_spill] sm:$0xff] %v7716_v44  ;;  %v171_v50 = vcombine.high %v167_v40, %v167_v40  ;;  %v1852_v15 = vmul.f32 %v7693_v20, %v7693_v20  ;;  %v1853_v26 = vmul.f32 %v7697_v45, %v7697_v45  ;;  %v166_v28 = vld [vmem:[#allocation6 + $0x8] sm:$0xff]  ;;  %v7751_v20 = vpop.f32.mrb[43].mxu1 }
 0x1e9   :  { %11094 = vst [vmem:[#allocation35_spill] sm:$0xff] %v7720_v5  ;;  %11096 = vst [vmem:[#allocation37_spill] sm:$0xff] %v7729_v56  ;;  %v7739_v18 = vadd.f32 %v11097_v42, %v7292_v3  ;;  %v7743_v29 = vadd.f32 %v11099_v46, %v7318_v38  ;;  %v7747_v8 = vadd.f32 %v1997_v63, %v1823_v7 }
 0x1ea   :  { %v7749_v6 = vadd.f32 %v2006_v35, %v1831_v39  ;;  %v2015_v24 = vadd.f32 %v2014_v21, %v1838_v61  ;;  %v178_v45 = vrot.slane %v167_v40, %v7704_v43  ;;  %v1854_v42 = vmul.f32 %v7712_v33, %v7712_v33  ;;  %v11102_v40 = vld [vmem:[#allocation51_spill] sm:$0xff] }
 0x1eb   :  { %11098 = vst [vmem:[#allocation39_spill] sm:$0xff] %v7739_v18  ;;  %11100 = vst [vmem:[#allocation50_spill] sm:$0xff] %v7743_v29  ;;  %v1855_v32 = vmul.f32 %v7716_v44, %v7716_v44  ;;  %v1862_v46 = vmul.f32 %v7720_v5, %v7720_v5  ;;  %v2024_v22 = vadd.f32 %v2023_v9, %v1846_v30  ;;  %v665_v30 = vpop.f32.mrb[44].mxu0  ;;  %v7795_v33 = vpop.f32.mrb[44].mxu1 }
 0x1ec   :  { %11101 = vst [vmem:[#allocation54_spill] sm:$0xff] %v7749_v6  ;;  %v7762_v39 = vmul.f32 %v7729_v56, %v7729_v56  ;;  %v168_v35 = vmul.f32 %v166_v28, %v166_v28  ;;  %v7765_v21 = vrot.slane %v171_v50, %v7704_v43  ;;  %v2032_v7 = vadd.f32 %v1853_v26, %v1852_v15  ;;  %v667_v28 = vpop.f32.mrb[45].mxu0  ;;  %v11106_v26 = vld [vmem:[#allocation29_spill] sm:$0xff]  ;;  %v7806_v1 = vpop.f32.mrb[45].mxu1 }
 0x1ed   :  { %v1860_v61 = vmul.f32 %v7739_v18, %v7739_v18  ;;  %v1861_v63 = vmul.f32 %v7743_v29, %v7743_v29  ;;  %v7773_v5 = vadd.f32 %v11102_v40, %v7329_v47  ;;  %v7775_v9 = vadd.f32 %v2015_v24, %v1839_v11  ;;  %5321 = vmatmul.mubr.msk.bf16.gmra.mrb[124].mxu0 %vm456_vm0, %v11106_v26  ;;  %v11107_v18 = vld [vmem:[#allocation55_spill] sm:$0xff]  ;;  %v11110_v24 = vld [vmem:[#allocation65_spill] sm:$0xff] }
 0x1ee   :  { %v7778_v56 = vadd.f32 %v665_v30, %v7329_v47  ;;  %v186_v50 = vcombine.high %v178_v45, %v178_v45  ;;  %v214_v15 = vsel %vm10953_vm1, %v178_v45, 0.0  ;;  %v7785_v29 = vadd.f32 %v11107_v18, %v7344_v36  ;;  %v669_v30 = vpop.f32.mrb[46].mxu0  ;;  %1314 = vmatprep.mubr.bf16.mxu0 %v11019_v37 }
 0x1ef   :  { %11103 = vst [vmem:[#allocation51_spill] sm:$0xff] %v7773_v5  ;;  %11104 = vst [vmem:[#allocation115_spill] sm:$0xff] %v7775_v9  ;;  %v7789_v40 = vadd.f32 %v7377_v60, %v7329_v47  ;;  %v7793_v11 = vadd.f32 %v11110_v24, %v7344_v36  ;;  %v188_v44 = vcombine.high %v168_v35, %v168_v35  ;;  %v671_v60 = vpop.f32.mrb[47].mxu0 }
 0x1f0   :  { %11105 = vst [vmem:[#allocation116_spill] sm:$0xff] %v7778_v56  ;;  %11108 = vst [vmem:[#allocation29_spill] sm:$0xff] %v7785_v29  ;;  %v1758_v45 = vmul.f32 %v7778_v56, %v7778_v56  ;;  %v7801_v18 = vadd.f32 %v667_v28, %v7344_v36  ;;  %v7804_v26 = vadd.f32 %v669_v30, %v7329_v47  ;;  %v7817_v56 = vpop.f32.mrb[46].mxu1 }
 0x1f1   :  { %11109 = vst [vmem:[#allocation55_spill] sm:$0xff] %v7789_v40  ;;  %11111 = vst [vmem:[#allocation65_spill] sm:$0xff] %v7793_v11  ;;  %v7809_v24 = vrot.slane %v168_v35, %v7704_v43  ;;  %v7811_v16 = vadd.f32 %v2024_v22, %v1847_v57  ;;  %v2041_v25 = vadd.f32 %v1861_v63, %v1860_v61  ;;  %v7824_v55 = vpop.f32.mrb[47].mxu1  ;;  %v215_v57 = vsel %vm10953_vm1, %v186_v50, 0.0  ;;  %v11122_v22 = vld [vmem:[#allocation59_spill] sm:$0xff] }
 0x1f2   :  { %11112 = vst [vmem:[#allocation117_spill] sm:$0xff] %v7801_v18  ;;  %11113 = vst [vmem:[#allocation118_spill] sm:$0xff] %v7804_v26  ;;  %v2033_v9 = vadd.f32 %v2032_v7, %v1854_v42  ;;  %v7815_v52 = vmul.f32 %v7773_v5, %v7773_v5  ;;  %v1766_v28 = vmul.f32 %v7804_v26, %v7804_v26  ;;  %v11116_v42 = vld [vmem:[#allocation73_spill] sm:$0xff] }
 0x1f3   :  { %11114 = vst [vmem:[#allocation119_spill] sm:$0xff] %v7811_v16  ;;  %v7822_v30 = vadd.f32 %v671_v60, %v7344_v36  ;;  %v7831_v35 = vadd.f32 %v11116_v42, %v7292_v3  ;;  %v7835_v7 = vmul.f32 %v7785_v29, %v7785_v29  ;;  %v7839_v61 = vmul.f32 %v7789_v40, %v7789_v40 }
 0x1f4   :  { %v7843_v63 = vmul.f32 %v7793_v11, %v7793_v11  ;;  %v1925_v60 = vadd.f32 %v7517_v13, %v1758_v45  ;;  %v1759_v50 = vmul.f32 %v7801_v18, %v7801_v18  ;;  %v7849_v42 = vrot.slane %v188_v44, %v7704_v43  ;;  %v806_v11 = vpop.f32.mrb[48].mxu0  ;;  %v11120_v44 = vld [vmem:[#allocation56_spill] sm:$0xff] }
 0x1f5   :  { %11115 = vst [vmem:[#allocation120_spill] sm:$0xff] %v7822_v30  ;;  %11117 = vst [vmem:[#allocation73_spill] sm:$0xff] %v7831_v35  ;;  %v7853_v5 = vadd.f32 %v2033_v9, %v1855_v32  ;;  %v2042_v29 = vadd.f32 %v2041_v25, %v1862_v46  ;;  %v7857_v40 = vadd.f32 %v7449_v23, %v7318_v38  ;;  %v808_v18 = vpop.f32.mrb[49].mxu0  ;;  %v11124_v25 = vld [vmem:[#allocation30_spill] sm:$0xff]  ;;  %v11126_v46 = vld [vmem:[#allocation75_spill] sm:$0xff] }
 0x1f6   :  { %v7859_v26 = vadd.f32 %v215_v57, %v214_v15  ;;  %v1934_v13 = vadd.f32 %v7519_v14, %v1766_v28  ;;  %v1767_v45 = vmul.f32 %v7822_v30, %v7822_v30  ;;  %v7865_v43 = vadd.f32 %v806_v11, %v11120_v44  ;;  %5322 = vmatmul.mubr.msk.bf16.gmra.mrb[128].mxu0 %vm456_vm0, %v11124_v25  ;;  %v11128_v15 = vld [vmem:[#allocation57_spill] sm:$0xff]  ;;  %v810_v28 = vpop.f32.mrb[50].mxu0 }
 0x1f7   :  { %11118 = vst [vmem:[#allocation121_spill] sm:$0xff] %v7853_v5  ;;  %11119 = vst [vmem:[#allocation122_spill] sm:$0xff] %v7857_v40  ;;  %v7869_v32 = vadd.f32 %v7722_v31, %v11122_v22  ;;  %v1868_v23 = vmul.f32 %v7831_v35, %v7831_v35  ;;  %v7877_v14 = vadd.f32 %v7461_v62, %v7292_v3  ;;  %v7886_v31 = vpop.f32.mrb[48].mxu1  ;;  %1324 = vmatprep.mubr.bf16.mxu0 %v11019_v37  ;;  %v812_v62 = vpop.f32.mrb[51].mxu0  ;;  %v11131_v5 = vld [vmem:[#allocation60_spill] sm:$0xff] }
 0x1f8   :  { %11121 = vst [vmem:[#allocation56_spill] sm:$0xff] %v7865_v43  ;;  %v7881_v9 = vadd.f32 %v11126_v46, %v7329_v47  ;;  %v7884_v11 = vadd.f32 %v808_v18, %v11128_v15  ;;  %v1926_v57 = vadd.f32 %v1925_v60, %v1759_v50  ;;  %v1760_v25 = vmul.f32 %v7865_v43, %v7865_v43  ;;  %v7894_v30 = vpop.f32.mrb[49].mxu1 }
 0x1f9   :  { %11123 = vst [vmem:[#allocation59_spill] sm:$0xff] %v7869_v32  ;;  %11125 = vst [vmem:[#allocation30_spill] sm:$0xff] %v7877_v14  ;;  %v7892_v35 = vadd.f32 %v810_v28, %v11120_v44  ;;  %v7902_v16 = vadd.f32 %v7731_v10, %v11131_v5  ;;  %v7905_v60 = vadd.f32 %v812_v62, %v11128_v15  ;;  %v7911_v28 = vpop.f32.mrb[50].mxu1 }
 0x1fa   :  { %11127 = vst [vmem:[#allocation75_spill] sm:$0xff] %v7881_v9  ;;  %11129 = vst [vmem:[#allocation57_spill] sm:$0xff] %v7884_v11  ;;  %v1761_v18 = vmul.f32 %v7884_v11, %v7884_v11  ;;  %v7909_v50 = vadd.f32 %v7745_v19, %v11122_v22  ;;  %v1935_v43 = vadd.f32 %v1934_v13, %v1767_v45  ;;  %v7917_v2 = vpop.f32.mrb[51].mxu1 }
 0x1fb   :  { %11130 = vst [vmem:[#allocation123_spill] sm:$0xff] %v7892_v35  ;;  %11132 = vst [vmem:[#allocation60_spill] sm:$0xff] %v7905_v60  ;;  %v1927_v6 = vadd.f32 %v1926_v57, %v1760_v25  ;;  %v1762_v46 = vmul.f32 %v7869_v32, %v7869_v32  ;;  %v1768_v11 = vmul.f32 %v7892_v35, %v7892_v35  ;;  %v816_v35 = vpop.f32.mrb[52].mxu0 }
 0x1fc   :  { %11133 = vst [vmem:[#allocation124_spill] sm:$0xff] %v7909_v50  ;;  %v7920_v10 = vadd.f32 %v2042_v29, %v7762_v39  ;;  %v1869_v62 = vmul.f32 %v7857_v40, %v7857_v40  ;;  %v7926_v19 = vadd.f32 %v7470_v58, %v7318_v38  ;;  %v1769_v13 = vmul.f32 %v7905_v60, %v7905_v60 }
 0x1fd   :  { %v7932_v45 = vmul.f32 %v7877_v14, %v7877_v14  ;;  %v7936_v57 = vadd.f32 %v7472_v0, %v7344_v36  ;;  %v1936_v29 = vadd.f32 %v1935_v43, %v1768_v11  ;;  %v1928_v39 = vadd.f32 %v1927_v6, %v1761_v18  ;;  %v818_v6 = vpop.f32.mrb[53].mxu0  ;;  %v11139_v18 = vld [vmem:[#allocation31_spill] sm:$0xff] }
 0x1fe   :  { %11134 = vst [vmem:[#allocation125_spill] sm:$0xff] %v7926_v19  ;;  %v7940_v25 = vmul.f32 %v7881_v9, %v7881_v9  ;;  %v1770_v58 = vmul.f32 %v7909_v50, %v7909_v50  ;;  %v7946_v40 = vadd.f32 %v7751_v20, %v11131_v5  ;;  %v1763_v14 = vmul.f32 %v7902_v16, %v7902_v16 }
 0x1ff   :  { %11135 = vst [vmem:[#allocation126_spill] sm:$0xff] %v7936_v57  ;;  %v1937_v32 = vadd.f32 %v1936_v29, %v1769_v13  ;;  %v7951_v0 = vadd.f32 %v816_v35, %v11120_v44  ;;  %v7955_v43 = vadd.f32 %v7795_v33, %v11122_v22  ;;  %v1929_v11 = vadd.f32 %v1928_v39, %v1762_v46  ;;  %v820_v35 = vpop.f32.mrb[54].mxu0  ;;  %v7968_v29 = vpop.f32.mrb[52].mxu1 }
 0x200   :  { %11136 = vst [vmem:[#allocation127_spill] sm:$0xff] %v7946_v40  ;;  %5323 = vmatmul.mubr.msk.bf16.gmra.mrb[132].mxu0 %vm456_vm0, %v11139_v18  ;;  %v7959_v9 = vadd.f32 %v1869_v62, %v1868_v23  ;;  %v7963_v20 = vadd.f32 %v7484_v51, %v7329_v47  ;;  %v7966_v13 = vadd.f32 %v818_v6, %v11128_v15  ;;  %v217_v33 = vsel %vm10953_vm1, %v7765_v21, 0.0  ;;  %v822_v62 = vpop.f32.mrb[55].mxu0  ;;  %v7978_v18 = vpop.f32.mrb[53].mxu1 }
 0x201   :  { %11137 = vst [vmem:[#allocation128_spill] sm:$0xff] %v7951_v0  ;;  %11138 = vst [vmem:[#allocation129_spill] sm:$0xff] %v7955_v43  ;;  %1506 = vmatprep.mubr.bf16.mxu0 %v11019_v37  ;;  %v1776_v46 = vmul.f32 %v7951_v0, %v7951_v0  ;;  %v7976_v23 = vadd.f32 %v820_v35, %v11120_v44  ;;  %v1930_v51 = vadd.f32 %v1929_v11, %v1763_v14  ;;  %v7993_v35 = vpop.f32.mrb[54].mxu1 }
 0x202   :  { %11140 = vst [vmem:[#allocation31_spill] sm:$0xff] %v7963_v20  ;;  %11141 = vst [vmem:[#allocation130_spill] sm:$0xff] %v7966_v13  ;;  %v1938_v39 = vadd.f32 %v1937_v32, %v1770_v58  ;;  %v1777_v6 = vmul.f32 %v7966_v13, %v7966_v13  ;;  %v7984_v50 = vadd.f32 %v7806_v1, %v11131_v5  ;;  %v8002_v11 = vpop.f32.mrb[55].mxu1 }
 0x203   :  { %11142 = vst [vmem:[#allocation131_spill] sm:$0xff] %v7976_v23  ;;  %v7987_v60 = vadd.f32 %v822_v62, %v11128_v15  ;;  %v7991_v0 = vadd.f32 %v7817_v56, %v11122_v22  ;;  %v1771_v32 = vmul.f32 %v7946_v40, %v7946_v40  ;;  %v1945_v14 = vadd.f32 %v7556_v4, %v1776_v46 }
 0x204   :  { %v1778_v58 = vmul.f32 %v7955_v43, %v7955_v43  ;;  %v1784_v1 = vmul.f32 %v7976_v23, %v7976_v23  ;;  %1931 = vadd.xlane.f32.xlu0 %v1930_v51  ;;  %v1877_v56 = vmul.f32 %v7926_v19, %v7926_v19  ;;  %v8008_v62 = vmul.f32 %v7936_v57, %v7936_v57 }
 0x205   :  { %11143 = vst [vmem:[#allocation132_spill] sm:$0xff] %v7987_v60  ;;  %11144 = vst [vmem:[#allocation133_spill] sm:$0xff] %v7991_v0  ;;  %v8012_v40 = vadd.f32 %v7494_v54, %v7344_v36  ;;  %v1785_v4 = vmul.f32 %v7987_v60, %v7987_v60  ;;  %v8018_v46 = vmul.f32 %v7963_v20, %v7963_v20  ;;  %v826_v54 = vpop.f32.mrb[56].mxu0 }
 0x206   :  { %v1954_v51 = vadd.f32 %v7558_v34, %v1784_v1  ;;  %v1939_v43 = vadd.f32 %v1938_v39, %v1771_v32  ;;  %v1946_v23 = vadd.f32 %v1945_v14, %v1777_v6  ;;  %v1786_v19 = vmul.f32 %v7991_v0, %v7991_v0  ;;  %v828_v39 = vpop.f32.mrb[57].mxu0  ;;  %v6532_v32 = vld [vmem:[#allocation3] sm:$0xff]  }
 0x207   :  { %11145 = vst [vmem:[#allocation134_spill] sm:$0xff] %v8012_v40  ;;  %v8025_v57 = vadd.f32 %v7824_v55, %v11131_v5  ;;  %v8029_v13 = vadd.f32 %v7886_v31, %v11122_v22  ;;  %v1779_v20 = vmul.f32 %v7984_v50, %v7984_v50  ;;  %v8034_v34 = vadd.f32 %v826_v54, %v11120_v44  ;;  %v830_v14 = vpop.f32.mrb[58].mxu0 }
 0x208   :  { %v1955_v60 = vadd.f32 %v1954_v51, %v1785_v4  ;;  %1940 = vadd.xlane.f32.xlu0 %v1939_v43  ;;  %v1947_v6 = vadd.f32 %v1946_v23, %v1778_v58  ;;  %5335 = vmatmul.mubr.msk.bf16.vlgmr.msra.gmra.mrb[136].mxu0 %vm456_vm0, %v6532_v32  ;;  %v8038_v55 = vadd.f32 %v828_v39, %v11128_v15  ;;  %v8048_v4 = vpop.f32.mrb[56].mxu1  ;;  %v832_v51 = vpop.f32.mrb[59].mxu0 }
 0x209   :  { %11146 = vst [vmem:[#allocation135_spill] sm:$0xff] %v8025_v57  ;;  %11147 = vst [vmem:[#allocation136_spill] sm:$0xff] %v8029_v13  ;;  %v8042_v31 = vadd.f32 %v7894_v30, %v11131_v5  ;;  %v8046_v1 = vadd.f32 %v7911_v28, %v11122_v22  ;;  %v218_v43 = vadd.f32 %v217_v33, %v7859_v26  ;;  %1516 = vmatprep.mubr.bf16.mxu0 %v11019_v37  ;;  %v8057_v39 = vpop.f32.mrb[57].mxu1 }
 0x20a   :  { %11148 = vst [vmem:[#allocation137_spill] sm:$0xff] %v8034_v34  ;;  %v1792_v23 = vmul.f32 %v8034_v34, %v8034_v34  ;;  %v8055_v58 = vadd.f32 %v830_v14, %v11120_v44  ;;  %v1948_v54 = vadd.f32 %v1947_v6, %v1779_v20  ;;  %v1956_v30 = vadd.f32 %v1955_v60, %v1786_v19  ;;  %v8064_v26 = vpop.f32.mrb[58].mxu1 }
 0x20b   :  { %11149 = vst [vmem:[#allocation138_spill] sm:$0xff] %v8042_v31  ;;  %11150 = vst [vmem:[#allocation139_spill] sm:$0xff] %v8046_v1  ;;  %v1793_v28 = vmul.f32 %v8038_v55, %v8038_v55  ;;  %v8062_v32 = vadd.f32 %v832_v51, %v11128_v15  ;;  %v11151_v33 = vcombine.high %v7765_v21, %v7765_v21  ;;  %v8072_v14 = vsel %vm10953_vm1, %v7809_v24, 0.0  ;;  %v8081_v51 = vpop.f32.mrb[59].mxu1 }
 0x20c   :  { %v1787_v60 = vmul.f32 %v8025_v57, %v8025_v57  ;;  %v1963_v19 = vadd.f32 %v7582_v53, %v1792_v23  ;;  %v1800_v20 = vmul.f32 %v8055_v58, %v8055_v58  ;;  %v1794_v6 = vmul.f32 %v8029_v13, %v8029_v13  ;;  %1949 = vadd.xlane.f32.xlu1 %v1948_v54 }
 0x20d   :  { %v219_v0 = vsel %vm10953_vm1, %v11151_v33, 0.0  ;;  %v2059_v21 = vadd.f32 %v1877_v56, %v7932_v45  ;;  %v1801_v33 = vmul.f32 %v8062_v32, %v8062_v32  ;;  %v1795_v34 = vmul.f32 %v8042_v31, %v8042_v31 }
 0x20e   :  { %v8090_v53 = vadd.f32 %v7917_v2, %v11131_v5  ;;  %v1964_v23 = vadd.f32 %v1963_v19, %v1793_v28  ;;  %v1972_v57 = vadd.f32 %v7594_v48, %v1800_v20  ;;  %v1802_v54 = vmul.f32 %v8046_v1, %v8046_v1  ;;  %v836_v2 = vpop.f32.mrb[60].mxu0 }
 0x20f   :  { %v1957_v13 = vadd.f32 %v1956_v30, %v1787_v60  ;;  %v2051_v45 = vadd.f32 %v7959_v9, %v7815_v52  ;;  %v8099_v56 = vadd.f32 %v7527_v17, %v7292_v3  ;;  %v8103_v31 = vmul.f32 %v8012_v40, %v8012_v40  ;;  %v838_v30 = vpop.f32.mrb[61].mxu0  ;;  %v6533_v60 = vld [vmem:[#allocation3 + $0x8] sm:$0xff]  }
 0x210   :  { %11152 = vst [vmem:[#allocation140_spill] sm:$0xff] %v8090_v53  ;;  %v8107_v28 = vadd.f32 %v7968_v29, %v11122_v22  ;;  %v1973_v48 = vadd.f32 %v1972_v57, %v1801_v33  ;;  %v8110_v19 = vadd.f32 %v836_v2, %v11120_v44  ;;  %v1965_v52 = vadd.f32 %v1964_v23, %v1794_v6  ;;  %v840_v20 = vpop.f32.mrb[62].mxu0  ;;  %v8132_v6 = vpop.f32.mrb[60].mxu1 }
 0x211   :  { %11153 = vst [vmem:[#allocation141_spill] sm:$0xff] %v8099_v56  ;;  %1958 = vadd.xlane.f32.xlu1 %v1957_v13  ;;  %v11155_v17 = vcombine.high %v7809_v24, %v7809_v24  ;;  %5336 = vmatmul.mubr.msk.bf16.gmra.mrb[140].mxu0 %vm456_vm0, %v6533_v60  ;;  %v1803_v29 = vmul.f32 %v8090_v53, %v8090_v53  ;;  %v842_v2 = vpop.f32.mrb[63].mxu0  ;;  %v8140_v60 = vpop.f32.mrb[61].mxu1  ;;  %v8151_v53 = vsel %vm10953_vm1, %v7849_v42, 0.0 }
 0x212   :  { %11154 = vst [vmem:[#allocation142_spill] sm:$0xff] %v8107_v28  ;;  %v8122_v57 = vadd.f32 %v838_v30, %v11128_v15  ;;  %v8126_v13 = vadd.f32 %v7978_v18, %v11131_v5  ;;  %v8130_v24 = vadd.f32 %v7993_v35, %v11122_v22  ;;  %1526 = vmatprep.mubr.bf16.mxu0 %v11019_v37  ;;  %v8147_v40 = vpop.f32.mrb[62].mxu1 }
 0x213   :  { %v8116_v9 = vsel %vm10953_vm1, %v11155_v17, 0.0  ;;  %v1808_v33 = vmul.f32 %v8110_v19, %v8110_v19  ;;  %v8138_v23 = vadd.f32 %v840_v20, %v11120_v44  ;;  %v1966_v30 = vadd.f32 %v1965_v52, %v1795_v34  ;;  %v8158_v52 = vpop.f32.mrb[63].mxu1 }
 0x214   :  { %11156 = vst [vmem:[#allocation143_spill] sm:$0xff] %v8126_v13  ;;  %11157 = vst [vmem:[#allocation144_spill] sm:$0xff] %v8130_v24  ;;  %v1974_v17 = vadd.f32 %v1973_v48, %v1802_v54  ;;  %v1809_v18 = vmul.f32 %v8122_v57, %v8122_v57  ;;  %v8145_v35 = vadd.f32 %v842_v2, %v11128_v15 }
 0x215   :  { %11158 = vst [vmem:[#allocation145_spill] sm:$0xff] %v8138_v23  ;;  %v220_v1 = vadd.f32 %v219_v0, %v218_v43  ;;  %v1981_v20 = vadd.f32 %v7669_v27, %v1808_v33  ;;  %v1816_v34 = vmul.f32 %v8138_v23, %v8138_v23  ;;  %v1810_v54 = vmul.f32 %v8107_v28, %v8107_v28 }
 0x216   :  { %1967 = vadd.xlane.f32.xlu0 %v1966_v30  ;;  %v1975_v48 = vadd.f32 %v1974_v17, %v1803_v29  ;;  %v8161_v2 = vadd.f32 %v2051_v45, %v7835_v7  ;;  %v2060_v0 = vadd.f32 %v2059_v21, %v7839_v61  ;;  %v1817_v43 = vmul.f32 %v8145_v35, %v8145_v35  ;;  %v846_v21 = vpop.f32.mrb[64].mxu0 }
 0x217   :  { %v8168_v27 = vadd.f32 %v8002_v11, %v11131_v5  ;;  %v1982_v33 = vadd.f32 %v1981_v20, %v1809_v18  ;;  %v1990_v23 = vadd.f32 %v7671_v41, %v1816_v34  ;;  %v1811_v29 = vmul.f32 %v8126_v13, %v8126_v13  ;;  %v848_v18 = vpop.f32.mrb[65].mxu0  ;;  %v6534_v34 = vld [vmem:[#allocation3 + $0x10] sm:$0xff]  }
 0x218   :  { %v1818_v30 = vmul.f32 %v8130_v24, %v8130_v24  ;;  %1976 = vadd.xlane.f32.xlu1 %v1975_v48  ;;  %v8177_v7 = vmul.f32 %v8099_v56, %v8099_v56  ;;  %v8181_v61 = vadd.f32 %v7539_v49, %v7318_v38  ;;  %v8185_v11 = vadd.f32 %v7551_v59, %v7292_v3  ;;  %v850_v48 = vpop.f32.mrb[66].mxu0 }
 0x219   :  { %11159 = vst [vmem:[#allocation146_spill] sm:$0xff] %v8168_v27  ;;  %v8189_v41 = vadd.f32 %v7553_v12, %v7329_v47  ;;  %v1991_v45 = vadd.f32 %v1990_v23, %v1817_v43  ;;  %v8192_v17 = vadd.f32 %v846_v21, %v11120_v44  ;;  %v8196_v20 = vadd.f32 %v8048_v4, %v11122_v22  ;;  %v8212_v4 = vpop.f32.mrb[64].mxu1  ;;  %v852_v21 = vpop.f32.mrb[67].mxu0 }
 0x21a   :  { %11160 = vst [vmem:[#allocation147_spill] sm:$0xff] %v8181_v61  ;;  %11161 = vst [vmem:[#allocation148_spill] sm:$0xff] %v8185_v11  ;;  %v1983_v49 = vadd.f32 %v1982_v33, %v1810_v54  ;;  %5337 = vmatmul.mubr.msk.bf16.gmra.mrb[144].mxu0 %vm456_vm0, %v6534_v34  ;;  %v1819_v59 = vmul.f32 %v8168_v27, %v8168_v27  ;;  %v8202_v12 = vadd.f32 %v848_v18, %v11128_v15  ;;  %v8220_v56 = vpop.f32.mrb[65].mxu1 }
 0x21b   :  { %11162 = vst [vmem:[#allocation149_spill] sm:$0xff] %v8189_v41  ;;  %11163 = vst [vmem:[#allocation150_spill] sm:$0xff] %v8192_v17  ;;  %v8206_v23 = vadd.f32 %v8057_v39, %v11131_v5  ;;  %v8210_v43 = vadd.f32 %v8064_v26, %v11122_v22  ;;  %1536 = vmatprep.mubr.bf16.mxu0 %v11019_v37  ;;  %v1824_v54 = vmul.f32 %v8192_v17, %v8192_v17  ;;  %v8230_v28 = vpop.f32.mrb[66].mxu1 }
 0x21c   :  { %11164 = vst [vmem:[#allocation151_spill] sm:$0xff] %v8196_v20  ;;  %v8218_v33 = vadd.f32 %v850_v48, %v11120_v44  ;;  %v1984_v18 = vadd.f32 %v1983_v49, %v1811_v29  ;;  %v1992_v34 = vadd.f32 %v1991_v45, %v1818_v30  ;;  %v8223_v39 = vadd.f32 %v2060_v0, %v7843_v63  ;;  %v8240_v30 = vpop.f32.mrb[67].mxu1  ;;  %v11169_v49 = vld [vmem:[#allocation86_spill] sm:$0xff] }
 0x21d   :  { %11165 = vst [vmem:[#allocation152_spill] sm:$0xff] %v8206_v23  ;;  %11166 = vst [vmem:[#allocation153_spill] sm:$0xff] %v8210_v43  ;;  %v1825_v26 = vmul.f32 %v8202_v12, %v8202_v12  ;;  %v8228_v24 = vadd.f32 %v852_v21, %v11128_v15  ;;  %v8233_v27 = vadd.f32 %v8072_v14, %v220_v1 }
 0x21e   :  { %11167 = vst [vmem:[#allocation154_spill] sm:$0xff] %v8218_v33  ;;  %v1999_v48 = vadd.f32 %v7747_v8, %v1824_v54  ;;  %v1832_v29 = vmul.f32 %v8218_v33, %v8218_v33  ;;  %v1826_v63 = vmul.f32 %v8196_v20, %v8196_v20  ;;  %1985 = vadd.xlane.f32.xlu0 %v1984_v18  ;;  %v11172_v54 = vld [vmem:[#allocation54_spill] sm:$0xff] }
 0x21f   :  { %11168 = vst [vmem:[#allocation155_spill] sm:$0xff] %v8228_v24  ;;  %v1993_v0 = vadd.f32 %v1992_v34, %v1819_v59  ;;  %v1885_v45 = vmul.f32 %v8181_v61, %v8181_v61  ;;  %v8246_v21 = vadd.f32 %v11169_v49, %v7318_v38  ;;  %v1833_v8 = vmul.f32 %v8228_v24, %v8228_v24 }
 0x220   :  { %v8252_v1 = vadd.f32 %v8081_v51, %v11131_v5  ;;  %v2000_v14 = vadd.f32 %v1999_v48, %v1825_v26  ;;  %v2008_v18 = vadd.f32 %v11172_v54, %v1832_v29  ;;  %v1827_v59 = vmul.f32 %v8206_v23, %v8206_v23  ;;  %v11173_v51 = vld [vmem:[#allocation87_spill] sm:$0xff]  ;;  %v856_v29 = vpop.f32.mrb[68].mxu0  ;;  %v6535_v23 = vld [vmem:[#allocation3 + $0x18] sm:$0xff]  }
 0x221   :  { %11170 = vst [vmem:[#allocation86_spill] sm:$0xff] %v8246_v21  ;;  %v1834_v34 = vmul.f32 %v8210_v43, %v8210_v43  ;;  %1994 = vadd.xlane.f32.xlu1 %v1993_v0  ;;  %v1892_v49 = vmul.f32 %v8185_v11, %v8185_v11  ;;  %v8263_v20 = vmul.f32 %v8189_v41, %v8189_v41  ;;  %v11175_v26 = vld [vmem:[#allocation91_spill] sm:$0xff]  ;;  %v858_v0 = vpop.f32.mrb[69].mxu0 }
 0x222   :  { %11171 = vst [vmem:[#allocation156_spill] sm:$0xff] %v8252_v1  ;;  %v8267_v61 = vadd.f32 %v11173_v51, %v7344_v36  ;;  %v8271_v48 = vadd.f32 %v11175_v26, %v7329_v47  ;;  %v2009_v54 = vadd.f32 %v2008_v18, %v1833_v8  ;;  %v8274_v43 = vadd.f32 %v856_v29, %v11120_v44  ;;  %v860_v13 = vpop.f32.mrb[70].mxu0 }
 0x223   :  { %v8278_v11 = vadd.f32 %v8132_v6, %v11122_v22  ;;  %v2001_v41 = vadd.f32 %v2000_v14, %v1826_v63  ;;  %5338 = vmatmul.mubr.msk.bf16.gmra.mrb[148].mxu0 %vm456_vm0, %v6535_v23  ;;  %v1835_v51 = vmul.f32 %v8252_v1, %v8252_v1  ;;  %v8284_v26 = vadd.f32 %v858_v0, %v11128_v15  ;;  %v8294_v6 = vpop.f32.mrb[68].mxu1  ;;  %v862_v14 = vpop.f32.mrb[71].mxu0 }
 0x224   :  { %11174 = vst [vmem:[#allocation54_spill] sm:$0xff] %v8267_v61  ;;  %11176 = vst [vmem:[#allocation87_spill] sm:$0xff] %v8271_v48  ;;  %v8288_v8 = vadd.f32 %v8140_v60, %v11131_v5  ;;  %v8292_v18 = vadd.f32 %v8147_v40, %v11122_v22  ;;  %1546 = vmatprep.mubr.bf16.mxu0 %v11019_v37  ;;  %v1840_v23 = vmul.f32 %v8274_v43, %v8274_v43  ;;  %v8302_v1 = vpop.f32.mrb[69].mxu1 }
 0x225   :  { %11177 = vst [vmem:[#allocation91_spill] sm:$0xff] %v8274_v43  ;;  %11178 = vst [vmem:[#allocation157_spill] sm:$0xff] %v8278_v11  ;;  %v8300_v63 = vadd.f32 %v860_v13, %v11120_v44  ;;  %v2002_v29 = vadd.f32 %v2001_v41, %v1827_v59  ;;  %v2010_v0 = vadd.f32 %v2009_v54, %v1834_v34  ;;  %v8312_v43 = vpop.f32.mrb[70].mxu1  ;;  %v11184_v13 = vld [vmem:[#allocation115_spill] sm:$0xff]  ;;  %v11185_v54 = vld [vmem:[#allocation93_spill] sm:$0xff] }
 0x226   :  { %11179 = vst [vmem:[#allocation158_spill] sm:$0xff] %v8284_v26  ;;  %11180 = vst [vmem:[#allocation159_spill] sm:$0xff] %v8288_v8  ;;  %v2068_v60 = vadd.f32 %v1885_v45, %v8177_v7  ;;  %v1893_v40 = vmul.f32 %v8246_v21, %v8246_v21  ;;  %v1841_v33 = vmul.f32 %v8284_v26, %v8284_v26  ;;  %v8319_v45 = vpop.f32.mrb[71].mxu1 }
 0x227   :  { %11181 = vst [vmem:[#allocation160_spill] sm:$0xff] %v8292_v18  ;;  %11182 = vst [vmem:[#allocation161_spill] sm:$0xff] %v8300_v63  ;;  %v8310_v17 = vadd.f32 %v862_v14, %v11128_v15  ;;  %v2017_v24 = vadd.f32 %v11184_v13, %v1840_v23  ;;  %v1848_v41 = vmul.f32 %v8300_v63, %v8300_v63  ;;  %2003 = vadd.xlane.f32.xlu0 %v2002_v29  ;;  %v11187_v29 = vld [vmem:[#allocation119_spill] sm:$0xff]  ;;  %v11188_v63 = vld [vmem:[#allocation97_spill] sm:$0xff] }
 0x228   :  { %v1842_v59 = vmul.f32 %v8278_v11, %v8278_v11  ;;  %v2011_v7 = vadd.f32 %v2010_v0, %v1835_v51  ;;  %v8323_v34 = vmul.f32 %v8267_v61, %v8267_v61  ;;  %v8327_v14 = vadd.f32 %v11185_v54, %v7344_v36 }
 0x229   :  { %11183 = vst [vmem:[#allocation162_spill] sm:$0xff] %v8310_v17  ;;  %v1849_v23 = vmul.f32 %v8310_v17, %v8310_v17  ;;  %v8333_v13 = vadd.f32 %v8158_v52, %v11131_v5  ;;  %v2018_v11 = vadd.f32 %v2017_v24, %v1841_v33  ;;  %v2026_v51 = vadd.f32 %v11187_v29, %v1848_v41  ;;  %v866_v24 = vpop.f32.mrb[72].mxu0 }
 0x22a   :  { %v1843_v0 = vmul.f32 %v8288_v8, %v8288_v8  ;;  %v1850_v61 = vmul.f32 %v8292_v18, %v8292_v18  ;;  %2012 = vadd.xlane.f32.xlu1 %v2011_v7  ;;  %v2077_v21 = vadd.f32 %v1893_v40, %v1892_v49  ;;  %v2069_v54 = vadd.f32 %v2068_v60, %v7940_v25  ;;  %v868_v29 = vpop.f32.mrb[73].mxu0  ;;  %v6536_v25 = vld [vmem:[#allocation3 + $0x20] sm:$0xff]  }
 0x22b   :  { %11186 = vst [vmem:[#allocation115_spill] sm:$0xff] %v8333_v13  ;;  %v8343_v17 = vadd.f32 %v11188_v63, %v7292_v3  ;;  %v8347_v52 = vmul.f32 %v8271_v48, %v8271_v48  ;;  %v2027_v33 = vadd.f32 %v2026_v51, %v1849_v23  ;;  %v8350_v41 = vadd.f32 %v866_v24, %v11120_v44  ;;  %v870_v40 = vpop.f32.mrb[74].mxu0 }
 0x22c   :  { %v8354_v7 = vadd.f32 %v8212_v4, %v11122_v22  ;;  %v2019_v49 = vadd.f32 %v2018_v11, %v1842_v59  ;;  %5339 = vmatmul.mubr.msk.bf16.gmra.mrb[152].mxu0 %vm456_vm0, %v6536_v25  ;;  %v1851_v63 = vmul.f32 %v8333_v13, %v8333_v13  ;;  %v8360_v60 = vadd.f32 %v868_v29, %v11128_v15  ;;  %v8370_v4 = vpop.f32.mrb[72].mxu1  ;;  %v872_v24 = vpop.f32.mrb[75].mxu0 }
 0x22d   :  { %11189 = vst [vmem:[#allocation93_spill] sm:$0xff] %v8343_v17  ;;  %11190 = vst [vmem:[#allocation119_spill] sm:$0xff] %v8350_v41  ;;  %v8364_v23 = vadd.f32 %v8220_v56, %v11131_v5  ;;  %v8368_v51 = vadd.f32 %v8230_v28, %v11122_v22  ;;  %1556 = vmatprep.mubr.bf16.mxu0 %v11019_v37  ;;  %v1856_v11 = vmul.f32 %v8350_v41, %v8350_v41  ;;  %v8378_v48 = vpop.f32.mrb[73].mxu1  ;;  %v11196_v56 = vld [vmem:[#allocation100_spill] sm:$0xff]  ;;  %v11198_v28 = vld [vmem:[#allocation102_spill] sm:$0xff] }
 0x22e   :  { %11191 = vst [vmem:[#allocation97_spill] sm:$0xff] %v8354_v7  ;;  %11192 = vst [vmem:[#allocation163_spill] sm:$0xff] %v8360_v60  ;;  %v8376_v59 = vadd.f32 %v870_v40, %v11120_v44  ;;  %v2020_v29 = vadd.f32 %v2019_v49, %v1843_v0  ;;  %v2028_v25 = vadd.f32 %v2027_v33, %v1850_v61  ;;  %v8393_v40 = vpop.f32.mrb[74].mxu1  ;;  %v11200_v0 = vld [vmem:[#allocation121_spill] sm:$0xff] }
 0x22f   :  { %11193 = vst [vmem:[#allocation164_spill] sm:$0xff] %v8364_v23  ;;  %11194 = vst [vmem:[#allocation165_spill] sm:$0xff] %v8368_v51  ;;  %v8382_v18 = vadd.f32 %v11196_v56, %v7318_v38  ;;  %v8386_v13 = vadd.f32 %v11198_v28, %v7292_v3  ;;  %v1857_v8 = vmul.f32 %v8360_v60, %v8360_v60  ;;  %v8400_v28 = vpop.f32.mrb[75].mxu1 }
 0x230   :  { %11195 = vst [vmem:[#allocation166_spill] sm:$0xff] %v8376_v59  ;;  %v8391_v41 = vadd.f32 %v872_v24, %v11128_v15  ;;  %v2035_v61 = vadd.f32 %v11200_v0, %v1856_v11  ;;  %v1864_v33 = vmul.f32 %v8376_v59, %v8376_v59  ;;  %v1858_v49 = vmul.f32 %v8354_v7, %v8354_v7 }
 0x231   :  { %11197 = vst [vmem:[#allocation100_spill] sm:$0xff] %v8382_v18  ;;  %11199 = vst [vmem:[#allocation102_spill] sm:$0xff] %v8386_v13  ;;  %2021 = vadd.xlane.f32.xlu0 %v2020_v29  ;;  %v2029_v56 = vadd.f32 %v2028_v25, %v1851_v63  ;;  %v8403_v26 = vadd.f32 %v2069_v54, %v8008_v62  ;;  %v2078_v24 = vadd.f32 %v2077_v21, %v8018_v46  ;;  %v11202_v21 = vld [vmem:[#allocation107_spill] sm:$0xff] }
 0x232   :  { %v1865_v60 = vmul.f32 %v8391_v41, %v8391_v41  ;;  %v8410_v11 = vadd.f32 %v8240_v30, %v11131_v5  ;;  %v2036_v0 = vadd.f32 %v2035_v61, %v1857_v8  ;;  %v2044_v59 = vadd.f32 %v7920_v10, %v1864_v33  ;;  %v876_v10 = vpop.f32.mrb[76].mxu0 }
 0x233   :  { %v1859_v63 = vmul.f32 %v8364_v23, %v8364_v23  ;;  %v1866_v29 = vmul.f32 %v8368_v51, %v8368_v51  ;;  %2030 = vadd.xlane.f32.xlu1 %v2029_v56  ;;  %v1900_v62 = vmul.f32 %v8343_v17, %v8343_v17  ;;  %v1901_v46 = vmul.f32 %v8382_v18, %v8382_v18  ;;  %v878_v61 = vpop.f32.mrb[77].mxu0  ;;  %v6537_v51 = vld [vmem:[#allocation3 + $0x28] sm:$0xff]  }
 0x234   :  { %11201 = vst [vmem:[#allocation121_spill] sm:$0xff] %v8410_v11  ;;  %v1908_v30 = vmul.f32 %v8386_v13, %v8386_v13  ;;  %v8425_v8 = vadd.f32 %v11202_v21, %v7318_v38  ;;  %v2045_v54 = vadd.f32 %v2044_v59, %v1865_v60  ;;  %v8428_v25 = vadd.f32 %v876_v10, %v11120_v44  ;;  %v880_v23 = vpop.f32.mrb[78].mxu0 }
 0x235   :  { %v8432_v33 = vadd.f32 %v8294_v6, %v11122_v22  ;;  %v2037_v56 = vadd.f32 %v2036_v0, %v1858_v49  ;;  %5340 = vmatmul.mubr.msk.bf16.gmra.mrb[156].mxu0 %vm456_vm0, %v6537_v51  ;;  %v1867_v7 = vmul.f32 %v8410_v11, %v8410_v11  ;;  %v8438_v21 = vadd.f32 %v878_v61, %v11128_v15  ;;  %v8448_v6 = vpop.f32.mrb[76].mxu1  ;;  %v882_v0 = vpop.f32.mrb[79].mxu0 }
 0x236   :  { %11203 = vst [vmem:[#allocation107_spill] sm:$0xff] %v8425_v8  ;;  %v8442_v60 = vadd.f32 %v8302_v1, %v11131_v5  ;;  %v8446_v59 = vadd.f32 %v8312_v43, %v11122_v22  ;;  %1566 = vmatprep.mubr.bf16.mxu0 %v11019_v37  ;;  %v1872_v51 = vmul.f32 %v8428_v25, %v8428_v25  ;;  %v8456_v11 = vpop.f32.mrb[77].mxu1 }
 0x237   :  { %11204 = vst [vmem:[#allocation167_spill] sm:$0xff] %v8432_v33  ;;  %v8454_v49 = vadd.f32 %v880_v23, %v11120_v44  ;;  %v2038_v10 = vadd.f32 %v2037_v56, %v1859_v63  ;;  %v2046_v61 = vadd.f32 %v2045_v54, %v1866_v29  ;;  %v2086_v1 = vadd.f32 %v1901_v46, %v1900_v62  ;;  %v8465_v18 = vpop.f32.mrb[78].mxu1  ;;  %v11207_v56 = vld [vmem:[#allocation103_spill] sm:$0xff] }
 0x238   :  { %11205 = vst [vmem:[#allocation168_spill] sm:$0xff] %v8442_v60  ;;  %11206 = vst [vmem:[#allocation169_spill] sm:$0xff] %v8446_v59  ;;  %v1909_v43 = vmul.f32 %v8425_v8, %v8425_v8  ;;  %v1873_v17 = vmul.f32 %v8438_v21, %v8438_v21  ;;  %v8463_v13 = vadd.f32 %v882_v0, %v11128_v15  ;;  %v8472_v46 = vpop.f32.mrb[79].mxu1 }
 0x239   :  { %v2053_v23 = vadd.f32 %v8161_v2, %v1872_v51  ;;  %v1880_v63 = vmul.f32 %v8454_v49, %v8454_v49  ;;  %v1874_v29 = vmul.f32 %v8432_v33, %v8432_v33  ;;  %2039 = vadd.xlane.f32.xlu0 %v2038_v10  ;;  %v2047_v62 = vadd.f32 %v2046_v61, %v1867_v7  ;;  %v11210_v10 = vld [vmem:[#allocation112_spill] sm:$0xff] }
 0x23a   :  { %v2079_v54 = vadd.f32 %v2078_v24, %v8103_v31  ;;  %v8477_v0 = vadd.f32 %v11207_v56, %v7329_v47  ;;  %v1881_v8 = vmul.f32 %v8463_v13, %v8463_v13  ;;  %v8483_v2 = vadd.f32 %v8319_v45, %v11131_v5  ;;  %v11212_v45 = vld [vmem:[#allocation113_spill] sm:$0xff] }
 0x23b   :  { %v2054_v51 = vadd.f32 %v2053_v23, %v1873_v17  ;;  %v2062_v33 = vadd.f32 %v8223_v39, %v1880_v63  ;;  %v1875_v7 = vmul.f32 %v8442_v60, %v8442_v60  ;;  %v1882_v31 = vmul.f32 %v8446_v59, %v8446_v59  ;;  %2048 = vadd.xlane.f32.xlu1 %v2047_v62  ;;  %v886_v17 = vpop.f32.mrb[80].mxu0  ;;  %v11214_v60 = vld [vmem:[#allocation108_spill] sm:$0xff] }
 0x23c   :  { %11208 = vst [vmem:[#allocation103_spill] sm:$0xff] %v8477_v0  ;;  %11209 = vst [vmem:[#allocation170_spill] sm:$0xff] %v8483_v2  ;;  %v2095_v24 = vadd.f32 %v1909_v43, %v1908_v30  ;;  %v2087_v47 = vadd.f32 %v2086_v1, %v8263_v20  ;;  %v8493_v61 = vadd.f32 %v11210_v10, %v7292_v3  ;;  %v888_v63 = vpop.f32.mrb[81].mxu0  ;;  %v6538_v20 = vld [vmem:[#allocation3 + $0x30] sm:$0xff]  }
 0x23d   :  { %v8497_v56 = vadd.f32 %v11212_v45, %v7318_v38  ;;  %v2063_v39 = vadd.f32 %v2062_v33, %v1881_v8  ;;  %v8500_v23 = vadd.f32 %v886_v17, %v11120_v44  ;;  %v8504_v62 = vadd.f32 %v8370_v4, %v11122_v22  ;;  %5341 = vmatmul.mubr.msk.bf16.gmra.mrb[160].mxu0 %vm456_vm0, %v6538_v20  ;;  %v890_v1 = vpop.f32.mrb[82].mxu0  ;;  %v8520_v4 = vpop.f32.mrb[80].mxu1 }
 0x23e   :  { %11211 = vst [vmem:[#allocation112_spill] sm:$0xff] %v8493_v61  ;;  %v2055_v30 = vadd.f32 %v2054_v51, %v1874_v29  ;;  %v1883_v3 = vmul.f32 %v8483_v2, %v8483_v2  ;;  %v8510_v38 = vadd.f32 %v888_v63, %v11128_v15  ;;  %v8514_v8 = vadd.f32 %v8378_v48, %v11131_v5  ;;  %v892_v51 = vpop.f32.mrb[83].mxu0  ;;  %v8528_v17 = vpop.f32.mrb[81].mxu1 }
 0x23f   :  { %11213 = vst [vmem:[#allocation113_spill] sm:$0xff] %v8504_v62  ;;  %v8518_v33 = vadd.f32 %v8393_v40, %v11122_v22  ;;  %1576 = vmatprep.mubr.bf16.mxu0 %v11019_v37  ;;  %v1888_v43 = vmul.f32 %v8500_v23, %v8500_v23  ;;  %v8526_v29 = vadd.f32 %v890_v1, %v11120_v44  ;;  %v1051_v59 = vpop.f32.mrb[82].mxu1 }
 0x240   :  { %v2056_v10 = vadd.f32 %v2055_v30, %v1875_v7  ;;  %v2064_v45 = vadd.f32 %v2063_v39, %v1882_v31  ;;  %v1916_v48 = vmul.f32 %v8493_v61, %v8493_v61  ;;  %v1917_v40 = vmul.f32 %v8497_v56, %v8497_v56  ;;  %v1052_v30 = vpop.f32.mrb[83].mxu1 }
 0x241   :  { %v1889_v63 = vmul.f32 %v8510_v38, %v8510_v38  ;;  %v8537_v20 = vadd.f32 %v892_v51, %v11128_v15  ;;  %v2071_v1 = vadd.f32 %v8403_v26, %v1888_v43  ;;  %v1896_v7 = vmul.f32 %v8526_v29, %v8526_v29 }
 0x242   :  { %v1890_v31 = vmul.f32 %v8504_v62, %v8504_v62  ;;  %2057 = vadd.xlane.f32.xlu0 %v2056_v10  ;;  %v2065_v39 = vadd.f32 %v2064_v45, %v1883_v3  ;;  %v1911_v2 = vmul.f32 %v8327_v14, %v8327_v14  ;;  %v8548_v61 = vadd.f32 %v11214_v60, %v7344_v36  ;;  %v896_v62 = vpop.f32.mrb[84].mxu0 }
 0x243   :  { %v1897_v59 = vmul.f32 %v8537_v20, %v8537_v20  ;;  %v8554_v26 = vadd.f32 %v8400_v28, %v11131_v5  ;;  %v2072_v43 = vadd.f32 %v2071_v1, %v1889_v63  ;;  %v2080_v51 = vadd.f32 %v2079_v54, %v1896_v7  ;;  %v898_v54 = vpop.f32.mrb[85].mxu0 }
 0x244   :  { %11215 = vst [vmem:[#allocation108_spill] sm:$0xff] %v8548_v61  ;;  %v1891_v3 = vmul.f32 %v8514_v8, %v8514_v8  ;;  %v1898_v10 = vmul.f32 %v8518_v33, %v8518_v33  ;;  %2066 = vadd.xlane.f32.xlu1 %v2065_v39  ;;  %v2088_v45 = vadd.f32 %v2087_v47, %v8323_v34  ;;  %v6539_v39 = vld [vmem:[#allocation3 + $0x38] sm:$0xff]  }
 0x245   :  { %v2096_v36 = vadd.f32 %v2095_v24, %v8347_v52  ;;  %v2104_v60 = vadd.f32 %v1917_v40, %v1916_v48  ;;  %v1918_v30 = vmul.f32 %v8477_v0, %v8477_v0  ;;  %v2081_v28 = vadd.f32 %v2080_v51, %v1897_v59  ;;  %5342 = vmatmul.mubr.msk.bf16.gmra.mrb[164].mxu0 %vm456_vm0, %v6539_v39  ;;  %v900_v24 = vpop.f32.mrb[86].mxu0 }
 0x246   :  { %v8565_v63 = vadd.f32 %v896_v62, %v11120_v44  ;;  %v8569_v1 = vadd.f32 %v8448_v6, %v11122_v22  ;;  %v2073_v7 = vadd.f32 %v2072_v43, %v1890_v31  ;;  %v1899_v34 = vmul.f32 %v8554_v26, %v8554_v26  ;;  %1586 = vmatprep.mubr.bf16.mxu0 %v11019_v37  ;;  %v902_v40 = vpop.f32.mrb[87].mxu0 }
 0x247   :  { %v8575_v52 = vadd.f32 %v898_v54, %v11128_v15  ;;  %v8579_v47 = vadd.f32 %v8456_v11, %v11131_v5  ;;  %v8583_v62 = vadd.f32 %v8465_v18, %v11122_v22  ;;  %v8589_v48 = vadd.f32 %v900_v24, %v11120_v44 }
 0x248   :  { %v1904_v6 = vmul.f32 %v8565_v63, %v8565_v63  ;;  %v2074_v31 = vadd.f32 %v2073_v7, %v1891_v3  ;;  %v2082_v59 = vadd.f32 %v2081_v28, %v1898_v10  ;;  %v2097_v43 = vadd.f32 %v2096_v36, %v1911_v2 }
 0x249   :  { %11216 = vst [vmem:[#allocation171_spill] sm:$0xff] %v8583_v62  ;;  %v1905_v11 = vmul.f32 %v8575_v52, %v8575_v52  ;;  %v8594_v51 = vadd.f32 %v902_v40, %v11128_v15  ;;  %v224_v18 = vadd.f32 %v8116_v9, %v8233_v27  ;;  %v1912_v39 = vmul.f32 %v8589_v48, %v8589_v48 }
 0x24a   :  { %v2089_v54 = vadd.f32 %v2088_v45, %v1904_v6  ;;  %v1906_v24 = vmul.f32 %v8569_v1, %v8569_v1  ;;  %2075 = vadd.xlane.f32.xlu0 %v2074_v31  ;;  %v2083_v3 = vadd.f32 %v2082_v59, %v1899_v34  ;;  %v2105_v10 = vadd.f32 %v2104_v60, %v1918_v30  ;;  %v906_v60 = vpop.f32.mrb[88].mxu0  ;;  %v6540_v59 = vld [vmem:[#allocation3 + $0x40] sm:$0xff]  }
 0x24b   :  { %v1919_v2 = vmul.f32 %v8548_v61, %v8548_v61  ;;  %v1913_v36 = vmul.f32 %v8594_v51, %v8594_v51  ;;  %v8608_v28 = vadd.f32 %v8472_v46, %v11131_v5  ;;  %v2098_v27 = vadd.f32 %v2097_v43, %v1912_v39  ;;  %v908_v40 = vpop.f32.mrb[89].mxu0 }
 0x24c   :  { %v2090_v9 = vadd.f32 %v2089_v54, %v1905_v11  ;;  %v1907_v45 = vmul.f32 %v8579_v47, %v8579_v47  ;;  %v1914_v7 = vmul.f32 %v8583_v62, %v8583_v62  ;;  %2084 = vadd.xlane.f32.xlu1 %v2083_v3  ;;  %v226_v30 = vadd.f32 %v8151_v53, %v224_v18  ;;  %v910_v53 = vpop.f32.mrb[90].mxu0  ;;  %v11269_v62 = vld [vmem:[#allocation71_spill] sm:$0xff] }
 0x24d   :  { %v2099_v34 = vadd.f32 %v2098_v27, %v1913_v36  ;;  %v8616_v6 = vadd.f32 %v906_v60, %v11120_v44  ;;  %v8620_v46 = vadd.f32 %v8520_v4, %v11122_v22  ;;  %5343 = vmatmul.mubr.msk.bf16.gmra.mrb[168].mxu0 %vm456_vm0, %v6540_v59  ;;  %v2106_v43 = vadd.f32 %v2105_v10, %v1919_v2  ;;  %v911_v39 = vpop.f32.mrb[91].mxu0 }
 0x24e   :  { %v2091_v31 = vadd.f32 %v2090_v9, %v1906_v24  ;;  %v1915_v11 = vmul.f32 %v8608_v28, %v8608_v28  ;;  %v8626_v54 = vadd.f32 %v908_v40, %v11128_v15  ;;  %v11220_v44 = vcombine.high %v7849_v42, %v7849_v42  ;;  %1596 = vmatprep.mubr.bf16.mxu0 %v11019_v37  ;;  %v1226_v53 = vpop.f32.mrb[92].mxu0 }
 0x24f   :  { %11217 = vst [vmem:[#allocation172_spill] sm:$0xff] %v8616_v6  ;;  %11218 = vst [vmem:[#allocation173_spill] sm:$0xff] %v8620_v46  ;;  %v1920_v22 = vmul.f32 %v8616_v6, %v8616_v6  ;;  %v8637_v24 = vadd.f32 %v8528_v17, %v11131_v5  ;;  %v2100_v3 = vadd.f32 %v2099_v34, %v1914_v7  ;;  %v6541_v5 = vld [vmem:[#allocation3 + $0x48] sm:$0xff]   ;;  %v6542_v7 = vld [vmem:[#allocation3 + $0x50] ss:$0 sps:$4 sm:$0xff]  }
 0x250   :  { %11219 = vst [vmem:[#allocation174_spill] sm:$0xff] %v8626_v54  ;;  %v227_v18 = vsel %vm10953_vm1, %v11220_v44, 0.0  ;;  %v2092_v4 = vadd.f32 %v2091_v31, %v1907_v45  ;;  %v1921_v15 = vmul.f32 %v8626_v54, %v8626_v54  ;;  %v1922_v42 = vmul.f32 %v8620_v46, %v8620_v46  ;;  %v11240_v6 = vld [vmem:[#allocation120_spill] sm:$0xff] }
 0x251   :  { %11221 = vst [vmem:[#allocation175_spill] sm:$0xff] %v8637_v24  ;;  %v2107_v10 = vadd.f32 %v2106_v43, %v1920_v22  ;;  %v2101_v2 = vadd.f32 %v2100_v3, %v1915_v11  ;;  %v228_v36 = vadd.f32 %v227_v18, %v226_v30  ;;  %v1923_v27 = vmul.f32 %v8637_v24, %v8637_v24  ;;  %v8650_v18 = vld [vmem:[#allocation14] sm:$0xff]  ;;  %v1228_v22 = vpop.f32.mrb[93].mxu0 }
 0x252   :  { %2093 = vadd.xlane.f32.xlu0 %v2092_v4  ;;  %v6829_v43 = vmov 269488144   ;;  %v11222_v3 = vld [vmem:[#allocation33_spill] sm:$0xff] }
 0x253   :  { %v2108_v9 = vadd.f32 %v2107_v10, %v1921_v15  ;;  %2102 = vadd.xlane.f32.xlu1 %v2101_v2  ;;  %v8648_v11 = vunpack.c.l.s4 %v6829_v43  ;;  %v8654_v15 = vrot.slane %v8650_v18, %v11222_v3  ;;  %v11224_v10 = vld [vmem:[#allocation36_spill] sm:$0xff]  ;;  %v1230_v2 = vpop.f32.mrb[94].mxu0 }
 0x255   :  { %v2109_v45 = vadd.f32 %v2108_v9, %v1922_v42  ;;  %5344 = vmatmul.mubr.msk.bf16.gmra.mrb[172].mxu0 %vm456_vm0, %v6541_v5  ;;  %11223 = vst [vmem:[#allocation176_spill] sm:$0xff] %v8654_v15  ;;  %v8658_v42 = vrot.slane %v8650_v18, %v11224_v10  ;;  %v11238_v10 = vld [vmem:[#allocation66_spill] sm:$0xff] }
 0x256   :  { %229 = vadd.xlane.f32.xlu0 %v228_v36  ;;  %1606 = vmatprep.mubr.bf16.mxu0 %v11019_v37  ;;  %v11226_v36 = vld [vmem:[#allocation58_spill] sm:$0xff] }
 0x257   :  { %v2110_v17 = vadd.f32 %v2109_v45, %v1923_v27  ;;  %11225 = vst [vmem:[#allocation177_spill] sm:$0xff] %v8658_v42  ;;  %v11227_v27 = vld [vmem:[#allocation43_spill] sm:$0xff] }
 0x259   :  { %2111 = vadd.xlane.f32.xlu1 %v2110_v17  ;;  %v1232_v17 = vpop.f32.mrb[95].mxu0 }
 0x25d   :  { %5345 = vmatmul.mubr.msk.bf16.gmra.mrb[176].mxu0 %vm456_vm0, %v6542_v7  ;;  %v1227_v7 = vadd.f32 %v1226_v53, %v8654_v15  ;;  %v11235_v53 = vld [vmem:[#allocation56_spill] sm:$0xff] }
 0x291   :  { %v1932_v60 = vpop.xlane.xlu0 %1931 }
 0x292   :  { %v2113_v34 = vmax.f32 %v1932_v60, 1e-16  ;;  %v1229_v60 = vadd.f32 %v1228_v22, %v8658_v42 }
 0x294   :  { %6476 = vrsqrt.f32 %v2113_v34  ;;  %v1231_v34 = vadd.f32 %v1230_v2, %v8654_v15 }
 0x295   :  { %v1941_v30 = vpop.xlane.xlu0 %1940 }
 0x296   :  { %v2114_v40 = vmax.f32 %v1941_v30, 1e-16  ;;  %v8676_v3 = vpack.c.bf16 %v1231_v34, %v1227_v7 }
 0x298   :  { %6478 = vrsqrt.f32 %v2114_v40  ;;  %v11228_v40 = vld [vmem:[#allocation117_spill] sm:$0xff] }
 0x299   :  { %v1950_v31 = vpop.xlane.xlu1 %1949 }
 0x29a   :  { %v2115_v59 = vmax.f32 %v1950_v31, 1e-16 }
 0x29c   :  { %6480 = vrsqrt.f32 %v2115_v59  ;;  %v11230_v59 = vld [vmem:[#allocation116_spill] sm:$0xff] }
 0x29d   :  { %11234 = vst [vmem:[#allocation116_spill] sm:$0xff] %v8676_v3 }
 0x29e   :  { %v1959_v44 = vpop.xlane.xlu1 %1958  ;;  %v6477_v4 = vpop.eup %6476 }
 0x29f   :  { %v2116_v39 = vmax.f32 %v1959_v44, 1e-16  ;;  %v2156_v9 = vmul.f32 %v6477_v4, %v11226_v36  ;;  %v2155_v45 = vmul.f32 %v6477_v4, %v11227_v27  ;;  %v8667_v31 = vmul.f32 %v6477_v4, %v11228_v40  ;;  %v11232_v36 = vld [vmem:[#allocation57_spill] sm:$0xff] }
 0x2a0   :  { %v8670_v43 = vmul.f32 %v6477_v4, %v11230_v59  ;;  %v1233_v44 = vadd.f32 %v1232_v17, %v8658_v42  ;;  %v8674_v27 = vmul.f32 %v6477_v4, %v11232_v36  ;;  %v8679_v22 = vmul.f32 %v6477_v4, %v11235_v53  ;;  %v11239_v59 = vld [vmem:[#allocation61_spill] sm:$0xff]  ;;  %v11242_v36 = vld [vmem:[#allocation118_spill] sm:$0xff]  ;;  %v11245_v53 = vld [vmem:[#allocation60_spill] sm:$0xff] }
 0x2a1   :  { %6482 = vrsqrt.f32 %v2116_v39  ;;  %11229 = vst [vmem:[#allocation58_spill] sm:$0xff] %v8667_v31  ;;  %v8682_v2 = vmul.f32 %v6477_v4, %v7902_v16  ;;  %v11267_v31 = vld [vmem:[#allocation53_spill] sm:$0xff] }
 0x2a2   :  { %11231 = vst [vmem:[#allocation43_spill] sm:$0xff] %v8670_v43  ;;  %11233 = vst [vmem:[#allocation117_spill] sm:$0xff] %v8674_v27  ;;  %v6479_v5 = vpop.eup %6478  ;;  %v8692_v34 = vpack.c.bf16 %v1233_v44, %v1229_v60  ;;  %v11257_v27 = vld [vmem:[#allocation130_spill] sm:$0xff] }
 0x2a3   :  { %v1968_v30 = vpop.xlane.xlu0 %1967  ;;  %11236 = vst [vmem:[#allocation57_spill] sm:$0xff] %v8679_v22  ;;  %11237 = vst [vmem:[#allocation56_spill] sm:$0xff] %v8682_v2  ;;  %v2164_v46 = vmul.f32 %v6479_v5, %v11238_v10  ;;  %v2163_v24 = vmul.f32 %v6479_v5, %v11239_v59  ;;  %v8687_v17 = vmul.f32 %v6479_v5, %v11240_v6  ;;  %v11251_v6 = vld [vmem:[#allocation59_spill] sm:$0xff]  ;;  %v11304_v2 = vld [vmem:[#allocation80_spill] sm:$0xff] }
 0x2a4   :  { %v2117_v39 = vmax.f32 %v1968_v30, 1e-16  ;;  %v8690_v54 = vmul.f32 %v6479_v5, %v11242_v36  ;;  %11244 = vst [vmem:[#allocation120_spill] sm:$0xff] %v8692_v34  ;;  %v1236_v30 = vpop.f32.mrb[96].mxu0  ;;  %v8695_v3 = vmul.f32 %v6479_v5, %v11245_v53  ;;  %v11249_v36 = vld [vmem:[#allocation70_spill] sm:$0xff] }
 0x2a5   :  { %v1977_v40 = vpop.xlane.xlu1 %1976  ;;  %11241 = vst [vmem:[#allocation66_spill] sm:$0xff] %v8687_v17  ;;  %v5751_v16 = vpack.c.bf16 %v2164_v46, %v2156_v9  ;;  %v5753_v37 = vpack.c.bf16 %v2163_v24, %v2155_v45  ;;  %v1238_v59 = vpop.f32.mrb[97].mxu0  ;;  %v11247_v46 = vld [vmem:[#allocation49_spill] sm:$0xff]  ;;  %v11248_v9 = vld [vmem:[#allocation48_spill] sm:$0xff] }
 0x2a6   :  { %11243 = vst [vmem:[#allocation61_spill] sm:$0xff] %v8690_v54  ;;  %6484 = vrsqrt.f32 %v2117_v39  ;;  %v2118_v7 = vmax.f32 %v1977_v40, 1e-16  ;;  %11246 = vst [vmem:[#allocation118_spill] sm:$0xff] %v8695_v3  ;;  %v8701_v0 = vpop.eup %6480  ;;  %v1237_v39 = vadd.f32 %v1236_v30, %v8654_v15  ;;  %v1239_v60 = vadd.f32 %v1238_v59, %v8658_v42  ;;  %v1240_v44 = vpop.f32.mrb[98].mxu0  ;;  %v11253_v59 = vld [vmem:[#allocation62_spill] sm:$0xff] }
 0x2a7   :  { %5752 = vmatprep.subr.bf16.mxu0 %v5751_v16  ;;  %v2172_v24 = vmul.f32 %v8701_v0, %v11247_v46  ;;  %v2171_v45 = vmul.f32 %v8701_v0, %v11248_v9  ;;  %v8713_v53 = vmul.f32 %v8701_v0, %v11249_v36  ;;  %v8716_v30 = vmul.f32 %v6477_v4, %v11251_v6  ;;  %v11255_v40 = vld [vmem:[#allocation123_spill] sm:$0xff]  ;;  %v11259_v3 = vld [vmem:[#allocation128_spill] sm:$0xff] }
 0x2a8   :  { %6486 = vrsqrt.f32 %v2118_v7  ;;  %v1242_v7 = vpop.f32.mrb[99].mxu0  ;;  %5754 = vmatpush1.bf16.xpose.msra.mxu0 %v5753_v37  ;;  %v8720_v10 = vmul.f32 %v8701_v0, %v11253_v59  ;;  %v1241_v16 = vadd.f32 %v1240_v44, %v8654_v15  ;;  %v8725_v34 = vmul.f32 %v6479_v5, %v11255_v40  ;;  %v11261_v37 = vld [vmem:[#allocation127_spill] sm:$0xff]  ;;  %v11263_v59 = vld [vmem:[#allocation124_spill] sm:$0xff] }
 0x2a9   :  { %11250 = vst [vmem:[#allocation60_spill] sm:$0xff] %v8713_v53  ;;  %11252 = vst [vmem:[#allocation49_spill] sm:$0xff] %v8716_v30  ;;  %v1243_v46 = vadd.f32 %v1242_v7, %v8658_v42  ;;  %v8729_v36 = vmul.f32 %v8701_v0, %v11257_v27  ;;  %v8733_v4 = vmul.f32 %v8701_v0, %v11259_v3  ;;  %v11268_v17 = vld [vmem:[#allocation52_spill] sm:$0xff]  ;;  %v11274_v27 = vld [vmem:[#allocation131_spill] sm:$0xff] }
 0x2aa   :  { %11254 = vst [vmem:[#allocation48_spill] sm:$0xff] %v8720_v10  ;;  %11256 = vst [vmem:[#allocation70_spill] sm:$0xff] %v8725_v34  ;;  %v8736_v6 = vmul.f32 %v6479_v5, %v11261_v37  ;;  %v8739_v61 = vmul.f32 %v6479_v5, %v11263_v59  ;;  %v8743_v40 = vpack.c.bf16 %v1241_v16, %v1237_v39  ;;  %v11270_v59 = vld [vmem:[#allocation67_spill] sm:$0xff]  ;;  %v1246_v16 = vpop.f32.mrb[100].mxu0 }
 0x2ab   :  { %v1986_v9 = vpop.xlane.xlu0 %1985  ;;  %11258 = vst [vmem:[#allocation59_spill] sm:$0xff] %v8729_v36  ;;  %11260 = vst [vmem:[#allocation62_spill] sm:$0xff] %v8733_v4  ;;  %v8741_v44 = vpop.eup %6482  ;;  %v8745_v43 = vpack.c.bf16 %v1243_v46, %v1239_v60  ;;  %v11272_v46 = vld [vmem:[#allocation132_spill] sm:$0xff]  ;;  %v11282_v36 = vld [vmem:[#allocation69_spill] sm:$0xff] }
 0x2ac   :  { %11262 = vst [vmem:[#allocation123_spill] sm:$0xff] %v8736_v6  ;;  %11264 = vst [vmem:[#allocation130_spill] sm:$0xff] %v8739_v61  ;;  %v2119_v7 = vmax.f32 %v1986_v9, 1e-16  ;;  %v2180_v3 = vmul.f32 %v8741_v44, %v11267_v31  ;;  %v2179_v37 = vmul.f32 %v8741_v44, %v11268_v17  ;;  %v8755_v5 = vmul.f32 %v8741_v44, %v11269_v62  ;;  %v11303_v61 = vld [vmem:[#allocation81_spill] sm:$0xff] }
 0x2ad   :  { %11265 = vst [vmem:[#allocation128_spill] sm:$0xff] %v8743_v40  ;;  %11266 = vst [vmem:[#allocation127_spill] sm:$0xff] %v8745_v43  ;;  %v8759_v39 = vmul.f32 %v8741_v44, %v11270_v59  ;;  %v8763_v9 = vmul.f32 %v8741_v44, %v11272_v46  ;;  %v8767_v31 = vmul.f32 %v8741_v44, %v11274_v27  ;;  %v1248_v43 = vpop.f32.mrb[101].mxu0  ;;  %v11278_v59 = vld [vmem:[#allocation76_spill] sm:$0xff] }
 0x2ae   :  { %v1995_v54 = vpop.xlane.xlu1 %1994  ;;  %6488 = vrsqrt.f32 %v2119_v7  ;;  %v5755_v17 = vpack.c.bf16 %v2180_v3, %v2172_v24  ;;  %v5757_v40 = vpack.c.bf16 %v2179_v37, %v2171_v45  ;;  %v1249_v46 = vadd.f32 %v1248_v43, %v8658_v42  ;;  %v1250_v22 = vpop.f32.mrb[102].mxu0  ;;  %v11276_v24 = vld [vmem:[#allocation64_spill] sm:$0xff]  ;;  %v11277_v3 = vld [vmem:[#allocation63_spill] sm:$0xff] }
 0x2af   :  { %11271 = vst [vmem:[#allocation124_spill] sm:$0xff] %v8759_v39  ;;  %v2120_v60 = vmax.f32 %v1995_v54, 1e-16  ;;  %11273 = vst [vmem:[#allocation53_spill] sm:$0xff] %v8763_v9  ;;  %v1247_v54 = vadd.f32 %v1246_v16, %v8654_v15  ;;  %v1252_v43 = vpop.f32.mrb[103].mxu0  ;;  %v11283_v9 = vld [vmem:[#allocation68_spill] sm:$0xff] }
 0x2b0   :  { %11275 = vst [vmem:[#allocation52_spill] sm:$0xff] %v8767_v31  ;;  %v8773_v7 = vpop.eup %6484  ;;  %5756 = vmatprep.subr.bf16.mxu0 %v5755_v17  ;;  %v1251_v17 = vadd.f32 %v1250_v22, %v8654_v15  ;;  %v1253_v27 = vadd.f32 %v1252_v43, %v8658_v42  ;;  %v11284_v39 = vld [vmem:[#allocation77_spill] sm:$0xff]  ;;  %v11285_v22 = vld [vmem:[#allocation74_spill] sm:$0xff] }
 0x2b1   :  { %6490 = vrsqrt.f32 %v2120_v60  ;;  %v2188_v45 = vmul.f32 %v8773_v7, %v11276_v24  ;;  %v2187_v37 = vmul.f32 %v8773_v7, %v11277_v3  ;;  %v8785_v62 = vmul.f32 %v8773_v7, %v11278_v59  ;;  %v11279_v60 = vld [vmem:[#allocation72_spill] sm:$0xff]  ;;  %5758 = vmatpush1.bf16.xpose.msra.mxu0 %v5757_v40 }
 0x2b2   :  { %v8789_v16 = vmul.f32 %v8773_v7, %v11279_v60  ;;  %v8791_v34 = vpop.eup %6486  ;;  %v8799_v3 = vmul.f32 %v8773_v7, %v8038_v55  ;;  %v8813_v4 = vpack.c.bf16 %v1251_v17, %v1247_v54  ;;  %v8815_v55 = vpack.c.bf16 %v1253_v27, %v1249_v46  ;;  %v1256_v27 = vpop.f32.mrb[104].mxu0 }
 0x2b3   :  { %v2196_v60 = vmul.f32 %v8791_v34, %v11282_v36  ;;  %v2195_v10 = vmul.f32 %v8791_v34, %v11283_v9  ;;  %v8807_v40 = vmul.f32 %v8791_v34, %v11284_v39  ;;  %v8811_v43 = vmul.f32 %v8791_v34, %v11285_v22  ;;  %v1258_v17 = vpop.f32.mrb[105].mxu0  ;;  %v11297_v9 = vld [vmem:[#allocation78_spill] sm:$0xff] }
 0x2b4   :  { %11280 = vst [vmem:[#allocation71_spill] sm:$0xff] %v8789_v16  ;;  %11281 = vst [vmem:[#allocation67_spill] sm:$0xff] %v8799_v3  ;;  %v2004_v59 = vpop.xlane.xlu0 %2003  ;;  %v8819_v31 = vmul.f32 %v8791_v34, %v8062_v32  ;;  %v8827_v22 = vmul.f32 %v8701_v0, %v7984_v50  ;;  %v11305_v3 = vld [vmem:[#allocation85_spill] sm:$0xff] }
 0x2b5   :  { %11286 = vst [vmem:[#allocation132_spill] sm:$0xff] %v8811_v43  ;;  %v2121_v24 = vmax.f32 %v2004_v59, 1e-16  ;;  %11287 = vst [vmem:[#allocation131_spill] sm:$0xff] %v8813_v4  ;;  %v5759_v53 = vpack.c.bf16 %v2196_v60, %v2188_v45  ;;  %v5761_v46 = vpack.c.bf16 %v2195_v10, %v2187_v37  ;;  %v11291_v45 = vld [vmem:[#allocation137_spill] sm:$0xff]  ;;  %v8837_v60 = vmul.f32 %v8791_v34, %v8055_v58  ;;  %v11296_v58 = vld [vmem:[#allocation79_spill] sm:$0xff] }
 0x2b6   :  { %11288 = vst [vmem:[#allocation64_spill] sm:$0xff] %v8815_v55  ;;  %11289 = vst [vmem:[#allocation63_spill] sm:$0xff] %v8819_v31  ;;  %v8833_v59 = vmul.f32 %v8773_v7, %v11291_v45  ;;  %v11294_v45 = vld [vmem:[#allocation135_spill] sm:$0xff]  ;;  %v11312_v16 = vld [vmem:[#allocation129_spill] sm:$0xff] }
 0x2b7   :  { %v2013_v36 = vpop.xlane.xlu1 %2012  ;;  %11290 = vst [vmem:[#allocation76_spill] sm:$0xff] %v8827_v22  ;;  %6492 = vrsqrt.f32 %v2121_v24  ;;  %5760 = vmatprep.subr.bf16.mxu0 %v5759_v53  ;;  %11293 = vst [vmem:[#allocation69_spill] sm:$0xff] %v8837_v60  ;;  %v1257_v53 = vadd.f32 %v1256_v27, %v8654_v15  ;;  %v1259_v24 = vadd.f32 %v1258_v17, %v8658_v42  ;;  %v11298_v4 = vld [vmem:[#allocation83_spill] sm:$0xff]  ;;  %v11328_v22 = vld [vmem:[#allocation92_spill] sm:$0xff] }
 0x2b8   :  { %v2122_v54 = vmax.f32 %v2013_v36, 1e-16  ;;  %11292 = vst [vmem:[#allocation72_spill] sm:$0xff] %v8833_v59  ;;  %v8843_v37 = vpop.eup %6488  ;;  %v1260_v36 = vpop.f32.mrb[106].mxu0  ;;  %v8849_v32 = vmul.f32 %v8741_v44, %v11294_v45 }
 0x2b9   :  { %v2204_v39 = vmul.f32 %v8843_v37, %v11296_v58  ;;  %v2203_v50 = vmul.f32 %v8843_v37, %v11297_v9  ;;  %v8857_v10 = vmul.f32 %v8843_v37, %v11298_v4  ;;  %v1262_v17 = vpop.f32.mrb[107].mxu0  ;;  %5762 = vmatpush1.bf16.xpose.msra.mxu0 %v5761_v46  ;;  %v1261_v45 = vadd.f32 %v1260_v36, %v8654_v15  ;;  %v11307_v36 = vld [vmem:[#allocation84_spill] sm:$0xff] }
 0x2ba   :  { %6494 = vrsqrt.f32 %v2122_v54  ;;  %11295 = vst [vmem:[#allocation68_spill] sm:$0xff] %v8849_v32  ;;  %v11300_v54 = vld [vmem:[#allocation82_spill] sm:$0xff]  ;;  %v1263_v30 = vadd.f32 %v1262_v17, %v8658_v42  ;;  %v8871_v9 = vmul.f32 %v8843_v37, %v8122_v57 }
 0x2bb   :  { %11299 = vst [vmem:[#allocation77_spill] sm:$0xff] %v8857_v10  ;;  %v8861_v27 = vmul.f32 %v8843_v37, %v11300_v54  ;;  %v8863_v55 = vpop.eup %6490  ;;  %v8885_v59 = vpack.c.bf16 %v1261_v45, %v1257_v53  ;;  %v11329_v32 = vld [vmem:[#allocation90_spill] sm:$0xff] }
 0x2bc   :  { %11302 = vst [vmem:[#allocation137_spill] sm:$0xff] %v8871_v9  ;;  %v2212_v54 = vmul.f32 %v8863_v55, %v11303_v61  ;;  %v2211_v6 = vmul.f32 %v8863_v55, %v11304_v2  ;;  %v8879_v46 = vmul.f32 %v8863_v55, %v11305_v3  ;;  %v8883_v17 = vmul.f32 %v8863_v55, %v11307_v36  ;;  %v11323_v2 = vld [vmem:[#allocation95_spill] sm:$0xff]  ;;  %v11338_v10 = vld [vmem:[#allocation138_spill] sm:$0xff] }
 0x2bd   :  { %11301 = vst [vmem:[#allocation74_spill] sm:$0xff] %v8861_v27  ;;  %11309 = vst [vmem:[#allocation78_spill] sm:$0xff] %v8885_v59  ;;  %v8887_v57 = vpack.c.bf16 %v1263_v30, %v1259_v24  ;;  %v8891_v60 = vmul.f32 %v8863_v55, %v8145_v35  ;;  %v8899_v36 = vmul.f32 %v8701_v0, %v11312_v16  ;;  %v1266_v24 = vpop.f32.mrb[108].mxu0  ;;  %v11322_v35 = vld [vmem:[#allocation88_spill] sm:$0xff] }
 0x2be   :  { %v2022_v4 = vpop.xlane.xlu0 %2021  ;;  %11306 = vst [vmem:[#allocation135_spill] sm:$0xff] %v8879_v46  ;;  %11308 = vst [vmem:[#allocation79_spill] sm:$0xff] %v8883_v17  ;;  %v5763_v31 = vpack.c.bf16 %v2212_v54, %v2204_v39  ;;  %v5765_v30 = vpack.c.bf16 %v2211_v6, %v2203_v50  ;;  %v1267_v39 = vadd.f32 %v1266_v24, %v8654_v15  ;;  %v1268_v45 = vpop.f32.mrb[109].mxu0  ;;  %v11315_v54 = vld [vmem:[#allocation145_spill] sm:$0xff]  ;;  %v11389_v46 = vld [vmem:[#allocation119_spill] sm:$0xff] }
 0x2bf   :  { %v2123_v58 = vmax.f32 %v2022_v4, 1e-16  ;;  %11310 = vst [vmem:[#allocation83_spill] sm:$0xff] %v8887_v57  ;;  %11311 = vst [vmem:[#allocation82_spill] sm:$0xff] %v8891_v60  ;;  %v8906_v4 = vmul.f32 %v8843_v37, %v8110_v19  ;;  %v8910_v3 = vmul.f32 %v8863_v55, %v11315_v54  ;;  %v1269_v16 = vadd.f32 %v1268_v45, %v8658_v42  ;;  %v11317_v50 = vld [vmem:[#allocation133_spill] sm:$0xff]  ;;  %v11325_v45 = vld [vmem:[#allocation94_spill] sm:$0xff] }
 0x2c0   :  { %v2031_v61 = vpop.xlane.xlu1 %2030  ;;  %11313 = vst [vmem:[#allocation81_spill] sm:$0xff] %v8899_v36  ;;  %5764 = vmatprep.subr.bf16.mxu0 %v5763_v31  ;;  %v1270_v31 = vpop.f32.mrb[110].mxu0  ;;  %v11321_v24 = vld [vmem:[#allocation89_spill] sm:$0xff] }
 0x2c1   :  { %6496 = vrsqrt.f32 %v2123_v58  ;;  %v2124_v53 = vmax.f32 %v2031_v61, 1e-16  ;;  %11314 = vst [vmem:[#allocation80_spill] sm:$0xff] %v8906_v4  ;;  %11316 = vst [vmem:[#allocation85_spill] sm:$0xff] %v8910_v3  ;;  %v8914_v6 = vpop.eup %6492  ;;  %v8919_v58 = vmul.f32 %v8741_v44, %v11317_v50  ;;  %v11319_v61 = vld [vmem:[#allocation140_spill] sm:$0xff]  ;;  %v1272_v44 = vpop.f32.mrb[111].mxu0  ;;  %5766 = vmatpush1.bf16.xpose.msra.mxu0 %v5765_v30 }
 0x2c2   :  { %v8923_v19 = vmul.f32 %v8791_v34, %v11319_v61  ;;  %v2220_v54 = vmul.f32 %v8914_v6, %v11321_v24  ;;  %v2219_v0 = vmul.f32 %v8914_v6, %v11322_v35  ;;  %v8935_v59 = vmul.f32 %v8914_v6, %v11325_v45  ;;  %v11330_v60 = vld [vmem:[#allocation101_spill] sm:$0xff]  ;;  %v11336_v3 = vld [vmem:[#allocation155_spill] sm:$0xff] }
 0x2c3   :  { %6498 = vrsqrt.f32 %v2124_v53  ;;  %11318 = vst [vmem:[#allocation84_spill] sm:$0xff] %v8919_v58  ;;  %v8931_v53 = vmul.f32 %v8914_v6, %v11323_v2  ;;  %v1271_v61 = vadd.f32 %v1270_v31, %v8654_v15  ;;  %v1273_v57 = vadd.f32 %v1272_v44, %v8658_v42  ;;  %v11332_v31 = vld [vmem:[#allocation96_spill] sm:$0xff]  ;;  %v11357_v36 = vld [vmem:[#allocation105_spill] sm:$0xff] }
 0x2c4   :  { %11320 = vst [vmem:[#allocation129_spill] sm:$0xff] %v8923_v19  ;;  %11326 = vst [vmem:[#allocation133_spill] sm:$0xff] %v8935_v59  ;;  %v8937_v50 = vpop.eup %6494  ;;  %v8945_v35 = vmul.f32 %v8914_v6, %v8202_v12  ;;  %v11358_v58 = vld [vmem:[#allocation104_spill] sm:$0xff] }
 0x2c5   :  { %11324 = vst [vmem:[#allocation145_spill] sm:$0xff] %v8931_v53  ;;  %v2228_v45 = vmul.f32 %v8937_v50, %v11328_v22  ;;  %v2227_v9 = vmul.f32 %v8937_v50, %v11329_v32  ;;  %v8953_v30 = vmul.f32 %v8937_v50, %v11330_v60  ;;  %v8957_v44 = vmul.f32 %v8937_v50, %v11332_v31  ;;  %v11348_v60 = vld [vmem:[#allocation99_spill] sm:$0xff]  ;;  %v11349_v32 = vld [vmem:[#allocation109_spill] sm:$0xff] }
 0x2c6   :  { %11327 = vst [vmem:[#allocation140_spill] sm:$0xff] %v8945_v35  ;;  %v2040_v2 = vpop.xlane.xlu0 %2039  ;;  %v8959_v4 = vpack.c.bf16 %v1271_v61, %v1267_v39  ;;  %v8961_v12 = vpack.c.bf16 %v1273_v57, %v1269_v16  ;;  %v8965_v27 = vmul.f32 %v8937_v50, %v11336_v3  ;;  %v8973_v31 = vmul.f32 %v8773_v7, %v11338_v10  ;;  %v1276_v3 = vpop.f32.mrb[112].mxu0  ;;  %v11340_v61 = vld [vmem:[#allocation150_spill] sm:$0xff]  ;;  %v11346_v16 = vld [vmem:[#allocation139_spill] sm:$0xff] }
 0x2c7   :  { %11331 = vst [vmem:[#allocation89_spill] sm:$0xff] %v8953_v30  ;;  %11333 = vst [vmem:[#allocation88_spill] sm:$0xff] %v8957_v44  ;;  %v2125_v24 = vmax.f32 %v2040_v2, 1e-16  ;;  %v5767_v17 = vpack.c.bf16 %v2228_v45, %v2220_v54  ;;  %v5769_v57 = vpack.c.bf16 %v2227_v9, %v2219_v0  ;;  %v8979_v54 = vmul.f32 %v8914_v6, %v11340_v61  ;;  %v11342_v2 = vld [vmem:[#allocation154_spill] sm:$0xff]  ;;  %v1278_v0 = vpop.f32.mrb[113].mxu0 }
 0x2c8   :  { %11334 = vst [vmem:[#allocation95_spill] sm:$0xff] %v8959_v4  ;;  %11335 = vst [vmem:[#allocation94_spill] sm:$0xff] %v8961_v12  ;;  %v2049_v22 = vpop.xlane.xlu1 %2048  ;;  %v8983_v45 = vmul.f32 %v8937_v50, %v11342_v2  ;;  %v8998_v2 = vmul.f32 %v8791_v34, %v11346_v16  ;;  %v11351_v4 = vld [vmem:[#allocation106_spill] sm:$0xff]  ;;  %v11353_v12 = vld [vmem:[#allocation143_spill] sm:$0xff]  ;;  %v1279_v34 = vadd.f32 %v1278_v0, %v8658_v42 }
 0x2c9   :  { %11337 = vst [vmem:[#allocation92_spill] sm:$0xff] %v8965_v27  ;;  %11339 = vst [vmem:[#allocation90_spill] sm:$0xff] %v8973_v31  ;;  %6500 = vrsqrt.f32 %v2125_v24  ;;  %v2126_v39 = vmax.f32 %v2049_v22, 1e-16  ;;  %5768 = vmatprep.subr.bf16.mxu0 %v5767_v17  ;;  %v1277_v17 = vadd.f32 %v1276_v3, %v8654_v15  ;;  %v11344_v22 = vld [vmem:[#allocation136_spill] sm:$0xff]  ;;  %v1280_v3 = vpop.f32.mrb[114].mxu0 }
 0x2ca   :  { %11341 = vst [vmem:[#allocation101_spill] sm:$0xff] %v8979_v54  ;;  %11343 = vst [vmem:[#allocation96_spill] sm:$0xff] %v8983_v45  ;;  %v8994_v61 = vmul.f32 %v8773_v7, %v11344_v22  ;;  %v9012_v7 = vmul.f32 %v8843_v37, %v11353_v12  ;;  %5770 = vmatpush1.bf16.xpose.msra.mxu0 %v5769_v57  ;;  %v1282_v16 = vpop.f32.mrb[115].mxu0  ;;  %v11355_v31 = vld [vmem:[#allocation158_spill] sm:$0xff]  ;;  %v11359_v57 = vld [vmem:[#allocation111_spill] sm:$0xff] }
 0x2cb   :  { %v8989_v9 = vpop.eup %6496  ;;  %6502 = vrsqrt.f32 %v2126_v39  ;;  %11347 = vst [vmem:[#allocation138_spill] sm:$0xff] %v8998_v2  ;;  %v11364_v45 = vld [vmem:[#allocation162_spill] sm:$0xff] }
 0x2cc   :  { %11345 = vst [vmem:[#allocation155_spill] sm:$0xff] %v8994_v61  ;;  %v2236_v10 = vmul.f32 %v8989_v9, %v11348_v60  ;;  %v9004_v24 = vmul.f32 %v8989_v9, %v11349_v32  ;;  %v9008_v39 = vmul.f32 %v8989_v9, %v11351_v4  ;;  %11354 = vst [vmem:[#allocation136_spill] sm:$0xff] %v9012_v7  ;;  %v11384_v61 = vld [vmem:[#allocation163_spill] sm:$0xff] }
 0x2cd   :  { %v9014_v22 = vpop.eup %6498  ;;  %v1281_v60 = vadd.f32 %v1280_v3, %v8654_v15  ;;  %v9022_v4 = vmul.f32 %v8989_v9, %v11355_v31  ;;  %v11361_v3 = vld [vmem:[#allocation110_spill] sm:$0xff]  ;;  %v1283_v31 = vadd.f32 %v1282_v16, %v8658_v42  ;;  %v11368_v16 = vld [vmem:[#allocation91_spill] sm:$0xff] }
 0x2ce   :  { %11350 = vst [vmem:[#allocation150_spill] sm:$0xff] %v9004_v24  ;;  %11352 = vst [vmem:[#allocation154_spill] sm:$0xff] %v9008_v39  ;;  %v2244_v12 = vmul.f32 %v9014_v22, %v11357_v36  ;;  %v2243_v35 = vmul.f32 %v9014_v22, %v11358_v58  ;;  %v9030_v0 = vmul.f32 %v9014_v22, %v11359_v57  ;;  %v11366_v58 = vld [vmem:[#allocation98_spill] sm:$0xff]  ;;  %v11387_v39 = vld [vmem:[#allocation37_spill] sm:$0xff] }
 0x2cf   :  { %11356 = vst [vmem:[#allocation139_spill] sm:$0xff] %v9022_v4  ;;  %v2058_v19 = vpop.xlane.xlu0 %2057  ;;  %v9034_v27 = vmul.f32 %v9014_v22, %v11361_v3  ;;  %v9036_v54 = vpack.c.bf16 %v1281_v60, %v1277_v17  ;;  %v9041_v59 = vmul.f32 %v9014_v22, %v11364_v45  ;;  %v2235_v53 = vmul.f32 %v8989_v9, %v11366_v58  ;;  %v11379_v3 = vld [vmem:[#allocation44_spill] sm:$0xff] }
 0x2d0   :  { %11360 = vst [vmem:[#allocation99_spill] sm:$0xff] %v9030_v0  ;;  %v2127_v32 = vmax.f32 %v2058_v19, 1e-16  ;;  %v5771_v44 = vpack.c.bf16 %v2244_v12, %v2236_v10  ;;  %v9049_v17 = vpack.c.bf16 %v1283_v31, %v1279_v34  ;;  %v9055_v10 = vmul.f32 %v8989_v9, %v11368_v16  ;;  %v11370_v12 = vld [vmem:[#allocation161_spill] sm:$0xff]  ;;  %v1286_v34 = vpop.f32.mrb[116].mxu0  ;;  %v11372_v31 = vld [vmem:[#allocation146_spill] sm:$0xff] }
 0x2d1   :  { %11362 = vst [vmem:[#allocation109_spill] sm:$0xff] %v9034_v27  ;;  %11363 = vst [vmem:[#allocation106_spill] sm:$0xff] %v9036_v54  ;;  %v2067_v36 = vpop.xlane.xlu1 %2066  ;;  %v5773_v45 = vpack.c.bf16 %v2243_v35, %v2235_v53  ;;  %v9059_v58 = vmul.f32 %v9014_v22, %v11370_v12  ;;  %v11374_v53 = vld [vmem:[#allocation142_spill] sm:$0xff]  ;;  %v11378_v12 = vld [vmem:[#allocation47_spill] sm:$0xff] }
 0x2d2   :  { %11365 = vst [vmem:[#allocation143_spill] sm:$0xff] %v9041_v59  ;;  %6504 = vrsqrt.f32 %v2127_v32  ;;  %v2128_v19 = vmax.f32 %v2067_v36, 1e-16  ;;  %11367 = vst [vmem:[#allocation158_spill] sm:$0xff] %v9049_v17  ;;  %5772 = vmatprep.subr.bf16.mxu0 %v5771_v44  ;;  %v9067_v36 = vmul.f32 %v8863_v55, %v11372_v31  ;;  %v9071_v35 = vmul.f32 %v8843_v37, %v11374_v53  ;;  %v11376_v44 = vld [vmem:[#allocation144_spill] sm:$0xff]  ;;  %v11386_v59 = vld [vmem:[#allocation39_spill] sm:$0xff] }
 0x2d3   :  { %11369 = vst [vmem:[#allocation105_spill] sm:$0xff] %v9055_v10  ;;  %11371 = vst [vmem:[#allocation104_spill] sm:$0xff] %v9059_v58  ;;  %v9063_v32 = vpop.eup %6500  ;;  %v9075_v16 = vmul.f32 %v8863_v55, %v11376_v44  ;;  %v11381_v31 = vld [vmem:[#allocation152_spill] sm:$0xff]  ;;  %5774 = vmatpush1.bf16.xpose.msra.mxu0 %v5773_v45  ;;  %v1287_v44 = vadd.f32 %v1286_v34, %v8654_v15  ;;  %v11388_v34 = vld [vmem:[#allocation35_spill] sm:$0xff] }
 0x2d4   :  { %6506 = vrsqrt.f32 %v2128_v19  ;;  %11373 = vst [vmem:[#allocation111_spill] sm:$0xff] %v9067_v36  ;;  %11375 = vst [vmem:[#allocation110_spill] sm:$0xff] %v9071_v35  ;;  %v2252_v60 = vmul.f32 %v9063_v32, %v11378_v12  ;;  %v2251_v57 = vmul.f32 %v9063_v32, %v11379_v3  ;;  %v11380_v19 = vld [vmem:[#allocation34_spill] sm:$0xff]  ;;  %v9087_v17 = vmul.f32 %v8914_v6, %v11381_v31  ;;  %v11383_v53 = vld [vmem:[#allocation28_spill] sm:$0xff]  ;;  %v1288_v12 = vpop.f32.mrb[117].mxu0 }
 0x2d5   :  { %11377 = vst [vmem:[#allocation162_spill] sm:$0xff] %v9075_v16  ;;  %v9083_v54 = vmul.f32 %v9063_v32, %v11380_v19  ;;  %v9089_v37 = vpop.eup %6502  ;;  %v9093_v55 = vmul.f32 %v9063_v32, %v11383_v53  ;;  %v9100_v19 = vmul.f32 %v9063_v32, %v11384_v61  ;;  %v11385_v31 = vld [vmem:[#allocation50_spill] sm:$0xff]  ;;  %v1290_v3 = vpop.f32.mrb[118].mxu0  ;;  %v1289_v61 = vadd.f32 %v1288_v12, %v8658_v42 }
 0x2d6   :  { %11382 = vst [vmem:[#allocation98_spill] sm:$0xff] %v9087_v17  ;;  %v2260_v4 = vmul.f32 %v9089_v37, %v11385_v31  ;;  %v2259_v45 = vmul.f32 %v9089_v37, %v11386_v59  ;;  %v9108_v53 = vmul.f32 %v9089_v37, %v11387_v39  ;;  %v9112_v27 = vmul.f32 %v9089_v37, %v11388_v34  ;;  %v1292_v24 = vpop.f32.mrb[119].mxu0 }
 0x2d7   :  { %v2076_v2 = vpop.xlane.xlu0 %2075  ;;  %v1291_v58 = vadd.f32 %v1290_v3, %v8654_v15  ;;  %v9118_v31 = vmul.f32 %v9089_v37, %v8391_v41  ;;  %v1296_v30 = vpop.f32.mrb[120].mxu0  ;;  %v1293_v41 = vadd.f32 %v1292_v24, %v8658_v42  ;;  %v11400_v34 = vunpack.c.0.s8 %v8648_v11  ;;  %v11402_v24 = vld [vmem:[#allocation51_spill] sm:$0xff] }
 0x2d8   :  { %v2129_v10 = vmax.f32 %v2076_v2, 1e-16  ;;  %v5775_v0 = vpack.c.bf16 %v2260_v4, %v2252_v60  ;;  %v9126_v2 = vmul.f32 %v9063_v32, %v11389_v46  ;;  %v5777_v43 = vpack.c.bf16 %v2259_v45, %v2251_v57  ;;  %v11392_v60 = vld [vmem:[#allocation166_spill] sm:$0xff]  ;;  %v11398_v45 = vld [vmem:[#allocation73_spill] sm:$0xff] }
 0x2d9   :  { %v2085_v59 = vpop.xlane.xlu1 %2084  ;;  %v9128_v3 = vpack.c.bf16 %v1291_v58, %v1287_v44  ;;  %v9135_v39 = vmul.f32 %v9089_v37, %v11392_v60  ;;  %v11397_v58 = vld [vmem:[#allocation122_spill] sm:$0xff]  ;;  %v11399_v60 = vld [vmem:[#allocation32_spill] sm:$0xff] }
 0x2da   :  { %11390 = vst [vmem:[#allocation91_spill] sm:$0xff] %v9126_v2  ;;  %6508 = vrsqrt.f32 %v2129_v10  ;;  %v2130_v12 = vmax.f32 %v2085_v59, 1e-16  ;;  %5776 = vmatprep.subr.bf16.mxu0 %v5775_v0  ;;  %v9141_v10 = vpack.c.bf16 %v1293_v41, %v1289_v61  ;;  %v11395_v0 = vld [vmem:[#allocation156_spill] sm:$0xff]  ;;  %v9156_v4 = vsub.s32 %v11400_v34, %v11399_v60  ;;  %v11401_v41 = vld [vmem:[#allocation29_spill] sm:$0xff] }
 0x2db   :  { %11391 = vst [vmem:[#allocation161_spill] sm:$0xff] %v9128_v3  ;;  %11393 = vst [vmem:[#allocation146_spill] sm:$0xff] %v9135_v39  ;;  %v9147_v57 = vmul.f32 %v8937_v50, %v11395_v0  ;;  %v1297_v61 = vadd.f32 %v1296_v30, %v8654_v15  ;;  %5778 = vmatpush1.bf16.xpose.msra.mxu0 %v5777_v43  ;;  %v1298_v3 = vpop.f32.mrb[121].mxu0  ;;  %v11403_v30 = vld [vmem:[#allocation125_spill] sm:$0xff]  ;;  %v11404_v43 = vld [vmem:[#allocation30_spill] sm:$0xff] }
 0x2dc   :  { %v9139_v46 = vpop.eup %6504  ;;  %6510 = vrsqrt.f32 %v2130_v12  ;;  %11394 = vst [vmem:[#allocation142_spill] sm:$0xff] %v9141_v10  ;;  %v1300_v7 = vpop.f32.mrb[122].mxu0  ;;  %v1299_v36 = vadd.f32 %v1298_v3, %v8658_v42 }
 0x2dd   :  { %11396 = vst [vmem:[#allocation144_spill] sm:$0xff] %v9147_v57  ;;  %v2268_v44 = vmul.f32 %v9139_v46, %v11397_v58  ;;  %v2267_v59 = vmul.f32 %v9139_v46, %v11398_v45  ;;  %v9163_v0 = vmul.f32 %v9139_v46, %v11401_v41  ;;  %v9167_v58 = vmul.f32 %v9139_v46, %v11402_v24  ;;  %v11405_v41 = vld [vmem:[#allocation65_spill] sm:$0xff]  ;;  %v11406_v24 = vld [vmem:[#allocation55_spill] sm:$0xff]  ;;  %v1302_v17 = vpop.f32.mrb[123].mxu0 }
 0x2de   :  { %v9159_v12 = vpop.eup %6506  ;;  %v1301_v11 = vadd.f32 %v1300_v7, %v8654_v15  ;;  %v1306_v2 = vpop.f32.mrb[124].mxu0 }
 0x2df   :  { %v2094_v34 = vpop.xlane.xlu0 %2093  ;;  %v2276_v10 = vmul.f32 %v9159_v12, %v11403_v30  ;;  %v2275_v60 = vmul.f32 %v9159_v12, %v11404_v43  ;;  %v9179_v35 = vmul.f32 %v9159_v12, %v11405_v41  ;;  %v9183_v16 = vmul.f32 %v9159_v12, %v11406_v24 }
 0x2e0   :  { %v2131_v45 = vmax.f32 %v2094_v34, 1e-16  ;;  %v9189_v30 = vmul.f32 %v9159_v12, %v8463_v13  ;;  %v2103_v43 = vpop.xlane.xlu1 %2102  ;;  %v9197_v34 = vmul.f32 %v9139_v46, %v8438_v21  ;;  %v9199_v3 = vpack.c.bf16 %v1301_v11, %v1297_v61 }
 0x2e1   :  { %v5779_v57 = vpack.c.bf16 %v2276_v10, %v2268_v44  ;;  %v2132_v7 = vmax.f32 %v2103_v43, 1e-16  ;;  %v1303_v13 = vadd.f32 %v1302_v17, %v8658_v42  ;;  %v5781_v39 = vpack.c.bf16 %v2275_v60, %v2267_v59  ;;  %v11414_v60 = vld [vmem:[#allocation141_spill] sm:$0xff] }
 0x2e2   :  { %11407 = vst [vmem:[#allocation47_spill] sm:$0xff] %v9189_v30  ;;  %11408 = vst [vmem:[#allocation44_spill] sm:$0xff] %v9197_v34  ;;  %6512 = vrsqrt.f32 %v2131_v45  ;;  %v9206_v24 = vmul.f32 %v9139_v46, %v8428_v25  ;;  %v9210_v21 = vmul.f32 %v9159_v12, %v8454_v49  ;;  %v1307_v17 = vadd.f32 %v1306_v2, %v8654_v15  ;;  %v11415_v25 = vld [vmem:[#allocation151_spill] sm:$0xff]  ;;  %v11417_v49 = vld [vmem:[#allocation153_spill] sm:$0xff] }
 0x2e3   :  { %11409 = vst [vmem:[#allocation34_spill] sm:$0xff] %v9199_v3  ;;  %5780 = vmatprep.subr.bf16.mxu0 %v5779_v57  ;;  %v230_v10 = vpop.xlane.xlu0 %229  ;;  %6514 = vrsqrt.f32 %v2132_v7  ;;  %v9214_v11 = vpack.c.bf16 %v1303_v13, %v1299_v36  ;;  %v11413_v57 = vld [vmem:[#allocation147_spill] sm:$0xff]  ;;  %v9223_v44 = vmul.f32 %v8914_v6, %v11415_v25  ;;  %v9227_v41 = vmul.f32 %v8937_v50, %v11417_v49  ;;  %v11419_v36 = vld [vmem:[#allocation126_spill] sm:$0xff]  ;;  %v11422_v49 = vld [vmem:[#allocation148_spill] sm:$0xff] }
 0x2e4   :  { %11410 = vst [vmem:[#allocation152_spill] sm:$0xff] %v9206_v24  ;;  %11411 = vst [vmem:[#allocation28_spill] sm:$0xff] %v9210_v21  ;;  %v9212_v45 = vpop.eup %6508  ;;  %v231_v61 = vmax.f32 %v230_v10, 1e-16  ;;  %5782 = vmatpush1.bf16.xpose.msra.mxu0 %v5781_v39  ;;  %v11420_v13 = vld [vmem:[#allocation75_spill] sm:$0xff]  ;;  %v11421_v25 = vld [vmem:[#allocation86_spill] sm:$0xff] }
 0x2e5   :  { %11412 = vst [vmem:[#allocation163_spill] sm:$0xff] %v9214_v11  ;;  %v2284_v59 = vmul.f32 %v9212_v45, %v11413_v57  ;;  %v2283_v43 = vmul.f32 %v9212_v45, %v11414_v60  ;;  %11416 = vst [vmem:[#allocation50_spill] sm:$0xff] %v9223_v44  ;;  %v9233_v2 = vmul.f32 %v9212_v45, %v11419_v36  ;;  %v1308_v57 = vpop.f32.mrb[125].mxu0  ;;  %v11424_v36 = vld [vmem:[#allocation31_spill] sm:$0xff] }
 0x2e6   :  { %11418 = vst [vmem:[#allocation39_spill] sm:$0xff] %v9227_v41  ;;  %v9229_v7 = vpop.eup %6510  ;;  %6516 = vrsqrt.f32 %v231_v61  ;;  %v9237_v10 = vmul.f32 %v9212_v45, %v11420_v13  ;;  %v2112_v60 = vpop.xlane.xlu1 %2111  ;;  %v11423_v61 = vld [vmem:[#allocation134_spill] sm:$0xff]  ;;  %v1309_v30 = vadd.f32 %v1308_v57, %v8658_v42  ;;  %v11440_v44 = vld [vmem:[#allocation87_spill] sm:$0xff] }
 0x2e7   :  { %v2292_v50 = vmul.f32 %v9229_v7, %v11421_v25  ;;  %v2291_v39 = vmul.f32 %v9229_v7, %v11422_v49  ;;  %v9247_v3 = vmul.f32 %v9229_v7, %v11423_v61  ;;  %v9251_v11 = vmul.f32 %v9229_v7, %v11424_v36  ;;  %v1310_v13 = vpop.f32.mrb[126].mxu0  ;;  %v11435_v61 = vld [vmem:[#allocation157_spill] sm:$0xff] }
 0x2e8   :  { %v2133_v34 = vmax.f32 %v2112_v60, 1e-16  ;;  %v1311_v6 = vadd.f32 %v1310_v13, %v8654_v15  ;;  %v1312_v24 = vpop.f32.mrb[127].mxu0  ;;  %v9257_v25 = vmul.f32 %v9229_v7, %v8537_v20  ;;  %v9265_v60 = vmul.f32 %v9212_v45, %v8510_v38 }
 0x2e9   :  { %v5783_v49 = vpack.c.bf16 %v2292_v50, %v2284_v59  ;;  %v1316_v36 = vpop.f32.mrb[128].mxu0  ;;  %v1313_v13 = vadd.f32 %v1312_v24, %v8658_v42  ;;  %v9272_v20 = vmul.f32 %v9212_v45, %v8500_v23  ;;  %v5785_v59 = vpack.c.bf16 %v2291_v39, %v2283_v43  ;;  %v11429_v23 = vld [vmem:[#allocation159_spill] sm:$0xff]  ;;  %v11434_v50 = vld [vmem:[#allocation54_spill] sm:$0xff] }
 0x2ea   :  { %6518 = vrsqrt.f32 %v2133_v34  ;;  %v9267_v57 = vpack.c.bf16 %v1311_v6, %v1307_v17  ;;  %v9278_v21 = vmul.f32 %v9229_v7, %v8526_v29  ;;  %v1317_v24 = vadd.f32 %v1316_v36, %v8654_v15  ;;  %v11431_v43 = vld [vmem:[#allocation115_spill] sm:$0xff]  ;;  %v11436_v36 = vld [vmem:[#allocation160_spill] sm:$0xff] }
 0x2eb   :  { %11426 = vst [vmem:[#allocation35_spill] sm:$0xff] %v9272_v20  ;;  %5784 = vmatprep.subr.bf16.mxu0 %v5783_v49  ;;  %v9284_v17 = vpack.c.bf16 %v1313_v13, %v1309_v30  ;;  %v9289_v6 = vmul.f32 %v8989_v9, %v11429_v23  ;;  %v9293_v39 = vmul.f32 %v9014_v22, %v11431_v43  ;;  %v11433_v49 = vld [vmem:[#allocation100_spill] sm:$0xff]  ;;  %v11437_v43 = vld [vmem:[#allocation149_spill] sm:$0xff] }
 0x2ec   :  { %11425 = vst [vmem:[#allocation37_spill] sm:$0xff] %v9267_v57  ;;  %11427 = vst [vmem:[#allocation119_spill] sm:$0xff] %v9278_v21  ;;  %v9282_v34 = vpop.eup %6512  ;;  %v9303_v30 = vmul.f32 %v8989_v9, %v11435_v61  ;;  %v9307_v13 = vmul.f32 %v9014_v22, %v11436_v36  ;;  %5786 = vmatpush1.bf16.xpose.msra.mxu0 %v5785_v59  ;;  %v11438_v22 = vld [vmem:[#allocation107_spill] sm:$0xff]  ;;  %v11439_v36 = vld [vmem:[#allocation102_spill] sm:$0xff] }
 0x2ed   :  { %11428 = vst [vmem:[#allocation166_spill] sm:$0xff] %v9284_v17  ;;  %11430 = vst [vmem:[#allocation156_spill] sm:$0xff] %v9289_v6  ;;  %v2300_v29 = vmul.f32 %v9282_v34, %v11433_v49  ;;  %v9299_v38 = vmul.f32 %v9282_v34, %v11434_v50  ;;  %v9309_v23 = vpop.eup %6514  ;;  %v9313_v57 = vmul.f32 %v9282_v34, %v11437_v43  ;;  %v1318_v49 = vpop.f32.mrb[129].mxu0 }
 0x2ee   :  { %11432 = vst [vmem:[#allocation122_spill] sm:$0xff] %v9293_v39  ;;  %v9319_v17 = vmul.f32 %v9282_v34, %v8575_v52  ;;  %v2308_v61 = vmul.f32 %v9309_v23, %v11438_v22  ;;  %v2307_v59 = vmul.f32 %v9309_v23, %v11439_v36  ;;  %v9329_v43 = vmul.f32 %v9309_v23, %v8327_v14  ;;  %v1320_v41 = vpop.f32.mrb[130].mxu0 }
 0x2ef   :  { %v9333_v50 = vmul.f32 %v9309_v23, %v11440_v44  ;;  %v1319_v20 = vadd.f32 %v1318_v49, %v8658_v42  ;;  %v1321_v9 = vadd.f32 %v1320_v41, %v8654_v15  ;;  %v1322_v6 = vpop.f32.mrb[131].mxu0  ;;  %v9339_v22 = vmul.f32 %v9309_v23, %v8594_v51  ;;  %v11442_v49 = vld [vmem:[#allocation93_spill] sm:$0xff] }
 0x2f0   :  { %v6517_v52 = vpop.eup %6516  ;;  %v9343_v36 = vmul.f32 %v9309_v23, %v8589_v48  ;;  %v5787_v14 = vpack.c.bf16 %v2308_v61, %v2300_v29  ;;  %v9350_v21 = vpop.f32.mrb[132].mxu0  ;;  %v9354_v41 = vmul.f32 %v9282_v34, %v8565_v63  ;;  %v2299_v51 = vmul.f32 %v9282_v34, %v11442_v49  ;;  %v6543_v29 = vld [vmem:[#allocation6] sm:$0xff] }
 0x2f1   :  { %v9346_v39 = vrot.slane %v6517_v52, %v9156_v4  ;;  %11441 = vst [vmem:[#allocation73_spill] sm:$0xff] %v9350_v21  ;;  %v9360_v15 = vpack.c.bf16 %v1321_v9, %v1317_v24  ;;  %v1323_v4 = vadd.f32 %v1322_v6, %v8658_v42  ;;  %v11445_v9 = vld [vmem:[#allocation121_spill] sm:$0xff]  ;;  %v9381_v63 = vpop.f32.mrb[133].mxu0 }
 0x2f2   :  { %5788 = vmatprep.subr.bf16.mxu0 %v5787_v14  ;;  %v5789_v49 = vpack.c.bf16 %v2307_v59, %v2299_v51  ;;  %v9376_v6 = vmul.f32 %v9089_v37, %v11445_v9  ;;  %11447 = vst [vmem:[#allocation125_spill] sm:$0xff] %v9381_v63  ;;  %v11450_v24 = vld [vmem:[#allocation41_spill] sm:$0xff] }
 0x2f3   :  { %11443 = vst [vmem:[#allocation29_spill] sm:$0xff] %v9360_v15  ;;  %v242_v61 = vmul.f32 %v6543_v29, %v9346_v39  ;;  %v9370_v21 = vpack.c.bf16 %v1323_v4, %v1319_v20  ;;  %v11446_v29 = vld [vmem:[#allocation114_spill] sm:$0xff]  ;;  %v11448_v15 = vld [vmem:[#allocation164_spill] sm:$0xff]  ;;  %v1330_v4 = vpop.f32.mrb[134].mxu0  ;;  %v11453_v42 = vld [vmem:[#allocation97_spill] sm:$0xff] }
 0x2f4   :  { %v9368_v44 = vpop.eup %6518  ;;  %5790 = vmatpush1.bf16.xpose.msra.mxu0 %v5789_v49  ;;  %v9385_v20 = vmul.f32 %v9063_v32, %v11448_v15  ;;  %v1331_v9 = vpop.f32.mrb[135].mxu0  ;;  %v11452_v49 = vld [vmem:[#allocation112_spill] sm:$0xff] }
 0x2f5   :  { %11444 = vst [vmem:[#allocation51_spill] sm:$0xff] %v9370_v21  ;;  %v2316_v14 = vmul.f32 %v9368_v44, %v8497_v56  ;;  %v2332_v52 = vrot.slane %v242_v61, %v11446_v29  ;;  %v2325_v48 = vcombine.high %v242_v61, %v242_v61  ;;  %v9392_v56 = vrot.slane %v8650_v18, %v11450_v24  ;;  %v1508_v15 = vpop.f32.mrb[136].mxu0  ;;  %v11455_v24 = vld [vmem:[#allocation168_spill] sm:$0xff]  ;;  %v11456_v61 = vld [vmem:[#allocation170_spill] sm:$0xff] }
 0x2f6   :  { %11449 = vst [vmem:[#allocation30_spill] sm:$0xff] %v9385_v20  ;;  %v2315_v63 = vmul.f32 %v9368_v44, %v11452_v49  ;;  %v9410_v21 = vmul.f32 %v9139_v46, %v11455_v24  ;;  %v9414_v49 = vmul.f32 %v9159_v12, %v11456_v61  ;;  %v9432_v24 = vmul.f32 %v9229_v7, %v8554_v26 }
 0x2f7   :  { %2407 = vmatprep.subr.mxu0 %v2316_v14  ;;  %v2340_v59 = vcombine.high %v2332_v52, %v2332_v52  ;;  %v9388_v51 = vrot.slane %v2325_v48, %v11446_v29  ;;  %11451 = vst [vmem:[#allocation65_spill] sm:$0xff] %v9392_v56  ;;  %v9400_v14 = vmul.f32 %v9063_v32, %v11453_v42  ;;  %v11454_v48 = vld [vmem:[#allocation165_spill] sm:$0xff] }
 0x2f8   :  { %v9404_v4 = vmul.f32 %v9089_v37, %v11454_v48  ;;  %v11458_v32 = vld [vmem:[#allocation169_spill] sm:$0xff]  ;;  %v9428_v48 = vmul.f32 %v9212_v45, %v8514_v8  ;;  %v1509_v61 = vadd.f32 %v1508_v15, %v9392_v56  ;;  %v9451_v15 = vmul.f32 %v9282_v34, %v8579_v47  ;;  %v11465_v8 = vld [vmem:[#allocation171_spill] sm:$0xff] }
 0x2f9   :  { %2431 = vmatprep.mubr.f32.mxu0 %v2340_v59  ;;  %v2341_v9 = vcombine.high %v9388_v51, %v9388_v51  ;;  %v11457_v59 = vld [vmem:[#allocation167_spill] sm:$0xff]  ;;  %v9424_v37 = vmul.f32 %v9159_v12, %v11458_v32  ;;  %v9443_v12 = vmul.f32 %v9229_v7, %v8518_v33  ;;  %v9455_v32 = vmul.f32 %v9309_v23, %v8608_v28  ;;  %v1510_v33 = vpop.f32.mrb[137].mxu0  ;;  %v11468_v28 = vld [vmem:[#allocation58_spill] sm:$0xff] }
 0x2fa   :  { %v9418_v20 = vmul.f32 %v9139_v46, %v11457_v59  ;;  %11459 = vst [vmem:[#allocation55_spill] sm:$0xff] %v9428_v48  ;;  %v11460_v59 = vld [vmem:[#allocation113_spill] sm:$0xff]  ;;  %v9465_v26 = vmul.f32 %v9282_v34, %v8569_v1  ;;  %v9469_v47 = vmul.f32 %v9309_v23, %v11465_v8  ;;  %v11467_v46 = vld [vmem:[#allocation66_spill] sm:$0xff] }
 0x2fb   :  { %v9439_v42 = vmul.f32 %v9212_v45, %v11460_v59  ;;  %11462 = vst [vmem:[#allocation141_spill] sm:$0xff] %v9443_v12  ;;  %v11463_v45 = vld [vmem:[#allocation42_spill] sm:$0xff]  ;;  %v11469_v48 = vpack.c.bf16 %v11467_v46, %v11468_v28  ;;  %v11470_v8 = vld [vmem:[#allocation61_spill] sm:$0xff]  ;;  %v11471_v12 = vld [vmem:[#allocation43_spill] sm:$0xff] }
 0x2fc   :  { %2408 = vmatpush1.xpose.msra.mxu0 %v2315_v63  ;;  %v9459_v59 = vrot.slane %v8650_v18, %v11463_v45  ;;  %11464 = vst [vmem:[#allocation151_spill] sm:$0xff] %v9465_v26  ;;  %11466 = vst [vmem:[#allocation153_spill] sm:$0xff] %v9469_v47  ;;  %v1512_v63 = vpop.f32.mrb[138].mxu0  ;;  %v11472_v46 = vpack.c.bf16 %v11470_v8, %v11471_v12  ;;  %v11473_v28 = vld [vmem:[#allocation60_spill] sm:$0xff] }
 0x2fd   :  { %11461 = vst [vmem:[#allocation147_spill] sm:$0xff] %v9439_v42  ;;  %5792 = vmatprep.subr.bf16.mxu0 %v11469_v48  ;;  %v1513_v7 = vadd.f32 %v1512_v63, %v9392_v56  ;;  %v1514_v42 = vpop.f32.mrb[139].mxu0 }
 0x2fe   :  { %v1511_v45 = vadd.f32 %v1510_v33, %v9459_v59  ;;  %v1515_v34 = vadd.f32 %v1514_v42, %v9459_v59  ;;  %v1518_v23 = vpop.f32.mrb[140].mxu0  ;;  %v11474_v33 = vpack.c.bf16 %v8755_v5, %v11473_v28 }
 0x2ff   :  { %2432 = vmatmul.mubr.f32.vlgmr.msra.gmra.mrb[180].mxu0 %v2332_v52  ;;  %v9484_v48 = vpack.c.bf16 %v1513_v7, %v1509_v61  ;;  %v1519_v18 = vadd.f32 %v1518_v23, %v9392_v56  ;;  %v1520_v1 = vpop.f32.mrb[141].mxu0  ;;  %v11475_v61 = vld [vmem:[#allocation124_spill] sm:$0xff] }
 0x300   :  { %5794 = vmatpush1.bf16.xpose.msra.mxu0 %v11472_v46  ;;  %2502 = vmatprep.mubr.f32.mxu0 %v2341_v9  ;;  %v9489_v63 = vpack.c.bf16 %v1515_v34, %v1511_v45  ;;  %v1521_v52 = vadd.f32 %v1520_v1, %v9459_v59  ;;  %v1522_v42 = vpop.f32.mrb[142].mxu0  ;;  %v11476_v7 = vld [vmem:[#allocation48_spill] sm:$0xff]  ;;  %v11479_v45 = vpack.c.bf16 %v8807_v40, %v8785_v62  ;;  %v11484_v40 = vld [vmem:[#allocation135_spill] sm:$0xff] }
 0x301   :  { %5796 = vmatprep.subr.bf16.mxu0 %v11474_v33  ;;  %v1523_v26 = vadd.f32 %v1522_v42, %v9392_v56  ;;  %v1524_v47 = vpop.f32.mrb[143].mxu0  ;;  %v11477_v8 = vpack.c.bf16 %v11475_v61, %v11476_v7 }
 0x302   :  { %v1525_v12 = vadd.f32 %v1524_v47, %v9459_v59  ;;  %v1528_v9 = vpop.f32.mrb[144].mxu0 }
 0x303   :  { %v9498_v5 = vpack.c.bf16 %v1523_v26, %v1519_v18  ;;  %v1529_v1 = vadd.f32 %v1528_v9, %v9392_v56  ;;  %v1530_v23 = vpop.f32.mrb[145].mxu0  ;;  %v11480_v26 = vld [vmem:[#allocation132_spill] sm:$0xff]  ;;  %v11481_v18 = vld [vmem:[#allocation71_spill] sm:$0xff] }
 0x304   :  { %v9503_v34 = vpack.c.bf16 %v1525_v12, %v1521_v52  ;;  %v1531_v46 = vadd.f32 %v1530_v23, %v9459_v59  ;;  %v1532_v28 = vpop.f32.mrb[146].mxu0  ;;  %v11482_v7 = vpack.c.bf16 %v11480_v26, %v11481_v18  ;;  %v11485_v52 = vld [vmem:[#allocation77_spill] sm:$0xff] }
 0x305   :  { %11478 = vst [vmem:[#allocation126_spill] sm:$0xff] %v9498_v5  ;;  %v1533_v47 = vadd.f32 %v1532_v28, %v9392_v56  ;;  %v1534_v33 = vpop.f32.mrb[147].mxu0  ;;  %v11486_v12 = vpack.c.bf16 %v11484_v40, %v11485_v52 }
 0x306   :  { %v1535_v42 = vadd.f32 %v1534_v33, %v9459_v59  ;;  %v1538_v61 = vpop.f32.mrb[148].mxu0 }
 0x307   :  { %v9512_v62 = vpack.c.bf16 %v1533_v47, %v1529_v1  ;;  %v11488_v1 = vld [vmem:[#allocation79_spill] sm:$0xff]  ;;  %v11489_v47 = vld [vmem:[#allocation74_spill] sm:$0xff] }
 0x308   :  { %5798 = vmatpush1.bf16.xpose.msra.mxu0 %v11477_v8  ;;  %v9517_v9 = vpack.c.bf16 %v1535_v42, %v1531_v46  ;;  %v1539_v8 = vadd.f32 %v1538_v61, %v9392_v56  ;;  %v11492_v46 = vld [vmem:[#allocation89_spill] sm:$0xff] }
 0x309   :  { %5800 = vmatprep.subr.bf16.mxu0 %v11479_v45  ;;  %11483 = vst [vmem:[#allocation75_spill] sm:$0xff] %v9512_v62  ;;  %v1540_v45 = vpop.f32.mrb[149].mxu0  ;;  %v11493_v42 = vld [vmem:[#allocation145_spill] sm:$0xff] }
 0x30a   :  { %11487 = vst [vmem:[#allocation86_spill] sm:$0xff] %v9517_v9  ;;  %v1541_v23 = vadd.f32 %v1540_v45, %v9459_v59  ;;  %v1542_v28 = vpop.f32.mrb[150].mxu0  ;;  %v11494_v52 = vpack.c.bf16 %v11492_v46, %v11493_v42 }
 0x30b   :  { %v1543_v33 = vadd.f32 %v1542_v28, %v9392_v56  ;;  %v1544_v5 = vpop.f32.mrb[151].mxu0 }
 0x30c   :  { %v1545_v26 = vadd.f32 %v1544_v5, %v9459_v59  ;;  %v1548_v18 = vpop.f32.mrb[152].mxu0 }
 0x30d   :  { %v9526_v40 = vpack.c.bf16 %v1543_v33, %v1539_v8  ;;  %v1550_v45 = vpop.f32.mrb[153].mxu0  ;;  %v11496_v8 = vld [vmem:[#allocation88_spill] sm:$0xff]  ;;  %v11497_v33 = vld [vmem:[#allocation133_spill] sm:$0xff] }
 0x30e   :  { %v9531_v61 = vpack.c.bf16 %v1545_v26, %v1541_v23  ;;  %v1551_v28 = vadd.f32 %v1550_v45, %v9459_v59  ;;  %v1552_v62 = vpop.f32.mrb[154].mxu0  ;;  %v11499_v23 = vld [vmem:[#allocation99_spill] sm:$0xff]  ;;  %v11500_v26 = vld [vmem:[#allocation150_spill] sm:$0xff] }
 0x30f   :  { %11491 = vst [vmem:[#allocation148_spill] sm:$0xff] %v9526_v40  ;;  %v1553_v5 = vadd.f32 %v1552_v62, %v9392_v56  ;;  %v1554_v9 = vpop.f32.mrb[155].mxu0  ;;  %v11501_v42 = vpack.c.bf16 %v11499_v23, %v11500_v26 }
 0x310   :  { %5802 = vmatpush1.bf16.xpose.msra.mxu0 %v11482_v7  ;;  %v11490_v7 = vpack.c.bf16 %v11488_v1, %v11489_v47  ;;  %11495 = vst [vmem:[#allocation134_spill] sm:$0xff] %v9531_v61  ;;  %v1555_v1 = vadd.f32 %v1554_v9, %v9459_v59  ;;  %v1558_v47 = vpop.f32.mrb[156].mxu0 }
 0x311   :  { %5804 = vmatprep.subr.bf16.mxu0 %v11486_v12  ;;  %v1549_v12 = vadd.f32 %v1548_v18, %v9392_v56  ;;  %v1560_v45 = vpop.f32.mrb[157].mxu0 }
 0x312   :  { %v9545_v18 = vpack.c.bf16 %v1555_v1, %v1551_v28  ;;  %v1561_v62 = vadd.f32 %v1560_v45, %v9459_v59  ;;  %v1562_v40 = vpop.f32.mrb[158].mxu0  ;;  %v11505_v28 = vpack.c.bf16 %v9108_v53, %v9083_v54  ;;  %v11506_v54 = vpack.c.bf16 %v9112_v27, %v9093_v55 }
 0x313   :  { %v9540_v46 = vpack.c.bf16 %v1553_v5, %v1549_v12  ;;  %v1563_v9 = vadd.f32 %v1562_v40, %v9392_v56  ;;  %v1564_v61 = vpop.f32.mrb[159].mxu0  ;;  %v11503_v12 = vld [vmem:[#allocation154_spill] sm:$0xff]  ;;  %v11507_v53 = vpack.c.bf16 %v9179_v35, %v9163_v0  ;;  %v11508_v35 = vpack.c.bf16 %v9183_v16, %v9167_v58 }
 0x314   :  { %v11509_v55 = vpack.c.bf16 %v9247_v3, %v9233_v2  ;;  %v11510_v58 = vpack.c.bf16 %v9251_v11, %v9237_v10  ;;  %v11511_v3 = vpack.c.bf16 %v9329_v43, %v9299_v38  ;;  %v11513_v11 = vld [vmem:[#allocation108_spill] sm:$0xff]  ;;  %v11514_v38 = vpack.c.bf16 %v9333_v50, %v9313_v57  ;;  %v11518_v57 = vld [vmem:[#allocation118_spill] sm:$0xff]  ;;  %v11519_v50 = vld [vmem:[#allocation117_spill] sm:$0xff] }
 0x315   :  { %v2318_v10 = vmul.f32 %v9368_v44, %v11513_v11 }
 0x318   :  { %5806 = vmatpush1.bf16.xpose.msra.mxu0 %v11490_v7  ;;  %v11498_v7 = vpack.c.bf16 %v11496_v8, %v11497_v33  ;;  %v1565_v8 = vadd.f32 %v1564_v61, %v9459_v59  ;;  %v11502_v33 = vld [vmem:[#allocation109_spill] sm:$0xff] }
 0x319   :  { %5808 = vmatprep.subr.bf16.mxu0 %v11494_v52  ;;  %v1559_v52 = vadd.f32 %v1558_v47, %v9392_v56  ;;  %v11504_v5 = vpack.c.bf16 %v11502_v33, %v11503_v12  ;;  %v1568_v47 = vpop.f32.mrb[160].mxu0 }
 0x31a   :  { %v9559_v1 = vpack.c.bf16 %v1565_v8, %v1561_v62  ;;  %v1569_v23 = vadd.f32 %v1568_v47, %v9392_v56  ;;  %v1570_v26 = vpop.f32.mrb[161].mxu0 }
 0x31b   :  { %v1571_v40 = vadd.f32 %v1570_v26, %v9459_v59 }
 0x320   :  { %5810 = vmatpush1.bf16.xpose.msra.mxu0 %v11498_v7  ;;  %v9554_v7 = vpack.c.bf16 %v1563_v9, %v1559_v52 }
 0x321   :  { %5812 = vmatprep.subr.bf16.mxu0 %v11501_v42  ;;  %v1572_v42 = vpop.f32.mrb[162].mxu0 }
 0x322   :  { %v1573_v61 = vadd.f32 %v1572_v42, %v9392_v56  ;;  %v1574_v45 = vpop.f32.mrb[163].mxu0 }
 0x323   :  { %v1575_v33 = vadd.f32 %v1574_v45, %v9459_v59  ;;  %v1578_v62 = vpop.f32.mrb[164].mxu0 }
 0x324   :  { %v9565_v52 = vpack.c.bf16 %v1573_v61, %v1569_v23  ;;  %v1579_v8 = vadd.f32 %v1578_v62, %v9392_v56  ;;  %v1580_v12 = vpop.f32.mrb[165].mxu0 }
 0x325   :  { %v9567_v9 = vpack.c.bf16 %v1575_v33, %v1571_v40 }
 0x328   :  { %5814 = vmatpush1.bf16.xpose.msra.mxu0 %v11504_v5  ;;  %v1581_v5 = vadd.f32 %v1580_v12, %v9459_v59 }
 0x329   :  { %5816 = vmatprep.subr.bf16.mxu0 %v11505_v28  ;;  %v1582_v28 = vpop.f32.mrb[166].mxu0 }
 0x32a   :  { %v1583_v47 = vadd.f32 %v1582_v28, %v9392_v56  ;;  %v1584_v23 = vpop.f32.mrb[167].mxu0 }
 0x32b   :  { %v1585_v26 = vadd.f32 %v1584_v23, %v9459_v59  ;;  %v1588_v0 = vpop.f32.mrb[168].mxu0 }
 0x32c   :  { %v9579_v40 = vpack.c.bf16 %v1583_v47, %v1579_v8  ;;  %v1589_v42 = vadd.f32 %v1588_v0, %v9392_v56  ;;  %v1590_v61 = vpop.f32.mrb[169].mxu0 }
 0x32d   :  { %v9581_v27 = vpack.c.bf16 %v1585_v26, %v1581_v5  ;;  %v1591_v45 = vadd.f32 %v1590_v61, %v9459_v59  ;;  %v1592_v33 = vpop.f32.mrb[170].mxu0 }
 0x330   :  { %5818 = vmatpush1.bf16.xpose.msra.mxu0 %v11506_v54  ;;  %v1593_v54 = vadd.f32 %v1592_v33, %v9392_v56 }
 0x331   :  { %5820 = vmatprep.subr.bf16.mxu0 %v11507_v53  ;;  %v1594_v53 = vpop.f32.mrb[171].mxu0 }
 0x332   :  { %v1595_v62 = vadd.f32 %v1594_v53, %v9459_v59  ;;  %v9593_v8 = vpack.c.bf16 %v1593_v54, %v1589_v42  ;;  %v1598_v2 = vpop.f32.mrb[172].mxu0  ;;  %v6544_v42 = vld [vmem:[#allocation6 + $0x8] sm:$0xff]  ;;  %v11517_v53 = vld [vmem:[#allocation103_spill] sm:$0xff] }
 0x333   :  { %v1599_v12 = vadd.f32 %v1598_v2, %v9392_v56  ;;  %v1600_v5 = vpop.f32.mrb[173].mxu0  ;;  %v9619_v61 = vmul.f32 %v6544_v42, %v9346_v39  ;;  %v11521_v2 = vld [vmem:[#allocation70_spill] sm:$0xff] }
 0x334   :  { %v9595_v16 = vpack.c.bf16 %v1595_v62, %v1591_v45  ;;  %v1601_v28 = vadd.f32 %v1600_v5, %v9459_v59  ;;  %v1602_v47 = vpop.f32.mrb[174].mxu0  ;;  %v2317_v62 = vmul.f32 %v9368_v44, %v11517_v53  ;;  %v11536_v53 = vld [vmem:[#allocation82_spill] sm:$0xff] }
 0x335   :  { %v1603_v23 = vadd.f32 %v1602_v47, %v9392_v56  ;;  %v1604_v26 = vpop.f32.mrb[175].mxu0  ;;  %v11525_v47 = vld [vmem:[#allocation59_spill] sm:$0xff] }
 0x336   :  { %v9616_v43 = vpop.f32.mrb[176].mxu0 }
 0x337   :  { %11515 = vst [vmem:[#allocation159_spill] sm:$0xff] %v9616_v43  ;;  %v9621_v45 = vpop.f32.mrb[177].mxu0 }
 0x338   :  { %5822 = vmatpush1.bf16.xpose.msra.mxu0 %v11508_v35  ;;  %v1605_v35 = vadd.f32 %v1604_v26, %v9459_v59  ;;  %11516 = vst [vmem:[#allocation115_spill] sm:$0xff] %v9621_v45  ;;  %v1612_v33 = vpop.f32.mrb[178].mxu0  ;;  %v11527_v26 = vld [vmem:[#allocation52_spill] sm:$0xff] }
 0x339   :  { %5824 = vmatprep.subr.bf16.mxu0 %v11509_v55  ;;  %v9607_v55 = vpack.c.bf16 %v1603_v23, %v1599_v12  ;;  %v1613_v54 = vpop.f32.mrb[179].mxu0  ;;  %v11522_v12 = vld [vmem:[#allocation57_spill] sm:$0xff] }
 0x33a   :  { %v9611_v0 = vpack.c.bf16 %v1605_v35, %v1601_v28  ;;  %v11523_v5 = vpack.c.bf16 %v11521_v2, %v11522_v12  ;;  %v11524_v28 = vld [vmem:[#allocation53_spill] sm:$0xff]  ;;  %v11528_v35 = vld [vmem:[#allocation62_spill] sm:$0xff]  ;;  %v11534_v54 = vld [vmem:[#allocation72_spill] sm:$0xff] }
 0x33b   :  { %11512 = vst [vmem:[#allocation31_spill] sm:$0xff] %v9607_v55  ;;  %v11526_v23 = vpack.c.bf16 %v11524_v28, %v11525_v47  ;;  %v11529_v11 = vpack.c.bf16 %v11527_v26, %v11528_v35  ;;  %v11533_v33 = vld [vmem:[#allocation69_spill] sm:$0xff]  ;;  %v11542_v2 = vld [vmem:[#allocation92_spill] sm:$0xff]  ;;  %v11548_v26 = vld [vmem:[#allocation143_spill] sm:$0xff] }
 0x33c   :  { %v11543_v12 = vld [vmem:[#allocation140_spill] sm:$0xff]  ;;  %v11546_v47 = vld [vmem:[#allocation101_spill] sm:$0xff]  ;;  %v11549_v35 = vld [vmem:[#allocation139_spill] sm:$0xff] }
 0x33d   :  { %v11545_v28 = vld [vmem:[#allocation96_spill] sm:$0xff] }
 0x340   :  { %5826 = vmatpush1.bf16.xpose.msra.mxu0 %v11510_v58  ;;  %v9627_v58 = vrot.slane %v9619_v61, %v11446_v29 }
 0x341   :  { %5828 = vmatprep.subr.bf16.mxu0 %v11511_v3  ;;  %v11520_v3 = vpack.c.bf16 %v11518_v57, %v11519_v50  ;;  %v11539_v50 = vld [vmem:[#allocation85_spill] sm:$0xff] }
 0x342   :  { %v2357_v39 = vcombine.high %v9627_v58, %v9627_v58 }
 0x348   :  { %5830 = vmatpush1.bf16.xpose.msra.mxu0 %v11514_v38  ;;  %v11531_v38 = vld [vmem:[#allocation67_spill] sm:$0xff] }
 0x349   :  { %2478 = vmatprep.subr.mxu0 %v2318_v10  ;;  %v11530_v10 = vld [vmem:[#allocation63_spill] sm:$0xff] }
 0x34a   :  { %v11532_v42 = vpack.c.bf16 %v11530_v10, %v11531_v38  ;;  %v1055_v10 = vld [vmem:[#allocation12 + $0x8] sm:$0xff] }
 0x34b   :  { %v1059_v38 = vld [vmem:[#allocation12 + $0x28] sm:$0xff] }
 0x350   :  { %2479 = vmatpush1.xpose.msra.mxu0 %v2317_v62  ;;  %v11537_v62 = vld [vmem:[#allocation137_spill] sm:$0xff] }
 0x351   :  { %5832 = vmatprep.subr.bf16.mxu0 %v11520_v3  ;;  %v11538_v57 = vpack.c.bf16 %v11536_v53, %v11537_v62  ;;  %v11540_v3 = vld [vmem:[#allocation80_spill] sm:$0xff]  ;;  %v5299_v53 = vcombine.low %v1055_v10, %v1059_v38  ;;  %v5300_v62 = vcombine.high %v1055_v10, %v1059_v38 }
 0x352   :  { %v11562_v38 = vld [vmem:[#allocation28_spill] sm:$0xff] }
 0x353   :  { %2503 = vmatmul.mubr.f32.vlgmr.msra.gmra.mrb[180].mxu0 %v9388_v51  ;;  %v11535_v51 = vpack.c.bf16 %v11533_v33, %v11534_v54  ;;  %v11551_v33 = vld [vmem:[#allocation104_spill] sm:$0xff]  ;;  %v11552_v54 = vld [vmem:[#allocation105_spill] sm:$0xff]  ;;  %1333 = vmatprep.subr.bf16.mxu1 %v5300_v62  ;;  %v11567_v62 = vld [vmem:[#allocation35_spill] sm:$0xff] }
 0x354   :  { %5834 = vmatpush1.bf16.xpose.msra.mxu0 %v11523_v5  ;;  %2573 = vmatprep.mubr.f32.mxu0 %v2357_v39  ;;  %v11541_v39 = vpack.c.bf16 %v11539_v50, %v11540_v3  ;;  %v11544_v5 = vpack.c.bf16 %v11542_v2, %v11543_v12  ;;  %v11554_v50 = vpack.c.bf16 %v9118_v31, %v9100_v19  ;;  %v1061_v2 = vld [vmem:[#allocation12 + $0x38] sm:$0xff]  ;;  %v9677_v19 = vld [vmem:[#allocation3] sm:$0xff]   ;;  %v11561_v31 = vmov 0  }
 0x355   :  { %5836 = vmatprep.subr.bf16.mxu0 %v11526_v23  ;;  %v11547_v23 = vpack.c.bf16 %v11545_v28, %v11546_v47  ;;  %1334 = vmatpush1.bf16.msra.mxu1 %v5299_v53  ;;  %v11555_v47 = vld [vmem:[#allocation146_spill] sm:$0xff]  ;;  %v11566_v53 = vld [vmem:[#allocation119_spill] sm:$0xff] }
 0x35c   :  { %5838 = vmatpush1.bf16.xpose.msra.mxu0 %v11529_v11  ;;  %v11550_v11 = vpack.c.bf16 %v11548_v26, %v11549_v35  ;;  %v11558_v35 = vld [vmem:[#allocation47_spill] sm:$0xff] }
 0x35d   :  { %5840 = vmatprep.subr.bf16.mxu0 %v11532_v42  ;;  %v1063_v42 = vld [vmem:[#allocation12 + $0x48] sm:$0xff] }
 0x364   :  { %5842 = vmatpush1.bf16.xpose.msra.mxu0 %v11535_v51  ;;  %v11553_v51 = vpack.c.bf16 %v11551_v33, %v11552_v54  ;;  %v11565_v54 = vpack.c.bf16 %v9257_v25, %v9265_v60  ;;  %v11570_v25 = vld [vmem:[#allocation174_spill] sm:$0xff] }
 0x365   :  { %5844 = vmatprep.subr.bf16.mxu0 %v11538_v57  ;;  %v1067_v57 = vld [vmem:[#allocation12 + $0x68] sm:$0xff]  ;;  %v2320_v60 = vmul.f32 %v9368_v44, %v11570_v25 }
 0x366   :  { %v5308_v3 = vcombine.high %v1063_v42, %v1067_v57  ;;  %v5307_v12 = vcombine.low %v1063_v42, %v1067_v57  ;;  %v11563_v42 = vld [vmem:[#allocation152_spill] sm:$0xff]  ;;  %v11568_v57 = vpack.c.bf16 %v11566_v53, %v11567_v62  ;;  %v11585_v53 = vld [vmem:[#allocation129_spill] sm:$0xff]  ;;  %v11586_v62 = vld [vmem:[#allocation90_spill] sm:$0xff] }
 0x367   :  { %v11564_v33 = vpack.c.bf16 %v11562_v38, %v11563_v42  ;;  %v9734_v42 = vld [vmem:[#allocation3 + $0x28] sm:$0xff]   ;;  %v11588_v25 = vld [vmem:[#allocation138_spill] sm:$0xff] }
 0x368   :  { %1335 = vmatprep.subr.bf16.mxu1 %v5308_v3  ;;  %v9699_v3 = vld [vmem:[#allocation3 + $0x10] sm:$0xff]  }
 0x369   :  { %1336 = vmatpush1.bf16.msra.mxu1 %v5307_v12 }
 0x36c   :  { %5846 = vmatpush1.bf16.xpose.msra.mxu0 %v11541_v39  ;;  %v1057_v39 = vld [vmem:[#allocation12 + $0x18] sm:$0xff]  ;;  %5324 = vmatmul.mubr.msk.bf16.vlgmr.msra.gmra.mrb[84].mxu1 %vm456_vm0, %v9677_v19 }
 0x36d   :  { %5848 = vmatprep.subr.bf16.mxu0 %v11544_v5  ;;  %v5304_v5 = vcombine.high %v1057_v39, %v1061_v2  ;;  %v5303_v28 = vcombine.low %v1057_v39, %v1061_v2  ;;  %1375 = vmatprep.mubr.bf16.mxu1 %v11561_v31  ;;  %v11571_v39 = vpack.c.bf16 %v9343_v36, %v9354_v41  ;;  %v11574_v36 = vld [vmem:[#allocation56_spill] sm:$0xff] }
 0x36e   :  { %v2342_v2 = vcombine.high %v9619_v61, %v9619_v61  ;;  %v11576_v61 = vld [vmem:[#allocation130_spill] sm:$0xff] }
 0x36f   :  { %1615 = vmatprep.subr.bf16.mxu1 %v5304_v5 }
 0x370   :  { %1616 = vmatpush1.bf16.msra.mxu1 %v5303_v28  ;;  %v2356_v5 = vrot.slane %v2342_v2, %v11446_v29  ;;  %v11573_v28 = vld [vmem:[#allocation123_spill] sm:$0xff]  ;;  %v11683_v29 = vld [vmem:[#allocation46_spill] sm:$0xff] }
 0x371   :  { %v11575_v41 = vpack.c.bf16 %v11573_v28, %v11574_v36  ;;  %v11591_v2 = vld [vmem:[#allocation111_spill] sm:$0xff]  ;;  %v9756_v28 = vld [vmem:[#allocation3 + $0x38] sm:$0xff]   ;;  %v11594_v36 = vld [vmem:[#allocation162_spill] sm:$0xff] }
 0x374   :  { %5850 = vmatpush1.bf16.xpose.msra.mxu0 %v11547_v23  ;;  %v11556_v23 = vld [vmem:[#allocation91_spill] sm:$0xff] }
 0x375   :  { %5852 = vmatprep.subr.bf16.mxu0 %v11550_v11  ;;  %v11557_v26 = vpack.c.bf16 %v11555_v47, %v11556_v23  ;;  %v11559_v11 = vld [vmem:[#allocation44_spill] sm:$0xff]  ;;  %v2358_v47 = vcombine.high %v2356_v5, %v2356_v5  ;;  %v9722_v23 = vld [vmem:[#allocation3 + $0x20] sm:$0xff]  }
 0x376   :  { %v11560_v10 = vpack.c.bf16 %v11558_v35, %v11559_v11  ;;  %v11579_v11 = vld [vmem:[#allocation68_spill] sm:$0xff] }
 0x37c   :  { %5854 = vmatpush1.bf16.xpose.msra.mxu0 %v11553_v51  ;;  %v9688_v51 = vld [vmem:[#allocation3 + $0x8] sm:$0xff]  }
 0x37d   :  { %5856 = vmatprep.subr.bf16.mxu0 %v11554_v50  ;;  %5325 = vmatmul.mubr.msk.bf16.gmra.mrb[88].mxu1 %vm456_vm0, %v9688_v51  ;;  %v11569_v50 = vpack.c.bf16 %v9339_v22, %v9319_v17  ;;  %v9711_v17 = vld [vmem:[#allocation3 + $0x18] sm:$0xff]   ;;  %v11572_v22 = vld [vmem:[#allocation172_spill] sm:$0xff] }
 0x37e   :  { %1385 = vmatprep.mubr.bf16.mxu1 %v11561_v31  ;;  %v2319_v12 = vmul.f32 %v9368_v44, %v11572_v22  ;;  %v11592_v22 = vld [vmem:[#allocation136_spill] sm:$0xff] }
 0x384   :  { %5858 = vmatpush1.bf16.xpose.msra.mxu0 %v11557_v26  ;;  %v11577_v26 = vld [vmem:[#allocation49_spill] sm:$0xff] }
 0x385   :  { %5860 = vmatprep.subr.bf16.mxu0 %v11560_v10  ;;  %5326 = vmatmul.mubr.msk.bf16.gmra.mrb[92].mxu1 %vm456_vm0, %v9699_v3  ;;  %v11578_v35 = vpack.c.bf16 %v11576_v61, %v11577_v26  ;;  %v11580_v10 = vld [vmem:[#allocation76_spill] sm:$0xff]  ;;  %v11598_v26 = vld [vmem:[#allocation98_spill] sm:$0xff] }
 0x386   :  { %1395 = vmatprep.mubr.bf16.mxu1 %v11561_v31  ;;  %v11581_v38 = vpack.c.bf16 %v11579_v11, %v11580_v10  ;;  %v11597_v61 = vld [vmem:[#allocation144_spill] sm:$0xff]  ;;  %v9767_v11 = vld [vmem:[#allocation3 + $0x40] sm:$0xff]   ;;  %v11600_v10 = vld [vmem:[#allocation39_spill] sm:$0xff] }
 0x38c   :  { %5862 = vmatpush1.bf16.xpose.msra.mxu0 %v11564_v33  ;;  %v11582_v33 = vld [vmem:[#allocation84_spill] sm:$0xff] }
 0x38d   :  { %5864 = vmatprep.subr.bf16.mxu0 %v11565_v54  ;;  %5327 = vmatmul.mubr.msk.bf16.gmra.mrb[96].mxu1 %vm456_vm0, %v9711_v17 }
 0x38e   :  { %1405 = vmatprep.mubr.bf16.mxu1 %v11561_v31 }
 0x394   :  { %5866 = vmatpush1.bf16.xpose.msra.mxu0 %v11568_v57  ;;  %v11587_v57 = vpack.c.bf16 %v11585_v53, %v11586_v62  ;;  %v9778_v62 = vld [vmem:[#allocation3 + $0x48] sm:$0xff]  }
 0x395   :  { %5868 = vmatprep.subr.bf16.mxu0 %v11569_v50  ;;  %5328 = vmatmul.mubr.msk.bf16.gmra.mrb[100].mxu1 %vm456_vm0, %v9722_v23  ;;  %v9745_v50 = vld [vmem:[#allocation3 + $0x30] sm:$0xff]  }
 0x396   :  { %1415 = vmatprep.mubr.bf16.mxu1 %v11561_v31 }
 0x39c   :  { %5870 = vmatpush1.bf16.xpose.msra.mxu0 %v11571_v39 }
 0x39d   :  { %2549 = vmatprep.subr.mxu0 %v2320_v60  ;;  %5329 = vmatmul.mubr.msk.bf16.gmra.mrb[104].mxu1 %vm456_vm0, %v9734_v42  ;;  %v11589_v60 = vld [vmem:[#allocation155_spill] sm:$0xff] }
 0x39e   :  { %1425 = vmatprep.mubr.bf16.mxu1 %v11561_v31  ;;  %v11590_v39 = vpack.c.bf16 %v11588_v25, %v11589_v60  ;;  %v11607_v25 = vld [vmem:[#allocation30_spill] sm:$0xff] }
 0x39f   :  { %v11608_v60 = vpack.c.bf16 %v9376_v6, %v11607_v25 }
 0x3a4   :  { %2550 = vmatpush1.xpose.msra.mxu0 %v2319_v12  ;;  %v11593_v12 = vpack.c.bf16 %v11591_v2, %v11592_v22  ;;  %v11609_v2 = vpack.c.bf16 %v9404_v4, %v9400_v14  ;;  %v11610_v22 = vpack.c.bf16 %v9414_v49, %v9410_v21  ;;  %v11617_v14 = vpack.c.bf16 %v9455_v32, %v9451_v15  ;;  %v11618_v4 = vld [vmem:[#allocation175_spill] sm:$0xff]  ;;  %v11619_v49 = vld [vmem:[#allocation153_spill] sm:$0xff] }
 0x3a5   :  { %5872 = vmatprep.subr.bf16.mxu0 %v11575_v41  ;;  %5330 = vmatmul.mubr.msk.bf16.gmra.mrb[108].mxu1 %vm456_vm0, %v9745_v50  ;;  %v11595_v41 = vld [vmem:[#allocation110_spill] sm:$0xff]  ;;  %v2322_v21 = vmul.f32 %v9368_v44, %v11618_v4 }
 0x3a6   :  { %1435 = vmatprep.mubr.bf16.mxu1 %v11561_v31 }
 0x3a7   :  { %2574 = vmatmul.mubr.f32.vlgmr.msra.gmra.mrb[180].mxu0 %v9627_v58  ;;  %v11583_v58 = vld [vmem:[#allocation81_spill] sm:$0xff] }
 0x3a8   :  { %5874 = vmatpush1.bf16.xpose.msra.mxu0 %v11578_v35  ;;  %2644 = vmatprep.mubr.f32.mxu0 %v2358_v47  ;;  %v11584_v54 = vpack.c.bf16 %v11582_v33, %v11583_v58  ;;  %v11596_v47 = vpack.c.bf16 %v11594_v36, %v11595_v41  ;;  %v11599_v35 = vpack.c.bf16 %v11597_v61, %v11598_v26  ;;  %v11603_v58 = vld [vmem:[#allocation122_spill] sm:$0xff]  ;;  %v11615_v36 = vld [vmem:[#allocation147_spill] sm:$0xff]  ;;  %v1069_v26 = vld [vmem:[#allocation12 + $0x78] sm:$0xff] }
 0x3a9   :  { %5876 = vmatprep.subr.bf16.mxu0 %v11581_v38  ;;  %v11601_v38 = vld [vmem:[#allocation50_spill] sm:$0xff] }
 0x3aa   :  { %v11602_v33 = vpack.c.bf16 %v11600_v10, %v11601_v38  ;;  %v11624_v38 = vld [vmem:[#allocation32_spill] sm:$0xff] }
 0x3ab   :  { %v2656_v25 = vadd.s32 32, %v11624_v38  ;;  %v2662_v4 = vadd.s32 80, %v11624_v38 }
 0x3ad   :  { %5331 = vmatmul.mubr.msk.bf16.gmra.mrb[112].mxu1 %vm456_vm0, %v9756_v28 }
 0x3ae   :  { %1445 = vmatprep.mubr.bf16.mxu1 %v11561_v31 }
 0x3b0   :  { %5878 = vmatpush1.bf16.xpose.msra.mxu0 %v11584_v54  ;;  %v11604_v54 = vld [vmem:[#allocation156_spill] sm:$0xff] }
 0x3b1   :  { %5880 = vmatprep.subr.bf16.mxu0 %v11587_v57  ;;  %v11605_v53 = vpack.c.bf16 %v11603_v58, %v11604_v54  ;;  %v11606_v57 = vpack.c.bf16 %v9307_v13, %v9303_v30  ;;  %v11611_v30 = vpack.c.bf16 %v9424_v37, %v9418_v20  ;;  %v11612_v13 = vld [vmem:[#allocation55_spill] sm:$0xff]  ;;  %v11622_v20 = vld [vmem:[#allocation173_spill] sm:$0xff]  ;;  %v6830_v58 = vmov 0.0|0.0  }
 0x3b2   :  { %v11613_v6 = vpack.c.bf16 %v9432_v24, %v11612_v13  ;;  %v2321_v37 = vmul.f32 %v9368_v44, %v11622_v20  ;;  %v1065_v24 = vld [vmem:[#allocation12 + $0x58] sm:$0xff]  ;;  %v2659_v13 = vadd.s32 56, %v11624_v38 }
 0x3b3   :  { %v5311_v15 = vcombine.low %v1065_v24, %v1069_v26  ;;  %v5312_v32 = vcombine.high %v1065_v24, %v1069_v26  ;;  %v2666_v24 = vadd.s32 112, %v11624_v38 }
 0x3b5   :  { %5332 = vmatmul.mubr.msk.bf16.gmra.mrb[116].mxu1 %vm456_vm0, %v9767_v11  ;;  %1617 = vmatprep.subr.bf16.mxu1 %v5312_v32  ;;  %v2668_v32 = vadd.s32 128, %v11624_v38 }
 0x3b6   :  { %1455 = vmatprep.mubr.bf16.mxu1 %v11561_v31  ;;  %1618 = vmatpush1.bf16.msra.mxu1 %v5311_v15 }
 0x3b7   :  { %5911 = vmatprep.subr.bf16.mxu1 %v6830_v58 }
 0x3b8   :  { %5882 = vmatpush1.bf16.xpose.msra.mxu0 %v11590_v39  ;;  %v9789_v39 = vld [vmem:[#allocation3 + $0x50] ss:$0 sps:$4 sm:$0xff]  }
 0x3b9   :  { %5884 = vmatprep.subr.bf16.mxu0 %v11593_v12  ;;  %v11614_v12 = vld [vmem:[#allocation141_spill] sm:$0xff] }
 0x3ba   :  { %v11616_v41 = vpack.c.bf16 %v11614_v12, %v11615_v36  ;;  %v2661_v36 = vadd.s32 72, %v11624_v38 }
 0x3bd   :  { %5333 = vmatmul.mubr.msk.bf16.gmra.mrb[120].mxu1 %vm456_vm0, %v9778_v62 }
 0x3be   :  { %1465 = vmatprep.mubr.bf16.mxu1 %v11561_v31 }
 0x3c0   :  { %5886 = vmatpush1.bf16.xpose.msra.mxu0 %v11596_v47  ;;  %v11620_v47 = vld [vmem:[#allocation151_spill] sm:$0xff] }
 0x3c1   :  { %5888 = vmatprep.subr.bf16.mxu0 %v11599_v35  ;;  %v11621_v61 = vpack.c.bf16 %v11619_v49, %v11620_v47  ;;  %v11623_v35 = vlaneseq  ;;  %v2664_v49 = vadd.s32 96, %v11624_v38 }
 0x3c3   :  { %v9820_v10 = vand.u32 127, %v11623_v35 }
 0x3c5   :  { %5334 = vmatmul.mubr.msk.bf16.gmra.mrb[124].mxu1 %vm456_vm0, %v9789_v39  ;;  %v9827_v54 = vmul.u32 8, %v9820_v10  ;;  %v2697_v44 = vadd.s32 1, %v9820_v10 }
 0x3c6   :  { %1647 = vmatprep.mubr.bf16.mxu1 %v11561_v31 }
 0x3c7   :  { %vm2676_vm2 = vcmp.ge.s32.totalorder %v11624_v38, %v9827_v54  ;;  %vm2680_vm14 = vcmp.ge.s32.totalorder %v2656_v25, %v9827_v54 }
 0x3c8   :  { %5890 = vmatpush1.bf16.xpose.msra.mxu0 %v11602_v33  ;;  %v9823_v33 = vadd.s32 8, %v11624_v38 }
 0x3c9   :  { %5892 = vmatprep.subr.bf16.mxu0 %v11605_v53  ;;  %v9835_v53 = vmul.u32 8, %v2697_v44  ;;  %v2669_v44 = vadd.s32 136, %v11624_v38 }
 0x3ca   :  { %vm2677_vm3 = vcmp.ge.s32.totalorder %v9823_v33, %v9827_v54 }
 0x3cb   :  { %vm2699_vm4 = vcmp.lt.s32.totalorder %v11624_v38, %v9835_v53  ;;  %vm2700_vm5 = vcmp.lt.s32.totalorder %v9823_v33, %v9835_v53  ;;  %vm2703_vm15 = vcmp.lt.s32.totalorder %v2656_v25, %v9835_v53 }
 0x3cc   :  { %vm9848_vm6 = vmand %vm2676_vm2, %vm2699_vm4 }
 0x3cd   :  { %5346 = vmatmul.mubr.msk.bf16.vlgmr.msra.gmra.mrb[128].mxu1 %vm456_vm0, %v9677_v19  ;;  %vm2721_vm9 = vmand %vm2677_vm3, %vm2700_vm5  ;;  %v2658_v19 = vadd.s32 48, %v11624_v38 }
 0x3ce   :  { %1657 = vmatprep.mubr.bf16.mxu1 %v11561_v31  ;;  %vm5912_vm12 = vmpackc.low %vm2721_vm9, %vm9848_vm6 }
 0x3cf   :  { %vm9879_vm6 = vmand %vm2680_vm14, %vm2703_vm15 }
 0x3d0   :  { %5894 = vmatpush1.bf16.xpose.msra.mxu0 %v11606_v57  ;;  %v2655_v57 = vadd.s32 24, %v11624_v38 }
 0x3d1   :  { %5896 = vmatprep.subr.bf16.mxu0 %v11608_v60  ;;  %v10096_v60 = vadd.s32 128, %v9820_v10 }
 0x3d2   :  { %vm2679_vm10 = vcmp.ge.s32.totalorder %v2655_v57, %v9827_v54  ;;  %vm2702_vm11 = vcmp.lt.s32.totalorder %v2655_v57, %v9835_v53 }
 0x3d3   :  { %vm2723_vm2 = vmand %vm2679_vm10, %vm2702_vm11  ;;  %vm2683_vm10 = vcmp.ge.s32.totalorder %v2659_v13, %v9827_v54  ;;  %vm2706_vm11 = vcmp.lt.s32.totalorder %v2659_v13, %v9835_v53 }
 0x3d5   :  { %5347 = vmatmul.mubr.msk.bf16.gmra.mrb[132].mxu1 %vm456_vm0, %v9688_v51  ;;  %v11665_v51 = vld [vmem:[#allocation40_spill] sm:$0xff] }
 0x3d6   :  { %1667 = vmatprep.mubr.bf16.mxu1 %v11561_v31 }
 0x3d8   :  { %5898 = vmatpush1.bf16.xpose.msra.mxu0 %v11609_v2  ;;  %v2657_v2 = vadd.s32 40, %v11624_v38 }
 0x3d9   :  { %5900 = vmatprep.subr.bf16.mxu0 %v11610_v22  ;;  %v10954_v22 = vmov 1.0|1.0  }
 0x3da   :  { %5913 = vmatpush1.bf16.msk.msra.mxu1 %vm5912_vm12, %v10954_v22  ;;  %vm2681_vm3 = vcmp.ge.s32.totalorder %v2657_v2, %v9827_v54  ;;  %vm2704_vm4 = vcmp.lt.s32.totalorder %v2657_v2, %v9835_v53  ;;  %v2793_v2 = vadd.s32 1, %v11624_v38 }
 0x3db   :  { %5914 = vmatprep.subr.bf16.mxu1 %v6830_v58  ;;  %vm9887_vm9 = vmand %vm2681_vm3, %vm2704_vm4  ;;  %vm2685_vm3 = vcmp.ge.s32.totalorder %v2661_v36, %v9827_v54  ;;  %vm2708_vm4 = vcmp.lt.s32.totalorder %v2661_v36, %v9835_v53  ;;  %v10126_v36 = vld [vmem:[#allocation14] sm:$0xff] }
 0x3dd   :  { %5348 = vmatmul.mubr.msk.bf16.gmra.mrb[136].mxu1 %vm456_vm0, %v9699_v3  ;;  %v2667_v3 = vadd.s32 120, %v11624_v38 }
 0x3de   :  { %1677 = vmatprep.mubr.bf16.mxu1 %v11561_v31 }
 0x3e0   :  { %5902 = vmatpush1.bf16.xpose.msra.mxu0 %v11611_v30  ;;  %v2796_v30 = vmul.u32 8, %v2793_v2 }
 0x3e1   :  { %5904 = vmatprep.subr.bf16.mxu0 %v11613_v6  ;;  %v2660_v6 = vadd.s32 64, %v11624_v38 }
 0x3e3   :  { %vm2684_vm14 = vcmp.ge.s32.totalorder %v2660_v6, %v9827_v54  ;;  %vm2707_vm15 = vcmp.lt.s32.totalorder %v2660_v6, %v9835_v53 }
 0x3e5   :  { %5349 = vmatmul.mubr.msk.bf16.gmra.mrb[140].mxu1 %vm456_vm0, %v9711_v17 }
 0x3e6   :  { %1687 = vmatprep.mubr.bf16.mxu1 %v11561_v31 }
 0x3e8   :  { %5906 = vmatpush1.bf16.xpose.msra.mxu0 %v11616_v41  ;;  %v11664_v41 = vld [vmem:[#allocation38_spill] sm:$0xff] }
 0x3e9   :  { %5908 = vmatprep.subr.bf16.mxu0 %v11617_v14  ;;  %v10130_v14 = vrot.slane %v10126_v36, %v11664_v41 }
 0x3ed   :  { %5350 = vmatmul.mubr.msk.bf16.gmra.mrb[144].mxu1 %vm456_vm0, %v9722_v23 }
 0x3ee   :  { %1697 = vmatprep.mubr.bf16.mxu1 %v11561_v31 }
 0x3f0   :  { %5910 = vmatpush1.bf16.xpose.msra.mxu0 %v11621_v61  ;;  %v2665_v61 = vadd.s32 104, %v11624_v38 }
 0x3f1   :  { %2620 = vmatprep.subr.mxu0 %v2322_v21  ;;  %v2663_v21 = vadd.s32 88, %v11624_v38 }
 0x3f2   :  { %vm2712_vm1 = vcmp.lt.s32.totalorder %v2665_v61, %v9835_v53 }
 0x3f5   :  { %5351 = vmatmul.mubr.msk.bf16.gmra.mrb[148].mxu1 %vm456_vm0, %v9734_v42 }
 0x3f6   :  { %1707 = vmatprep.mubr.bf16.mxu1 %v11561_v31 }
 0x3f8   :  { %2621 = vmatpush1.xpose.msra.mxu0 %v2321_v37  ;;  %v11666_v37 = vmov 0 }
 0x3f9   :  { %6105 = vmatprep.subr.bf16.mxu0 %v6830_v58 }
 0x3fb   :  { %2645 = vmatmul.mubr.f32.vlgmr.msra.gmra.mrb[180].mxu0 %v2356_v5  ;;  %v9831_v5 = vadd.s32 16, %v11624_v38 }
 0x3fc   :  { %6107 = vmatpush1.bf16.msk.msra.mxu0 %vm5912_vm12, %v10954_v22  ;;  %vm5918_vm12 = vmpackc.low %vm9887_vm9, %vm9879_vm6  ;;  %vm2709_vm9 = vcmp.lt.s32.totalorder %v2662_v4, %v9835_v53 }
 0x3fd   :  { %vm2678_vm7 = vcmp.ge.s32.totalorder %v9831_v5, %v9827_v54  ;;  %vm2701_vm8 = vcmp.lt.s32.totalorder %v9831_v5, %v9835_v53  ;;  %6108 = vmatprep.subr.bf16.mxu0 %v6830_v58  ;;  %vm9925_vm6 = vmand %vm2684_vm14, %vm2707_vm15  ;;  %vm2688_vm14 = vcmp.ge.s32.totalorder %v2664_v49, %v9827_v54  ;;  %vm2711_vm15 = vcmp.lt.s32.totalorder %v2664_v49, %v9835_v53 }
 0x3fe   :  { %vm9864_vm13 = vmand %vm2678_vm7, %vm2701_vm8  ;;  %vm2682_vm7 = vcmp.ge.s32.totalorder %v2658_v19, %v9827_v54  ;;  %vm2705_vm8 = vcmp.lt.s32.totalorder %v2658_v19, %v9835_v53  ;;  %5352 = vmatmul.mubr.msk.bf16.gmra.mrb[152].mxu1 %vm456_vm0, %v9745_v50  ;;  %v2794_v19 = vadd.s32 1, %v9823_v33 }
 0x3ff   :  { %vm5915_vm5 = vmpackc.low %vm2723_vm2, %vm9864_vm13  ;;  %1717 = vmatprep.mubr.bf16.mxu1 %v11561_v31 }
 0x400   :  { %5916 = vmatpush1.bf16.msk.msra.mxu1 %vm5915_vm5, %v10954_v22  ;;  %6110 = vmatpush1.bf16.msk.msra.mxu0 %vm5915_vm5, %v10954_v22  ;;  %vm9902_vm13 = vmand %vm2682_vm7, %vm2705_vm8  ;;  %vm2686_vm8 = vcmp.ge.s32.totalorder %v2662_v4, %v9827_v54  ;;  %v2797_v13 = vmul.u32 8, %v2794_v19 }
 0x401   :  { %5917 = vmatprep.subr.bf16.mxu1 %v6830_v58  ;;  %6111 = vmatprep.subr.bf16.mxu0 %v6830_v58  ;;  %vm9910_vm2 = vmand %vm2683_vm10, %vm2706_vm11  ;;  %vm2687_vm10 = vcmp.ge.s32.totalorder %v2663_v21, %v9827_v54  ;;  %vm2710_vm11 = vcmp.lt.s32.totalorder %v2663_v21, %v9835_v53  ;;  %v10134_v21 = vrot.slane %v10126_v36, %v11665_v51 }
 0x402   :  { %vm5921_vm5 = vmpackc.low %vm9910_vm2, %vm9902_vm13 }
 0x403   :  { %vm9931_vm7 = vmand %vm2685_vm3, %vm2708_vm4  ;;  %vm2689_vm4 = vcmp.ge.s32.totalorder %v2665_v61, %v9827_v54 }
 0x404   :  { %5919 = vmatpush1.bf16.msk.msra.mxu1 %vm5918_vm12, %v10954_v22  ;;  %6113 = vmatpush1.bf16.msk.msra.mxu0 %vm5918_vm12, %v10954_v22  ;;  %vm9960_vm3 = vmand %vm2686_vm8, %vm2709_vm9 }
 0x405   :  { %5920 = vmatprep.subr.bf16.mxu1 %v6830_v58  ;;  %6114 = vmatprep.subr.bf16.mxu0 %v6830_v58  ;;  %vm9968_vm12 = vmand %vm2687_vm10, %vm2710_vm11  ;;  %vm2690_vm10 = vcmp.ge.s32.totalorder %v2666_v24, %v9827_v54  ;;  %vm2691_vm11 = vcmp.ge.s32.totalorder %v2667_v3, %v9827_v54 }
 0x406   :  { %vm9974_vm13 = vmand %vm2688_vm14, %vm2711_vm15  ;;  %vm2714_vm14 = vcmp.lt.s32.totalorder %v2667_v3, %v9835_v53  ;;  %vm2692_vm15 = vcmp.ge.s32.totalorder %v2668_v32, %v9827_v54  ;;  %5353 = vmatmul.mubr.msk.bf16.gmra.mrb[156].mxu1 %vm456_vm0, %v9756_v28 }
 0x407   :  { %vm11647_vm2 = vmpackc.low %vm9931_vm7, %vm9925_vm6  ;;  %1727 = vmatprep.mubr.bf16.mxu1 %v11561_v31 }
 0x408   :  { %5922 = vmatpush1.bf16.msk.msra.mxu1 %vm5921_vm5, %v10954_v22  ;;  %6116 = vmatpush1.bf16.msk.msra.mxu0 %vm5921_vm5, %v10954_v22  ;;  %vm9984_vm5 = vmand %vm2689_vm4, %vm2712_vm1  ;;  %vm2713_vm1 = vcmp.lt.s32.totalorder %v2666_v24, %v9835_v53  ;;  %vm2693_vm4 = vcmp.ge.s32.totalorder %v2669_v44, %v9827_v54 }
 0x409   :  { %5923 = vmatprep.subr.bf16.mxu1 %v6830_v58  ;;  %6117 = vmatprep.subr.bf16.mxu0 %v6830_v58  ;;  %vm11650_vm8 = vmmov %vm11647_vm2 }
 0x40a   :  { %vm5927_vm9 = vmpackc.low %vm9968_vm12, %vm9960_vm3  ;;  %vm2715_vm3 = vcmp.lt.s32.totalorder %v2668_v32, %v9835_v53 }
 0x40b   :  { %vm5930_vm6 = vmpackc.low %vm9984_vm5, %vm9974_vm13  ;;  %vm2824_vm13 = vcmask 320512   ;;  %vm11655_vm5 = vcmask 1041408  }
 0x40c   :  { %5925 = vmatpush1.bf16.msk.msra.mxu1 %vm11647_vm2, %v10954_v22  ;;  %6119 = vmatpush1.bf16.msk.msra.mxu0 %vm11650_vm8, %v10954_v22  ;;  %vm10011_vm7 = vmand %vm2690_vm10, %vm2713_vm1  ;;  %vm2716_vm2 = vcmp.lt.s32.totalorder %v2669_v44, %v9835_v53 }
 0x40d   :  { %5926 = vmatprep.subr.bf16.mxu1 %v6830_v58  ;;  %6120 = vmatprep.subr.bf16.mxu0 %v6830_v58  ;;  %vm10019_vm12 = vmand %vm2691_vm11, %vm2714_vm14 }
 0x40e   :  { %vm5933_vm8 = vmpackc.low %vm10019_vm12, %vm10011_vm7  ;;  %5354 = vmatmul.mubr.msk.bf16.gmra.mrb[160].mxu1 %vm456_vm0, %v9767_v11  ;;  %v2670_v11 = vadd.s32 144, %v11624_v38 }
 0x40f   :  { %vm2737_vm10 = vmand %vm2693_vm4, %vm2716_vm2  ;;  %1737 = vmatprep.mubr.bf16.mxu1 %v11561_v31 }
 0x410   :  { %5928 = vmatpush1.bf16.msk.msra.mxu1 %vm5927_vm9, %v10954_v22  ;;  %6122 = vmatpush1.bf16.msk.msra.mxu0 %vm5927_vm9, %v10954_v22  ;;  %vm2736_vm9 = vmand %vm2692_vm15, %vm2715_vm3  ;;  %vm2717_vm14 = vcmp.lt.s32.totalorder %v2670_v11, %v9835_v53 }
 0x411   :  { %5929 = vmatprep.subr.bf16.mxu1 %v6830_v58  ;;  %6123 = vmatprep.subr.bf16.mxu0 %v6830_v58  ;;  %vm5936_vm1 = vmpackc.low %vm2737_vm10, %vm2736_vm9  ;;  %vm2800_vm10 = vcmp.lt.s32.totalorder %v10096_v60, %v2796_v30 }
 0x414   :  { %5931 = vmatpush1.bf16.msk.msra.mxu1 %vm5930_vm6, %v10954_v22  ;;  %6125 = vmatpush1.bf16.msk.msra.mxu0 %vm5930_vm6, %v10954_v22 }
 0x415   :  { %5932 = vmatprep.subr.bf16.mxu1 %v6830_v58  ;;  %6126 = vmatprep.subr.bf16.mxu0 %v6830_v58 }
 0x416   :  { %5355 = vmatmul.mubr.msk.bf16.gmra.mrb[164].mxu1 %vm456_vm0, %v9778_v62  ;;  %v2671_v62 = vadd.s32 152, %v11624_v38 }
 0x417   :  { %1747 = vmatprep.mubr.bf16.mxu1 %v11561_v31  ;;  %v2672_v31 = vadd.s32 160, %v11624_v38 }
 0x418   :  { %5934 = vmatpush1.bf16.msk.msra.mxu1 %vm5933_vm8, %v10954_v22  ;;  %6128 = vmatpush1.bf16.msk.msra.mxu0 %vm5933_vm8, %v10954_v22  ;;  %vm2695_vm11 = vcmp.ge.s32.totalorder %v2671_v62, %v9827_v54  ;;  %vm2718_vm6 = vcmp.lt.s32.totalorder %v2671_v62, %v9835_v53 }
 0x419   :  { %5935 = vmatprep.subr.bf16.mxu1 %v6830_v58  ;;  %6129 = vmatprep.subr.bf16.mxu0 %v6830_v58  ;;  %vm2739_vm12 = vmand %vm2695_vm11, %vm2718_vm6  ;;  %vm2696_vm15 = vcmp.ge.s32.totalorder %v2672_v31, %v9827_v54  ;;  %vm2719_vm3 = vcmp.lt.s32.totalorder %v2672_v31, %v9835_v53  ;;  %v2785_v53 = vmul.u32 8, %v9823_v33  ;;  %vm10122_vm6 = vcmp.lt.s32.totalorder %v9820_v10, %v2797_v13 }
 0x41a   :  { %vm2740_vm2 = vmand %vm2696_vm15, %vm2719_vm3 }
 0x41b   :  { %vm2790_vm9 = vcmp.ge.s32.totalorder %v10096_v60, %v2785_v53 }
 0x41c   :  { %5937 = vmatpush1.bf16.msk.msra.mxu1 %vm5936_vm1, %v10954_v22  ;;  %6131 = vmatpush1.bf16.msk.msra.mxu0 %vm5936_vm1, %v10954_v22  ;;  %vm2802_vm1 = vcmp.lt.s32.totalorder %v10096_v60, %v2797_v13 }
 0x41d   :  { %5938 = vmatprep.subr.bf16.mxu1 %v6830_v58  ;;  %6132 = vmatprep.subr.bf16.mxu0 %v6830_v58  ;;  %v6833_v58 = vmov 1.0   ;;  %vm2808_vm11 = vmand %vm2790_vm9, %vm2802_vm1 }
 0x41e   :  { %5356 = vmatmul.mubr.msk.bf16.gmra.mrb[168].mxu1 %vm456_vm0, %v9789_v39  ;;  %vm2694_vm0 = vcmp.ge.s32.totalorder %v2670_v11, %v9827_v54  ;;  %v10956_v39 = vmov 0.0   ;;  %v2784_v54 = vmul.u32 8, %v11624_v38 }
 0x41f   :  { %vm2738_vm7 = vmand %vm2694_vm0, %vm2717_vm14  ;;  %vm10112_vm0 = vcmp.lt.s32.totalorder %v9820_v10, %v2796_v30  ;;  %vm10117_vm14 = vcmp.ge.s32.totalorder %v9820_v10, %v2785_v53 }
 0x420   :  { %vm5939_vm4 = vmpackc.low %vm2739_vm12, %vm2738_vm7  ;;  %vm2788_vm8 = vcmp.ge.s32.totalorder %v10096_v60, %v2784_v54 }
 0x421   :  { %5940 = vmatpush1.bf16.msk.msra.mxu1 %vm5939_vm4, %v10954_v22  ;;  %6134 = vmatpush1.bf16.msk.msra.mxu0 %vm5939_vm4, %v10954_v22  ;;  %vm2807_vm15 = vmand %vm10117_vm14, %vm10122_vm6 }
 0x422   :  { %2879 = vmatprep.subr.mxu1 %v10956_v39  ;;  %3376 = vmatprep.subr.mxu0 %v10956_v39 }
 0x425   :  { %5404 = vmatpush1.msk.msra.mxu1 %vm2740_vm2, %v6833_v58  ;;  %5433 = vmatpush1.msk.msra.mxu0 %vm2740_vm2, %v6833_v58 }
 0x43f   :  { %v1367_v4 = vpop.f32.mrb[84].mxu1 }
 0x440   :  { %v1369_v49 = vpop.f32.mrb[85].mxu1  ;;  %v1368_v47 = vadd.f32 %v1367_v4, %v10130_v14 }
 0x441   :  { %v1370_v61 = vadd.f32 %v1369_v49, %v10134_v21  ;;  %v1371_v20 = vpop.f32.mrb[86].mxu1 }
 0x442   :  { %v1372_v24 = vadd.f32 %v1371_v20, %v10130_v14  ;;  %v1373_v26 = vpop.f32.mrb[87].mxu1 }
 0x443   :  { %v1374_v3 = vadd.f32 %v1373_v26, %v10134_v21 }
 0x444   :  { %v10154_v15 = vpack.c.bf16 %v1372_v24, %v1368_v47 }
 0x445   :  { %v10157_v57 = vpack.c.bf16 %v1374_v3, %v1370_v61 }
 0x450   :  { %v1377_v35 = vpop.f32.mrb[88].mxu1 }
 0x451   :  { %v1378_v32 = vadd.f32 %v1377_v35, %v10130_v14  ;;  %v1379_v44 = vpop.f32.mrb[89].mxu1 }
 0x452   :  { %v1380_v25 = vadd.f32 %v1379_v44, %v10134_v21 }
 0x4ce   :  { %v10075_v17 = vpop.f32.mrb[180].mxu0 }
 0x4cf   :  { %v2823_v23 = vsel %vm11655_vm5, %v10075_v17, -inf  ;;  %v10079_v42 = vpop.f32.mrb[181].mxu0  ;;  %vm10107_vm5 = vcmp.ge.s32.totalorder %v9820_v10, %v2784_v54 }
 0x4d0   :  { %v2825_v50 = vsel %vm2824_vm13, %v10079_v42, -inf  ;;  %vm2806_vm13 = vmand %vm2788_vm8, %vm2800_vm10  ;;  %vm2835_vm8 = vcmask 326656  }
 0x4d1   :  { %v2826_v28 = vmax.f32 %v2823_v23, %v2825_v50  ;;  %vm5941_vm7 = vmpackc.low %vm2808_vm11, %vm2806_vm13  ;;  %v1381_v23 = vpop.f32.mrb[90].mxu1  ;;  %vm2913_vm13 = vcmask 1044480   ;;  %vm3406_vm11 = vcmask 164864  }
 0x4d2   :  { %5942 = vmatprep.subr.msk.bf16.mxu1 %vm5941_vm7, %v10954_v22  ;;  %vm2805_vm12 = vmand %vm10107_vm5, %vm10112_vm0  ;;  %6136 = vmatprep.subr.msk.bf16.mxu0 %vm5941_vm7, %v10954_v22  ;;  %v1382_v50 = vadd.f32 %v1381_v23, %v10130_v14  ;;  %vm2909_vm0 = vcmask 171008  }
 0x4d3   :  { %2827 = vmax.xlane.f32.xlu0 %v2826_v28  ;;  %vm10148_vm3 = vmpackc.low %vm2807_vm15, %vm2805_vm12  ;;  %v1383_v28 = vpop.f32.mrb[91].mxu1 }
 0x4d4   :  { %v11667_v37 = vsel %vm10148_vm3, 4294967295, %v11666_v37  ;;  %v1384_v11 = vadd.f32 %v1383_v28, %v10134_v21  ;;  %v1387_v62 = vpop.f32.mrb[92].mxu1  ;;  %v10162_v31 = vpack.c.bf16 %v1382_v50, %v1378_v32 }
 0x4d5   :  { %11668 = vst [vmem:[#allocation100_spill] sm:$0xff] %v11667_v37  ;;  %v1388_v58 = vadd.f32 %v1387_v62, %v10130_v14  ;;  %v1389_v54 = vpop.f32.mrb[93].mxu1 }
 0x4d6   :  { %v10165_v53 = vpack.c.bf16 %v1384_v11, %v1380_v25  ;;  %v1390_v2 = vadd.f32 %v1389_v54, %v10134_v21  ;;  %v1391_v19 = vpop.f32.mrb[94].mxu1 }
 0x4d7   :  { %v1392_v30 = vadd.f32 %v1391_v19, %v10130_v14  ;;  %v1393_v13 = vpop.f32.mrb[95].mxu1 }
 0x4d8   :  { %v1394_v6 = vadd.f32 %v1393_v13, %v10134_v21  ;;  %v1397_v38 = vpop.f32.mrb[96].mxu1 }
 0x4d9   :  { %v10170_v33 = vpack.c.bf16 %v1392_v30, %v1388_v58  ;;  %v1398_v12 = vadd.f32 %v1397_v38, %v10130_v14  ;;  %v1399_v4 = vpop.f32.mrb[97].mxu1 }
 0x4da   :  { %v10173_v49 = vpack.c.bf16 %v1394_v6, %v1390_v2  ;;  %v1400_v47 = vadd.f32 %v1399_v4, %v10134_v21  ;;  %v1401_v61 = vpop.f32.mrb[98].mxu1 }
 0x4db   :  { %v1402_v20 = vadd.f32 %v1401_v61, %v10130_v14  ;;  %v1403_v24 = vpop.f32.mrb[99].mxu1 }
 0x4dc   :  { %v1404_v26 = vadd.f32 %v1403_v24, %v10134_v21  ;;  %v1407_v3 = vpop.f32.mrb[100].mxu1 }
 0x4dd   :  { %v10178_v35 = vpack.c.bf16 %v1402_v20, %v1398_v12  ;;  %v1408_v32 = vadd.f32 %v1407_v3, %v10130_v14  ;;  %v1409_v44 = vpop.f32.mrb[101].mxu1 }
 0x4de   :  { %v10181_v25 = vpack.c.bf16 %v1404_v26, %v1400_v47  ;;  %v1410_v23 = vadd.f32 %v1409_v44, %v10134_v21  ;;  %v1411_v50 = vpop.f32.mrb[102].mxu1 }
 0x4df   :  { %v1412_v28 = vadd.f32 %v1411_v50, %v10130_v14  ;;  %v1413_v11 = vpop.f32.mrb[103].mxu1 }
 0x4e0   :  { %v1414_v62 = vadd.f32 %v1413_v11, %v10134_v21  ;;  %v1417_v58 = vpop.f32.mrb[104].mxu1 }
 0x4e1   :  { %v10186_v54 = vpack.c.bf16 %v1412_v28, %v1408_v32  ;;  %v1418_v2 = vadd.f32 %v1417_v58, %v10130_v14  ;;  %v1419_v19 = vpop.f32.mrb[105].mxu1 }
 0x4e2   :  { %v10189_v30 = vpack.c.bf16 %v1414_v62, %v1410_v23  ;;  %v1420_v13 = vadd.f32 %v1419_v19, %v10134_v21  ;;  %v1421_v6 = vpop.f32.mrb[106].mxu1 }
 0x4e3   :  { %11669 = vst [vmem:[#allocation54_spill] sm:$0xff] %v10186_v54  ;;  %v1422_v38 = vadd.f32 %v1421_v6, %v10130_v14  ;;  %v1423_v12 = vpop.f32.mrb[107].mxu1 }
 0x4e4   :  { %v1424_v4 = vadd.f32 %v1423_v12, %v10134_v21  ;;  %v1427_v47 = vpop.f32.mrb[108].mxu1 }
 0x4e5   :  { %v10194_v61 = vpack.c.bf16 %v1422_v38, %v1418_v2  ;;  %v1428_v20 = vadd.f32 %v1427_v47, %v10130_v14  ;;  %v1429_v24 = vpop.f32.mrb[109].mxu1 }
 0x4e6   :  { %v10197_v26 = vpack.c.bf16 %v1424_v4, %v1420_v13  ;;  %v1430_v3 = vadd.f32 %v1429_v24, %v10134_v21  ;;  %v1431_v32 = vpop.f32.mrb[110].mxu1 }
 0x4e7   :  { %11670 = vst [vmem:[#allocation157_spill] sm:$0xff] %v10194_v61  ;;  %v1432_v44 = vadd.f32 %v1431_v32, %v10130_v14  ;;  %v1433_v23 = vpop.f32.mrb[111].mxu1 }
 0x4e8   :  { %11671 = vst [vmem:[#allocation160_spill] sm:$0xff] %v10197_v26  ;;  %v1434_v50 = vadd.f32 %v1433_v23, %v10134_v21  ;;  %v1437_v28 = vpop.f32.mrb[112].mxu1 }
 0x4e9   :  { %v10202_v11 = vpack.c.bf16 %v1432_v44, %v1428_v20  ;;  %v1438_v62 = vadd.f32 %v1437_v28, %v10130_v14  ;;  %v1439_v58 = vpop.f32.mrb[113].mxu1 }
 0x4ea   :  { %v10205_v2 = vpack.c.bf16 %v1434_v50, %v1430_v3  ;;  %v1440_v19 = vadd.f32 %v1439_v58, %v10134_v21  ;;  %v1441_v13 = vpop.f32.mrb[114].mxu1 }
 0x4eb   :  { %11672 = vst [vmem:[#allocation149_spill] sm:$0xff] %v10202_v11  ;;  %v1442_v6 = vadd.f32 %v1441_v13, %v10130_v14  ;;  %v1443_v38 = vpop.f32.mrb[115].mxu1 }
 0x4ec   :  { %11673 = vst [vmem:[#allocation107_spill] sm:$0xff] %v10205_v2  ;;  %v1444_v12 = vadd.f32 %v1443_v38, %v10134_v21  ;;  %v1447_v4 = vpop.f32.mrb[116].mxu1 }
 0x4ed   :  { %v10210_v47 = vpack.c.bf16 %v1442_v6, %v1438_v62  ;;  %v1448_v24 = vadd.f32 %v1447_v4, %v10130_v14  ;;  %v1449_v20 = vpop.f32.mrb[117].mxu1 }
 0x4ee   :  { %v10213_v32 = vpack.c.bf16 %v1444_v12, %v1440_v19  ;;  %v1450_v44 = vadd.f32 %v1449_v20, %v10134_v21  ;;  %v1451_v3 = vpop.f32.mrb[118].mxu1 }
 0x4ef   :  { %11674 = vst [vmem:[#allocation102_spill] sm:$0xff] %v10210_v47  ;;  %v1452_v23 = vadd.f32 %v1451_v3, %v10130_v14  ;;  %v1453_v50 = vpop.f32.mrb[119].mxu1 }
 0x4f0   :  { %11675 = vst [vmem:[#allocation87_spill] sm:$0xff] %v10213_v32  ;;  %v1454_v28 = vadd.f32 %v1453_v50, %v10134_v21  ;;  %v1457_v58 = vpop.f32.mrb[120].mxu1 }
 0x4f1   :  { %v10218_v13 = vpack.c.bf16 %v1452_v23, %v1448_v24  ;;  %v1458_v38 = vadd.f32 %v1457_v58, %v10130_v14  ;;  %v1459_v62 = vpop.f32.mrb[121].mxu1 }
 0x4f2   :  { %v10221_v6 = vpack.c.bf16 %v1454_v28, %v1450_v44  ;;  %v1460_v4 = vadd.f32 %v1459_v62, %v10134_v21  ;;  %v1461_v19 = vpop.f32.mrb[122].mxu1  ;;  %v11682_v62 = vld [vmem:[#allocation45_spill] sm:$0xff] }
 0x4f3   :  { %11676 = vst [vmem:[#allocation93_spill] sm:$0xff] %v10218_v13  ;;  %v1462_v12 = vadd.f32 %v1461_v19, %v10130_v14  ;;  %v1463_v20 = vpop.f32.mrb[123].mxu1  ;;  %v10238_v19 = vrot.slane %v10126_v36, %v11682_v62 }
 0x4f4   :  { %11677 = vst [vmem:[#allocation121_spill] sm:$0xff] %v10221_v6  ;;  %v1464_v22 = vadd.f32 %v1463_v20, %v10134_v21  ;;  %v1467_v3 = vpop.f32.mrb[124].mxu1  ;;  %v10242_v20 = vrot.slane %v10126_v36, %v11683_v29 }
 0x4f5   :  { %v10226_v39 = vpack.c.bf16 %v1462_v12, %v1458_v38  ;;  %v10229_v50 = vadd.f32 %v1467_v3, %v10130_v14  ;;  %v1469_v24 = vpop.f32.mrb[125].mxu1 }
 0x4f6   :  { %v10231_v23 = vpack.c.bf16 %v1464_v22, %v1460_v4  ;;  %v10234_v44 = vadd.f32 %v1469_v24, %v10134_v21  ;;  %v1471_v28 = vpop.f32.mrb[126].mxu1 }
 0x4f7   :  { %11678 = vst [vmem:[#allocation164_spill] sm:$0xff] %v10226_v39  ;;  %11679 = vst [vmem:[#allocation112_spill] sm:$0xff] %v10229_v50  ;;  %v1472_v58 = vpop.f32.mrb[127].mxu1 }
 0x4f8   :  { %11680 = vst [vmem:[#allocation97_spill] sm:$0xff] %v10231_v23  ;;  %11681 = vst [vmem:[#allocation165_spill] sm:$0xff] %v10234_v44  ;;  %v1649_v38 = vpop.f32.mrb[128].mxu1 }
 0x4f9   :  { %v1650_v14 = vadd.f32 %v1649_v38, %v10238_v19  ;;  %v1651_v12 = vpop.f32.mrb[129].mxu1 }
 0x4fa   :  { %v1652_v22 = vadd.f32 %v1651_v12, %v10242_v20  ;;  %v1653_v4 = vpop.f32.mrb[130].mxu1 }
 0x4fb   :  { %v1654_v21 = vadd.f32 %v1653_v4, %v10238_v19  ;;  %v1655_v3 = vpop.f32.mrb[131].mxu1 }
 0x4fc   :  { %v1656_v24 = vadd.f32 %v1655_v3, %v10242_v20  ;;  %v1659_v62 = vpop.f32.mrb[132].mxu1 }
 0x4fd   :  { %v10248_v28 = vpack.c.bf16 %v1654_v21, %v1650_v14  ;;  %v1660_v36 = vadd.f32 %v1659_v62, %v10238_v19  ;;  %v1661_v29 = vpop.f32.mrb[133].mxu1 }
 0x4fe   :  { %v10250_v58 = vpack.c.bf16 %v1656_v24, %v1652_v22  ;;  %v1662_v43 = vadd.f32 %v1661_v29, %v10242_v20  ;;  %v1663_v38 = vpop.f32.mrb[134].mxu1 }
 0x4ff   :  { %11684 = vst [vmem:[#allocation168_spill] sm:$0xff] %v10248_v28  ;;  %v1664_v56 = vadd.f32 %v1663_v38, %v10238_v19  ;;  %v1665_v12 = vpop.f32.mrb[135].mxu1 }
 0x500   :  { %11685 = vst [vmem:[#allocation170_spill] sm:$0xff] %v10250_v58  ;;  %v1666_v55 = vadd.f32 %v1665_v12, %v10242_v20  ;;  %v1669_v14 = vpop.f32.mrb[136].mxu1 }
 0x501   :  { %v10256_v4 = vpack.c.bf16 %v1664_v56, %v1660_v36  ;;  %v1670_v22 = vadd.f32 %v1669_v14, %v10238_v19  ;;  %v1671_v21 = vpop.f32.mrb[137].mxu1 }
 0x502   :  { %v10258_v45 = vpack.c.bf16 %v1666_v55, %v1662_v43  ;;  %v1672_v3 = vadd.f32 %v1671_v21, %v10242_v20  ;;  %v1673_v62 = vpop.f32.mrb[138].mxu1 }
 0x503   :  { %11686 = vst [vmem:[#allocation167_spill] sm:$0xff] %v10256_v4  ;;  %v1674_v24 = vadd.f32 %v1673_v62, %v10238_v19  ;;  %v1675_v29 = vpop.f32.mrb[139].mxu1 }
 0x504   :  { %11687 = vst [vmem:[#allocation169_spill] sm:$0xff] %v10258_v45  ;;  %v1676_v28 = vadd.f32 %v1675_v29, %v10242_v20  ;;  %v1679_v56 = vpop.f32.mrb[140].mxu1 }
 0x505   :  { %v10264_v38 = vpack.c.bf16 %v1674_v24, %v1670_v22  ;;  %v1680_v55 = vadd.f32 %v1679_v56, %v10238_v19  ;;  %v1681_v43 = vpop.f32.mrb[141].mxu1 }
 0x506   :  { %v10266_v58 = vpack.c.bf16 %v1676_v28, %v1672_v3  ;;  %v1682_v36 = vadd.f32 %v1681_v43, %v10242_v20  ;;  %v1683_v12 = vpop.f32.mrb[142].mxu1 }
 0x507   :  { %11688 = vst [vmem:[#allocation113_spill] sm:$0xff] %v10264_v38  ;;  %v1684_v14 = vadd.f32 %v1683_v12, %v10238_v19  ;;  %v1685_v21 = vpop.f32.mrb[143].mxu1 }
 0x508   :  { %11689 = vst [vmem:[#allocation171_spill] sm:$0xff] %v10266_v58  ;;  %v1686_v4 = vadd.f32 %v1685_v21, %v10242_v20  ;;  %v1689_v22 = vpop.f32.mrb[144].mxu1 }
 0x509   :  { %v10272_v62 = vpack.c.bf16 %v1684_v14, %v1680_v55  ;;  %v1690_v28 = vadd.f32 %v1689_v22, %v10238_v19  ;;  %v1691_v3 = vpop.f32.mrb[145].mxu1 }
 0x50a   :  { %v10274_v45 = vpack.c.bf16 %v1686_v4, %v1682_v36  ;;  %v1692_v24 = vadd.f32 %v1691_v3, %v10242_v20  ;;  %v1693_v29 = vpop.f32.mrb[146].mxu1 }
 0x50b   :  { %11690 = vst [vmem:[#allocation66_spill] sm:$0xff] %v10272_v62  ;;  %v1694_v56 = vadd.f32 %v1693_v29, %v10238_v19  ;;  %v1695_v43 = vpop.f32.mrb[147].mxu1 }
 0x50c   :  { %11691 = vst [vmem:[#allocation58_spill] sm:$0xff] %v10274_v45  ;;  %v1696_v38 = vadd.f32 %v1695_v43, %v10242_v20  ;;  %v1699_v55 = vpop.f32.mrb[148].mxu1 }
 0x50d   :  { %v10280_v12 = vpack.c.bf16 %v1694_v56, %v1690_v28  ;;  %v1700_v4 = vadd.f32 %v1699_v55, %v10238_v19  ;;  %v1701_v36 = vpop.f32.mrb[149].mxu1 }
 0x50e   :  { %v10282_v58 = vpack.c.bf16 %v1696_v38, %v1692_v24  ;;  %v1702_v14 = vadd.f32 %v1701_v36, %v10242_v20  ;;  %v1703_v21 = vpop.f32.mrb[150].mxu1 }
 0x50f   :  { %11692 = vst [vmem:[#allocation61_spill] sm:$0xff] %v10280_v12  ;;  %v1704_v22 = vadd.f32 %v1703_v21, %v10238_v19  ;;  %v1705_v3 = vpop.f32.mrb[151].mxu1 }
 0x510   :  { %11693 = vst [vmem:[#allocation43_spill] sm:$0xff] %v10282_v58  ;;  %v1706_v62 = vadd.f32 %v1705_v3, %v10242_v20  ;;  %v1709_v28 = vpop.f32.mrb[152].mxu1  ;;  %v2795_v3 = vadd.s32 1, %v9831_v5 }
 0x511   :  { %v10288_v29 = vpack.c.bf16 %v1704_v22, %v1700_v4  ;;  %v1710_v38 = vadd.f32 %v1709_v28, %v10238_v19  ;;  %v1711_v24 = vpop.f32.mrb[153].mxu1 }
 0x512   :  { %v10290_v45 = vpack.c.bf16 %v1706_v62, %v1702_v14  ;;  %v1712_v56 = vadd.f32 %v1711_v24, %v10242_v20  ;;  %v1713_v43 = vpop.f32.mrb[154].mxu1 }
 0x513   :  { %11694 = vst [vmem:[#allocation60_spill] sm:$0xff] %v10288_v29  ;;  %v1714_v36 = vadd.f32 %v1713_v43, %v10238_v19  ;;  %v1715_v12 = vpop.f32.mrb[155].mxu1 }
 0x514   :  { %11695 = vst [vmem:[#allocation124_spill] sm:$0xff] %v10290_v45  ;;  %v1716_v4 = vadd.f32 %v1715_v12, %v10242_v20  ;;  %v1719_v24 = vpop.f32.mrb[156].mxu1  ;;  %v2798_v45 = vmul.u32 8, %v2795_v3 }
 0x515   :  { %v10298_v22 = vpack.c.bf16 %v1714_v36, %v1710_v38  ;;  %v1720_v43 = vadd.f32 %v1719_v24, %v10238_v19  ;;  %v1721_v29 = vpop.f32.mrb[157].mxu1 }
 0x516   :  { %v10301_v28 = vpack.c.bf16 %v1716_v4, %v1712_v56  ;;  %v1723_v12 = vpop.f32.mrb[158].mxu1  ;;  %vm10316_vm2 = vcmp.lt.s32.totalorder %v10096_v60, %v2798_v45  ;;  %vm10332_vm1 = vcmp.lt.s32.totalorder %v9820_v10, %v2798_v45  ;;  %v11709_v45 = vmov 0.0  }
 0x517   :  { %11696 = vst [vmem:[#allocation48_spill] sm:$0xff] %v10298_v22  ;;  %v1724_v38 = vadd.f32 %v1723_v12, %v10238_v19 }
 0x519   :  { %v10308_v36 = vpack.c.bf16 %v1724_v38, %v1720_v43 }
 0x51b   :  { %11697 = vst [vmem:[#allocation132_spill] sm:$0xff] %v10308_v36 }
 0x560   :  { %v2828_v55 = vpop.xlane.xlu0 %2827 }
 0x561   :  { %v2829_v21 = vsub.f32 %v10075_v17, %v2828_v55  ;;  %v2830_v58 = vsub.f32 %v10079_v42, %v2828_v55  ;;  %v2786_v17 = vmul.u32 8, %v9831_v5  ;;  %v1722_v42 = vadd.f32 %v1721_v29, %v10242_v20  ;;  %v1725_v55 = vpop.f32.mrb[159].mxu1 }
 0x562   :  { %v1729_v29 = vpop.f32.mrb[160].mxu1 }
 0x563   :  { %v2831_v62 = vmul.f32 1.442695, %v2829_v21  ;;  %v2833_v14 = vmul.f32 1.442695, %v2830_v58  ;;  %v1726_v58 = vadd.f32 %v1725_v55, %v10242_v20  ;;  %vm10311_vm4 = vcmp.ge.s32.totalorder %v10096_v60, %v2786_v17 }
 0x564   :  { %vm2810_vm9 = vmand %vm10311_vm4, %vm10316_vm2  ;;  %vm10327_vm10 = vcmp.ge.s32.totalorder %v9820_v10, %v2786_v17 }
 0x565   :  { %6520 = vpow2.f32 %v2831_v62  ;;  %v10320_v5 = vpack.c.bf16 %v1726_v58, %v1722_v42  ;;  %v1730_v62 = vadd.f32 %v1729_v29, %v10238_v19  ;;  %v10346_v10 = vsel %vm2810_vm9, 1.0, %v11709_v45  ;;  %vm2809_vm5 = vmand %vm10327_vm10, %vm10332_vm1 }
 0x566   :  { %6522 = vpow2.f32 %v2833_v14  ;;  %v1731_v14 = vpop.f32.mrb[161].mxu1  ;;  %11710 = vst [vmem:[#allocation79_spill] sm:$0xff] %v10346_v10  ;;  %v11711_v58 = vmov 1.0|1.0   ;;  %v10365_v21 = vsel %vm2809_vm5, 1.0, %v11709_v45 }
 0x567   :  { %11702 = vst [vmem:[#allocation71_spill] sm:$0xff] %v10320_v5  ;;  %v1732_v24 = vadd.f32 %v1731_v14, %v10242_v20  ;;  %v1733_v43 = vpop.f32.mrb[162].mxu1  ;;  %11712 = vst [vmem:[#allocation74_spill] sm:$0xff] %v10365_v21 }
 0x568   :  { %v1734_v17 = vadd.f32 %v1733_v43, %v10238_v19  ;;  %v1735_v12 = vpop.f32.mrb[163].mxu1 }
 0x569   :  { %v1736_v38 = vadd.f32 %v1735_v12, %v10242_v20  ;;  %v1739_v29 = vpop.f32.mrb[164].mxu1 }
 0x56a   :  { %v10354_v55 = vpack.c.bf16 %v1734_v17, %v1730_v62  ;;  %v1740_v4 = vadd.f32 %v1739_v29, %v10238_v19  ;;  %v1741_v60 = vpop.f32.mrb[165].mxu1 }
 0x56b   :  { %v10359_v56 = vpack.c.bf16 %v1736_v38, %v1732_v24  ;;  %v1742_v62 = vadd.f32 %v1741_v60, %v10242_v20  ;;  %v1743_v14 = vpop.f32.mrb[166].mxu1  ;;  %v11713_v24 = vld [vmem:[#allocation120_spill] sm:$0xff] }
 0x56c   :  { %v1744_v43 = vadd.f32 %v1743_v14, %v10238_v19  ;;  %v1745_v17 = vpop.f32.mrb[167].mxu1  ;;  %v11714_v60 = vld [vmem:[#allocation36_spill] sm:$0xff] }
 0x56d   :  { %v1746_v12 = vadd.f32 %v1745_v17, %v10242_v20  ;;  %v11718_v17 = vld [vmem:[#allocation64_spill] sm:$0xff] }
 0x56e   :  { %v10374_v38 = vpack.c.bf16 %v1744_v43, %v1740_v4  ;;  %v11715_v4 = vld [vmem:[#allocation116_spill] sm:$0xff] }
 0x56f   :  { %v10337_v3 = vpop.eup %6520  ;;  %v11717_v43 = vld [vmem:[#allocation128_spill] sm:$0xff] }
 0x570   :  { %11707 = vst [vmem:[#allocation135_spill] sm:$0xff] %v10337_v3  ;;  %v10340_v42 = vpop.eup %6522 }
 0x571   :  { %11708 = vst [vmem:[#allocation77_spill] sm:$0xff] %v10340_v42  ;;  %5405 = vmatprep.mubr.msk.f32.mxu1 %vm2835_vm8, %v10340_v42 }
 0x572   :  { %2904 = vmatmul.mubr.f32.vlgmr.msra.gmra.mrb[172].mxu1 %v10337_v3 }
 0x573   :  { %5944 = vmatpush1.bf16.msk.msra.mxu1 %vm10148_vm3, %v11711_v58  ;;  %2984 = vmatprep.mubr.f32.mxu1 %v11709_v45  ;;  %v10378_v45 = vpop.f32.mrb[168].mxu1  ;;  %v10382_v58 = vld [vmem:[#allocation15] sm:$0xff] }
 0x574   :  { %5410 = vmatprep.subr.msk.mxu1 %vm2913_vm13, %v10346_v10  ;;  %v10376_v10 = vpack.c.bf16 %v1746_v12, %v1742_v62  ;;  %v10380_v29 = vpop.f32.mrb[169].mxu1  ;;  %v11716_v62 = vld [vmem:[#allocation127_spill] sm:$0xff]  ;;  %v11721_v12 = vld [vmem:[#allocation78_spill] sm:$0xff] }
 0x575   :  { %v1753_v37 = vpop.f32.mrb[170].mxu1 }
 0x576   :  { %v11719_v37 = vld [vmem:[#allocation131_spill] sm:$0xff] }
 0x577   :  { %5411 = vmatpush1.msk.msra.mxu1 %vm2913_vm13, %v10365_v21  ;;  %v1754_v21 = vpop.f32.mrb[171].mxu1 }
 0x578   :  { %5946 = vmatprep.subr.bf16.mxu1 %v11713_v24  ;;  %v3004_v24 = vrot.slane %v10382_v58, %v11714_v60  ;;  %v11720_v21 = vld [vmem:[#allocation83_spill] sm:$0xff]  ;;  %v11722_v60 = vld [vmem:[#allocation94_spill] sm:$0xff] }
 0x645   :  { %v2905_v14 = vpop.f32.mrb[172].mxu1 }
 0x646   :  { %v2907_v3 = vpop.f32.mrb[173].mxu1  ;;  %5412 = vmatmul.mubr.msk.f32.vlgmr.msra.gmra.mrb[174].mxu1 %vm2909_vm0, %v2905_v14  ;;  %v11724_v14 = vld [vmem:[#allocation158_spill] sm:$0xff] }
 0x647   :  { %5948 = vmatpush1.bf16.xpose.msra.mxu1 %v11715_v4  ;;  %3101 = vmatprep.mubr.f32.mxu1 %v3004_v24  ;;  %v11723_v3 = vld [vmem:[#allocation95_spill] sm:$0xff]  ;;  %v11725_v4 = vld [vmem:[#allocation106_spill] sm:$0xff] }
 0x648   :  { %5950 = vmatprep.subr.bf16.mxu1 %v11716_v62  ;;  %v11726_v24 = vld [vmem:[#allocation142_spill] sm:$0xff]  ;;  %v11727_v62 = vld [vmem:[#allocation161_spill] sm:$0xff] }
 0x64f   :  { %5952 = vmatpush1.bf16.xpose.msra.mxu1 %v11717_v43  ;;  %v11728_v43 = vld [vmem:[#allocation163_spill] sm:$0xff] }
 0x650   :  { %5954 = vmatprep.subr.bf16.mxu1 %v11718_v17  ;;  %v11729_v17 = vld [vmem:[#allocation34_spill] sm:$0xff] }
 0x657   :  { %5956 = vmatpush1.bf16.xpose.msra.mxu1 %v11719_v37  ;;  %v11730_v37 = vld [vmem:[#allocation166_spill] sm:$0xff] }
 0x658   :  { %5958 = vmatprep.subr.bf16.mxu1 %v11720_v21  ;;  %v11731_v21 = vld [vmem:[#allocation37_spill] sm:$0xff] }
 0x65f   :  { %5960 = vmatpush1.bf16.xpose.msra.mxu1 %v11721_v12  ;;  %v11732_v12 = vld [vmem:[#allocation51_spill] sm:$0xff] }
 0x660   :  { %5962 = vmatprep.subr.bf16.mxu1 %v11722_v60  ;;  %v11733_v60 = vld [vmem:[#allocation177_spill] sm:$0xff] }
 0x667   :  { %5964 = vmatpush1.bf16.xpose.msra.mxu1 %v11723_v3  ;;  %v11734_v3 = vld [vmem:[#allocation125_spill] sm:$0xff] }
 0x668   :  { %5966 = vmatprep.subr.bf16.mxu1 %v11724_v14  ;;  %v10407_v42 = vadd.f32 %v11734_v3, %v11733_v60  ;;  %v11735_v14 = vld [vmem:[#allocation29_spill] sm:$0xff]  ;;  %v11741_v60 = vld [vmem:[#allocation86_spill] sm:$0xff]  ;;  %v11742_v3 = vld [vmem:[#allocation75_spill] sm:$0xff] }
 0x66f   :  { %5968 = vmatpush1.bf16.xpose.msra.mxu1 %v11725_v4 }
 0x670   :  { %5970 = vmatprep.subr.bf16.mxu1 %v11726_v24  ;;  %v11736_v24 = vld [vmem:[#allocation176_spill] sm:$0xff] }
 0x677   :  { %5972 = vmatpush1.bf16.xpose.msra.mxu1 %v11727_v62  ;;  %v11737_v62 = vld [vmem:[#allocation73_spill] sm:$0xff] }
 0x678   :  { %5974 = vmatprep.subr.bf16.mxu1 %v11728_v43  ;;  %v10413_v4 = vadd.f32 %v11737_v62, %v11736_v24  ;;  %v11738_v43 = vld [vmem:[#allocation33_spill] sm:$0xff]  ;;  %v11739_v62 = vld [vmem:[#allocation42_spill] sm:$0xff]  ;;  %v11744_v24 = vld [vmem:[#allocation148_spill] sm:$0xff] }
 0x67f   :  { %5976 = vmatpush1.bf16.xpose.msra.mxu1 %v11729_v17  ;;  %v3000_v17 = vrot.slane %v10382_v58, %v11738_v43 }
 0x680   :  { %5978 = vmatprep.subr.bf16.mxu1 %v11730_v37 }
 0x687   :  { %5980 = vmatpush1.bf16.xpose.msra.mxu1 %v11731_v21 }
 0x688   :  { %5982 = vmatprep.subr.bf16.mxu1 %v11732_v12  ;;  %v3012_v12 = vrot.slane %v10382_v58, %v11665_v51  ;;  %v3008_v51 = vrot.slane %v10382_v58, %v11664_v41  ;;  %v11743_v41 = vld [vmem:[#allocation134_spill] sm:$0xff] }
 0x68f   :  { %5984 = vmatpush1.bf16.xpose.msra.mxu1 %v11735_v14 }
 0x690   :  { %3077 = vmatprep.subr.mxu1 %v10407_v42 }
 0x697   :  { %3078 = vmatpush1.xpose.msra.mxu1 %v10413_v4 }
 0x698   :  { %5986 = vmatprep.subr.bf16.mxu1 %v10157_v57 }
 0x69a   :  { %3102 = vmatmul.mubr.f32.vlgmr.msra.gmra.mrb[176].mxu1 %v3000_v17  ;;  %v3020_v17 = vrot.slane %v10382_v58, %v11739_v62 }
 0x69b   :  { %5988 = vmatpush1.bf16.xpose.msra.mxu1 %v10154_v15  ;;  %3172 = vmatprep.mubr.f32.mxu1 %v3012_v12  ;;  %v11740_v12 = vld [vmem:[#allocation126_spill] sm:$0xff] }
 0x69c   :  { %5990 = vmatprep.subr.bf16.mxu1 %v10165_v53 }
 0x6a3   :  { %5992 = vmatpush1.bf16.xpose.msra.mxu1 %v10162_v31 }
 0x6a4   :  { %5994 = vmatprep.subr.bf16.mxu1 %v10173_v49 }
 0x6ab   :  { %5996 = vmatpush1.bf16.xpose.msra.mxu1 %v10170_v33 }
 0x6ac   :  { %5998 = vmatprep.subr.bf16.mxu1 %v10181_v25 }
 0x6b3   :  { %6000 = vmatpush1.bf16.xpose.msra.mxu1 %v10178_v35 }
 0x6b4   :  { %6002 = vmatprep.subr.bf16.mxu1 %v10189_v30 }
 0x6bb   :  { %6004 = vmatpush1.bf16.xpose.msra.mxu1 %v10186_v54  ;;  %v11759_v54 = vld [vmem:[#allocation43_spill] sm:$0xff] }
 0x6bc   :  { %6006 = vmatprep.subr.bf16.mxu1 %v10197_v26  ;;  %v11755_v26 = vld [vmem:[#allocation171_spill] sm:$0xff] }
 0x6c3   :  { %6008 = vmatpush1.bf16.xpose.msra.mxu1 %v10194_v61  ;;  %v11752_v61 = vld [vmem:[#allocation168_spill] sm:$0xff] }
 0x6c4   :  { %6010 = vmatprep.subr.bf16.mxu1 %v10205_v2  ;;  %v11751_v2 = vld [vmem:[#allocation170_spill] sm:$0xff] }
 0x6cb   :  { %6012 = vmatpush1.bf16.xpose.msra.mxu1 %v10202_v11 }
 0x6cc   :  { %6014 = vmatprep.subr.bf16.mxu1 %v10213_v32  ;;  %v11750_v32 = vld [vmem:[#allocation46_spill] sm:$0xff] }
 0x6cd   :  { %v3028_v11 = vrot.slane %v10382_v58, %v11750_v32  ;;  %v11760_v32 = vld [vmem:[#allocation61_spill] sm:$0xff] }
 0x6d3   :  { %6016 = vmatpush1.bf16.xpose.msra.mxu1 %v10210_v47 }
 0x6d4   :  { %6018 = vmatprep.subr.bf16.mxu1 %v10221_v6  ;;  %v11749_v6 = vld [vmem:[#allocation41_spill] sm:$0xff] }
 0x6d5   :  { %v3016_v47 = vrot.slane %v10382_v58, %v11749_v6  ;;  %v11758_v6 = vld [vmem:[#allocation66_spill] sm:$0xff] }
 0x6db   :  { %6020 = vmatpush1.bf16.xpose.msra.mxu1 %v10218_v13 }
 0x6dc   :  { %6022 = vmatprep.subr.bf16.mxu1 %v10231_v23  ;;  %v11748_v23 = vld [vmem:[#allocation159_spill] sm:$0xff] }
 0x6e3   :  { %6024 = vmatpush1.bf16.xpose.msra.mxu1 %v10226_v39  ;;  %v11747_v39 = vld [vmem:[#allocation65_spill] sm:$0xff] }
 0x6e4   :  { %3148 = vmatprep.subr.mxu1 %v10234_v44  ;;  %v11746_v44 = vld [vmem:[#allocation31_spill] sm:$0xff]  ;;  %v1609_v13 = vadd.f32 %v11748_v23, %v11747_v39  ;;  %v11756_v39 = vld [vmem:[#allocation113_spill] sm:$0xff]  ;;  %v11757_v23 = vld [vmem:[#allocation58_spill] sm:$0xff] }
 0x6eb   :  { %3149 = vmatpush1.xpose.msra.mxu1 %v10229_v50 }
 0x6ec   :  { %6026 = vmatprep.subr.bf16.mxu1 %v9489_v63 }
 0x6ee   :  { %3173 = vmatmul.mubr.f32.vlgmr.msra.gmra.mrb[176].mxu1 %v3008_v51 }
 0x6ef   :  { %6028 = vmatpush1.bf16.xpose.msra.mxu1 %v9484_v48  ;;  %3243 = vmatprep.mubr.f32.mxu1 %v3020_v17  ;;  %v11745_v17 = vld [vmem:[#allocation115_spill] sm:$0xff] }
 0x6f0   :  { %6030 = vmatprep.subr.bf16.mxu1 %v9503_v34  ;;  %v1611_v50 = vadd.f32 %v11745_v17, %v9459_v59  ;;  %v11753_v59 = vld [vmem:[#allocation169_spill] sm:$0xff]  ;;  %v11754_v17 = vld [vmem:[#allocation167_spill] sm:$0xff] }
 0x6f7   :  { %6032 = vmatpush1.bf16.xpose.msra.mxu1 %v11740_v12 }
 0x6f8   :  { %6034 = vmatprep.subr.bf16.mxu1 %v11741_v60 }
 0x6ff   :  { %6036 = vmatpush1.bf16.xpose.msra.mxu1 %v11742_v3 }
 0x700   :  { %6038 = vmatprep.subr.bf16.mxu1 %v11743_v41 }
 0x707   :  { %6040 = vmatpush1.bf16.xpose.msra.mxu1 %v11744_v24 }
 0x708   :  { %6042 = vmatprep.subr.bf16.mxu1 %v9545_v18 }
 0x70f   :  { %6044 = vmatpush1.bf16.xpose.msra.mxu1 %v9540_v46 }
 0x710   :  { %6046 = vmatprep.subr.bf16.mxu1 %v9559_v1 }
 0x717   :  { %6048 = vmatpush1.bf16.xpose.msra.mxu1 %v9554_v7 }
 0x718   :  { %6050 = vmatprep.subr.bf16.mxu1 %v9567_v9 }
 0x719   :  { %v10459_v51 = vpop.f32.mrb[174].mxu1 }
 0x71a   :  { %v10461_v62 = vpop.f32.mrb[175].mxu1 }
 0x71b   :  { %6524 = vrcp.f32 %v10461_v62  ;;  %v11772_v62 = vld [vmem:[#allocation116_spill] sm:$0xff] }
 0x71c   :  { %6526 = vrcp.f32 %v10459_v51 }
 0x71f   :  { %6052 = vmatpush1.bf16.xpose.msra.mxu1 %v9565_v52 }
 0x720   :  { %6054 = vmatprep.subr.bf16.mxu1 %v9581_v27 }
 0x727   :  { %6056 = vmatpush1.bf16.xpose.msra.mxu1 %v9579_v40 }
 0x728   :  { %6058 = vmatprep.subr.bf16.mxu1 %v9595_v16 }
 0x72f   :  { %6060 = vmatpush1.bf16.xpose.msra.mxu1 %v9593_v8 }
 0x730   :  { %6062 = vmatprep.subr.bf16.mxu1 %v9611_v0 }
 0x737   :  { %6064 = vmatpush1.bf16.xpose.msra.mxu1 %v11746_v44 }
 0x738   :  { %3219 = vmatprep.subr.mxu1 %v1611_v50 }
 0x73f   :  { %3220 = vmatpush1.xpose.msra.mxu1 %v1609_v13 }
 0x740   :  { %6066 = vmatprep.subr.bf16.mxu1 %v11751_v2 }
 0x742   :  { %3244 = vmatmul.mubr.f32.vlgmr.msra.gmra.mrb[176].mxu1 %v3016_v47  ;;  %v11761_v47 = vld [vmem:[#allocation124_spill] sm:$0xff] }
 0x743   :  { %6068 = vmatpush1.bf16.xpose.msra.mxu1 %v11752_v61  ;;  %3314 = vmatprep.mubr.f32.mxu1 %v3028_v11  ;;  %v11762_v61 = vld [vmem:[#allocation60_spill] sm:$0xff]  ;;  %v10499_v11 = vadd.f32 %v10380_v29, %v10242_v20  ;;  %v3332_v20 = vstv %s10671_s8  ;;  %s6834_s8 = smov [#allocation20]  }
 0x744   :  { %6070 = vmatprep.subr.bf16.mxu1 %v11753_v59  ;;  %s5212_s25 = sshll.u32 %s6834_s8, 4  ;;  %s5213_s25 = int_to_ptr.vmem [resolvable:$true] %s5212_s25 }
 0x745   :  { %s6777_s4 = scalar_lea.vmem %s5213_s25, 32  ;;  %p6782_p11 = scmp.lt.s32.totalorder %s5213_s25, %s5213_s25 }
 0x746   :  { %p6778_p10 = scmp.ne.s32.totalorder %s5213_s25, %s6777_s4  ;;  %p6783_p12 = scmp.lt.s32.totalorder %s6777_s4, %s6777_s4 }
 0x748   :  { %p6784_p13 = por %p6783_p12, %p6782_p11 }
 0x74a   :  { %p6785_p0 = pnand %p6784_p13, %p6778_p10 }
 0x74b   :  { %6072 = vmatpush1.bf16.xpose.msra.mxu1 %v11754_v17 }
 0x74c   :  { %6074 = vmatprep.subr.bf16.mxu1 %v11755_v26 }
 0x753   :  { %6076 = vmatpush1.bf16.xpose.msra.mxu1 %v11756_v39 }
 0x754   :  { %6078 = vmatprep.subr.bf16.mxu1 %v11757_v23 }
 0x75b   :  { %6080 = vmatpush1.bf16.xpose.msra.mxu1 %v11758_v6 }
 0x75c   :  { %6082 = vmatprep.subr.bf16.mxu1 %v11759_v54 }
 0x763   :  { %6084 = vmatpush1.bf16.xpose.msra.mxu1 %v11760_v32 }
 0x764   :  { %6086 = vmatprep.subr.bf16.mxu1 %v11761_v47 }
 0x76b   :  { %6088 = vmatpush1.bf16.xpose.msra.mxu1 %v11762_v61 }
 0x76c   :  { %6090 = vmatprep.subr.bf16.mxu1 %v10301_v28 }
 0x773   :  { %6092 = vmatpush1.bf16.xpose.msra.mxu1 %v10298_v22  ;;  %v10505_v22 = vadd.f32 %v10378_v45, %v10238_v19  ;;  %v11771_v19 = vld [vmem:[#allocation120_spill] sm:$0xff] }
 0x774   :  { %6094 = vmatprep.subr.bf16.mxu1 %v10320_v5  ;;  %v11763_v5 = vld [vmem:[#allocation45_spill] sm:$0xff] }
 0x77b   :  { %6096 = vmatpush1.bf16.xpose.msra.mxu1 %v10308_v36  ;;  %v3024_v36 = vrot.slane %v10382_v58, %v11763_v5 }
 0x77c   :  { %6098 = vmatprep.subr.bf16.mxu1 %v10359_v56 }
 0x783   :  { %6100 = vmatpush1.bf16.xpose.msra.mxu1 %v10354_v55 }
 0x784   :  { %6102 = vmatprep.subr.bf16.mxu1 %v10376_v10 }
 0x78b   :  { %6104 = vmatpush1.bf16.xpose.msra.mxu1 %v10374_v38 }
 0x78c   :  { %3290 = vmatprep.subr.mxu1 %v10499_v11 }
 0x793   :  { %3291 = vmatpush1.xpose.msra.mxu1 %v10505_v22 }
 0x794   :  { %6220 = vmatprep.subr.bf16.mxu1 %v9489_v63 }
 0x796   :  { %3315 = vmatmul.mubr.f32.vlgmr.msra.gmra.mrb[176].mxu1 %v3024_v36 }
 0x797   :  { %6222 = vmatpush1.bf16.msra.mxu1 %v9484_v48  ;;  %v6525_v48 = vpop.eup %6524 }
 0x798   :  { %6224 = vmatprep.subr.bf16.mxu1 %v9503_v34  ;;  %v6527_v63 = vpop.eup %6526 }
 0x79b   :  { %6226 = vmatpush1.bf16.msra.mxu1 %v11740_v12 }
 0x79c   :  { %6228 = vmatprep.subr.bf16.mxu1 %v11741_v60 }
 0x79f   :  { %6230 = vmatpush1.bf16.msra.mxu1 %v11742_v3 }
 0x7a0   :  { %6232 = vmatprep.subr.bf16.mxu1 %v11743_v41 }
 0x7a3   :  { %6234 = vmatpush1.bf16.msra.mxu1 %v11744_v24 }
 0x7a4   :  { %6236 = vmatprep.subr.bf16.mxu1 %v9545_v18 }
 0x7a7   :  { %6238 = vmatpush1.bf16.msra.mxu1 %v9540_v46 }
 0x7a8   :  { %6240 = vmatprep.subr.bf16.mxu1 %v9559_v1 }
 0x7ab   :  { %6242 = vmatpush1.bf16.msra.mxu1 %v9554_v7  ;;  %v11764_v7 = vld [vmem:[#allocation77_spill] sm:$0xff] }
 0x7ac   :  { %6244 = vmatprep.subr.bf16.mxu1 %v9567_v9  ;;  %v2994_v1 = vmul.f32 %v6525_v48, %v11764_v7  ;;  %v11765_v9 = vld [vmem:[#allocation135_spill] sm:$0xff]  ;;  %v11778_v7 = vld [vmem:[#allocation78_spill] sm:$0xff] }
 0x7ad   :  { %v11773_v48 = vld [vmem:[#allocation127_spill] sm:$0xff] }
 0x7af   :  { %6246 = vmatpush1.bf16.msra.mxu1 %v9565_v52 }
 0x7b0   :  { %6248 = vmatprep.subr.bf16.mxu1 %v9581_v27 }
 0x7b3   :  { %6250 = vmatpush1.bf16.msra.mxu1 %v9579_v40  ;;  %v2993_v40 = vmul.f32 %v6527_v63, %v11765_v9  ;;  %v11774_v63 = vld [vmem:[#allocation128_spill] sm:$0xff]  ;;  %v11780_v9 = vld [vmem:[#allocation95_spill] sm:$0xff] }
 0x7b4   :  { %6252 = vmatprep.subr.bf16.mxu1 %v9595_v16  ;;  %v11766_v16 = vmov 1.0|1.0  }
 0x7b7   :  { %6254 = vmatpush1.bf16.msra.mxu1 %v9593_v8 }
 0x7b8   :  { %6256 = vmatprep.subr.bf16.mxu1 %v9611_v0  ;;  %v11784_v0 = vld [vmem:[#allocation161_spill] sm:$0xff] }
 0x7bb   :  { %6258 = vmatpush1.bf16.msra.mxu1 %v11746_v44  ;;  %v11770_v44 = vld [vmem:[#allocation74_spill] sm:$0xff] }
 0x7bc   :  { %3679 = vmatprep.subr.mxu1 %v1611_v50  ;;  %v11769_v50 = vld [vmem:[#allocation79_spill] sm:$0xff] }
 0x7bf   :  { %3680 = vmatpush1.msra.mxu1 %v1609_v13  ;;  %v11768_v13 = vmov 0.0  }
 0x869   :  { %v3316_v34 = vpop.f32.mrb[176].mxu1 }
 0x86a   :  { %v3324_v46 = vrot.slane %v3316_v34, %v11738_v43  ;;  %v3318_v18 = vpop.f32.mrb[177].mxu1  ;;  %v11775_v34 = vld [vmem:[#allocation64_spill] sm:$0xff] }
 0x86b   :  { %v3328_v52 = vrot.slane %v3318_v18, %v11738_v43  ;;  %v11777_v18 = vld [vmem:[#allocation83_spill] sm:$0xff] }
 0x86c   :  { %v3329_v8 = vmul.f32 %v3324_v46, %v2993_v40  ;;  %v11776_v46 = vld [vmem:[#allocation131_spill] sm:$0xff] }
 0x86d   :  { %v3330_v27 = vmul.f32 %v3328_v52, %v2994_v1  ;;  %v11779_v52 = vld [vmem:[#allocation94_spill] sm:$0xff] }
 0x86f   :  { %5434 = vmatprep.mubr.msk.f32.mxu0 %vm2835_vm8, %v3330_v27  ;;  %v11781_v27 = vld [vmem:[#allocation158_spill] sm:$0xff] }
 0x870   :  { %3401 = vmatmul.mubr.f32.vlgmr.msra.gmra.mrb[182].mxu0 %v3329_v8  ;;  %v11782_v8 = vld [vmem:[#allocation106_spill] sm:$0xff] }
 0x871   :  { %6138 = vmatpush1.bf16.msk.msra.mxu0 %vm10148_vm3, %v11766_v16  ;;  %3485 = vmatprep.mubr.f32.mxu0 %v11768_v13  ;;  %v11783_v16 = vld [vmem:[#allocation142_spill] sm:$0xff]  ;;  %v11785_v13 = vld [vmem:[#allocation163_spill] sm:$0xff] }
 0x872   :  { %5439 = vmatprep.subr.msk.mxu0 %vm2913_vm13, %v11769_v50  ;;  %v11786_v50 = vld [vmem:[#allocation34_spill] sm:$0xff] }
 0x875   :  { %5440 = vmatpush1.msk.msra.mxu0 %vm2913_vm13, %v11770_v44  ;;  %v11787_v44 = vld [vmem:[#allocation51_spill] sm:$0xff] }
 0x876   :  { %6140 = vmatprep.subr.bf16.mxu0 %v11771_v19  ;;  %v6348_v19 = vld [vmem:[#allocation17 + $0x240] sm:$0xff]  }
 0x877   :  { %5575 = vmatprep.subr.bf16.mxu1 %v6348_v19 }
 0x943   :  { %v3402_v36 = vpop.f32.mrb[182].mxu0 }
 0x944   :  { %v3403_v5 = vadd.f32 %v3402_v36, %v3332_v20  ;;  %v3404_v45 = vpop.f32.mrb[183].mxu0 }
 0x946   :  { %v3407_v58 = vsel %vm3406_vm11, %v3403_v5, -inf }
 0x947   :  { %3408 = vmax.xlane.f32.xlu1 %v3407_v58  ;;  %v11790_v58 = vld [vmem:[#allocation157_spill] sm:$0xff] }
 0x9d4   :  { %v3409_v29 = vpop.xlane.xlu1 %3408 }
 0x9d5   :  { %v3410_v43 = vsub.f32 %v3403_v5, %v3409_v29  ;;  %v11791_v29 = vld [vmem:[#allocation107_spill] sm:$0xff] }
 0x9d7   :  { %v3411_v12 = vmul.f32 1.442695, %v3410_v43  ;;  %v11794_v43 = vld [vmem:[#allocation102_spill] sm:$0xff] }
 0x9d9   :  { %6528 = vpow2.f32 %v3411_v12  ;;  %v11795_v12 = vld [vmem:[#allocation121_spill] sm:$0xff] }
 0x9e3   :  { %v6529_v60 = vpop.eup %6528 }
 0x9e4   :  { %v3413_v3 = vsel %vm3406_vm11, %v6529_v60, 0.0 }
 0x9e5   :  { %3414 = vadd.xlane.f32.xlu0 %v3413_v3  ;;  %v11797_v3 = vld [vmem:[#allocation97_spill] sm:$0xff] }
 0xa72   :  { %v3415_v41 = vpop.xlane.xlu0 %3414 }
 0xa73   :  { %6530 = vrcp.f32 %v3415_v41  ;;  %v11798_v41 = vld [vmem:[#allocation164_spill] sm:$0xff] }
 0xa7d   :  { %v6531_v24 = vpop.eup %6530 }
 0xa7e   :  { %v3417_v51 = vmul.f32 %v6531_v24, %v6529_v60  ;;  %v11796_v60 = vld [vmem:[#allocation93_spill] sm:$0xff] }
 0xa7f   :  { %v11799_v24 = vld [vmem:[#allocation165_spill] sm:$0xff] }
 0xa80   :  { %5441 = vmatmul.mubr.msk.f32.vlgmr.msra.gmra.mrb[184].mxu0 %vm2909_vm0, %v3417_v51  ;;  %v11800_v51 = vld [vmem:[#allocation112_spill] sm:$0xff] }
 0xa81   :  { %6142 = vmatpush1.bf16.msra.mxu0 %v11772_v62  ;;  %v11801_v62 = vld [vmem:[#allocation168_spill] sm:$0xff] }
 0xa82   :  { %6144 = vmatprep.subr.bf16.mxu0 %v11773_v48  ;;  %v6371_v48 = vld [vmem:[#allocation17 + $0x328] sm:$0xff]  }
 0xa85   :  { %6146 = vmatpush1.bf16.msra.mxu0 %v11774_v63  ;;  %v6373_v63 = vld [vmem:[#allocation17 + $0x370] sm:$0xff]  }
 0xa86   :  { %6148 = vmatprep.subr.bf16.mxu0 %v11775_v34  ;;  %v6375_v34 = vld [vmem:[#allocation17 + $0x330] sm:$0xff]  }
 0xa89   :  { %6150 = vmatpush1.bf16.msra.mxu0 %v11776_v46  ;;  %v6377_v46 = vld [vmem:[#allocation17 + $0x378] sm:$0xff]  }
 0xa8a   :  { %6152 = vmatprep.subr.bf16.mxu0 %v11777_v18  ;;  %v6379_v18 = vld [vmem:[#allocation17 + $0x338] sm:$0xff]  }
 0xa8d   :  { %6154 = vmatpush1.bf16.msra.mxu0 %v11778_v7  ;;  %v6398_v7 = vld [vmem:[#allocation17 + $0x40] sm:$0xff]  }
 0xa8e   :  { %6156 = vmatprep.subr.bf16.mxu0 %v11779_v52  ;;  %v4037_v52 = vld [vmem:[#allocation8] sm:$0xff] }
 0xa91   :  { %6158 = vmatpush1.bf16.msra.mxu0 %v11780_v9  ;;  %v10625_v9 = vmax.f32 %v4037_v52, 0.0  ;;  %v6439_v52 = vld [vmem:[#allocation17 + $0x110] sm:$0xff]  }
 0xa92   :  { %6160 = vmatprep.subr.bf16.mxu0 %v11781_v27  ;;  %v11805_v27 = vld [vmem:[#allocation114_spill] sm:$0xff] }
 0xa95   :  { %6162 = vmatpush1.bf16.msra.mxu0 %v11782_v8  ;;  %v10629_v8 = vrot.slane %v10625_v9, %v11805_v27 }
 0xa96   :  { %6164 = vmatprep.subr.bf16.mxu0 %v11783_v16 }
 0xa99   :  { %6166 = vmatpush1.bf16.msra.mxu0 %v11784_v0 }
 0xa9a   :  { %6168 = vmatprep.subr.bf16.mxu0 %v11785_v13 }
 0xa9d   :  { %6170 = vmatpush1.bf16.msra.mxu0 %v11786_v50 }
 0xa9e   :  { %6172 = vmatprep.subr.bf16.mxu0 %v11730_v37  ;;  %v6350_v37 = vld [vmem:[#allocation17 + $0x200] sm:$0xff]  }
 0xaa1   :  { %6174 = vmatpush1.bf16.msra.mxu0 %v11731_v21  ;;  %v6352_v21 = vld [vmem:[#allocation17 + $0x248] sm:$0xff]  }
 0xaa2   :  { %6176 = vmatprep.subr.bf16.mxu0 %v11787_v44 }
 0xaa5   :  { %6178 = vmatpush1.bf16.msra.mxu0 %v11735_v14  ;;  %v6360_v14 = vld [vmem:[#allocation17 + $0x258] sm:$0xff]  }
 0xaa6   :  { %3537 = vmatprep.subr.mxu0 %v10407_v42  ;;  %v6356_v42 = vld [vmem:[#allocation17 + $0x250] sm:$0xff]  }
 0xaa9   :  { %3538 = vmatpush1.msra.mxu0 %v10413_v4  ;;  %v6358_v4 = vld [vmem:[#allocation17 + $0x210] sm:$0xff]  }
 0xaaa   :  { %6180 = vmatprep.subr.bf16.mxu0 %v10157_v57  ;;  %v6354_v57 = vld [vmem:[#allocation17 + $0x208] sm:$0xff]  }
 0xb53   :  { %v3487_v20 = vpop.f32.mrb[184].mxu0 }
 0xb54   :  { %v3489_v36 = vpop.f32.mrb[185].mxu0  ;;  %v10572_v45 = vmul.f32 %v3487_v20, %v2993_v40  ;;  %v11789_v40 = vld [vmem:[#allocation160_spill] sm:$0xff] }
 0xb55   :  { %v3493_v5 = vmul.f32 %v3489_v36, %v2994_v1  ;;  %v11788_v1 = vld [vmem:[#allocation54_spill] sm:$0xff] }
 0xb57   :  { %5442 = vmatprep.mubr.msk.f32.mxu0 %vm2835_vm8, %v3493_v5  ;;  %5444 = vmatprep.mubr.msk.f32.mxu1 %vm2835_vm8, %v3493_v5 }
 0xb58   :  { %3562 = vmatmul.mubr.f32.vlgmr.msra.gmra.mrb[186].mxu0 %v10572_v45  ;;  %3704 = vmatmul.mubr.f32.vlgmr.msra.gmra.mrb[178].mxu1 %v10572_v45 }
 0xb59   :  { %6182 = vmatpush1.bf16.msra.mxu0 %v10154_v15  ;;  %5443 = vmatprep.mubr.msk.f32.mxu0 %vm2835_vm8, %v3493_v5  ;;  %v6362_v15 = vld [vmem:[#allocation17 + $0x218] sm:$0xff]  }
 0xb5a   :  { %6184 = vmatprep.subr.bf16.mxu0 %v10165_v53  ;;  %5576 = vmatpush3.bf16.msra.mxu1 %v6350_v37  ;;  %v6364_v53 = vld [vmem:[#allocation17 + $0x260] sm:$0xff]  }
 0xb5b   :  { %5577 = vmatprep.subr.bf16.mxu1 %v6352_v21  ;;  %v6381_v21 = vld [vmem:[#allocation17 + $0x280] sm:$0xff]  }
 0xb5d   :  { %6186 = vmatpush1.bf16.msra.mxu0 %v10162_v31  ;;  %v6366_v31 = vld [vmem:[#allocation17 + $0x220] sm:$0xff]  }
 0xb5e   :  { %6188 = vmatprep.subr.bf16.mxu0 %v10173_v49  ;;  %5578 = vmatpush3.bf16.msra.mxu1 %v6354_v57  ;;  %v6368_v49 = vld [vmem:[#allocation17 + $0x268] sm:$0xff]   ;;  %v6399_v57 = vld [vmem:[#allocation17] sm:$0xff]  }
 0xb5f   :  { %5579 = vmatprep.subr.bf16.mxu1 %v6356_v42 }
 0xb61   :  { %6190 = vmatpush1.bf16.msra.mxu0 %v10170_v33  ;;  %v6370_v33 = vld [vmem:[#allocation17 + $0x228] sm:$0xff]  }
 0xb62   :  { %6192 = vmatprep.subr.bf16.mxu0 %v10181_v25  ;;  %5580 = vmatpush3.bf16.msra.mxu1 %v6358_v4  ;;  %v6372_v25 = vld [vmem:[#allocation17 + $0x270] sm:$0xff]  }
 0xb63   :  { %5581 = vmatprep.subr.bf16.mxu1 %v6360_v14  ;;  %v6382_v14 = vld [vmem:[#allocation17 + $0x2c8] sm:$0xff]  }
 0xb65   :  { %6194 = vmatpush1.bf16.msra.mxu0 %v10178_v35  ;;  %v11792_v35 = vld [vmem:[#allocation149_spill] sm:$0xff] }
 0xb66   :  { %6196 = vmatprep.subr.bf16.mxu0 %v10189_v30  ;;  %5582 = vmatpush3.bf16.msra.mxu1 %v6362_v15  ;;  %v11793_v30 = vld [vmem:[#allocation87_spill] sm:$0xff]  ;;  %v6402_v15 = vld [vmem:[#allocation17 + $0x48] sm:$0xff]  }
 0xb67   :  { %5583 = vmatprep.subr.bf16.mxu1 %v6364_v53 }
 0xb69   :  { %6198 = vmatpush1.bf16.msra.mxu0 %v11788_v1  ;;  %v6384_v1 = vld [vmem:[#allocation17 + $0x2d0] sm:$0xff]  }
 0xb6a   :  { %6200 = vmatprep.subr.bf16.mxu0 %v11789_v40  ;;  %5584 = vmatpush3.bf16.msra.mxu1 %v6366_v31  ;;  %v6383_v31 = vld [vmem:[#allocation17 + $0x288] sm:$0xff]   ;;  %v6406_v40 = vld [vmem:[#allocation17 + $0x50] sm:$0xff]  }
 0xb6b   :  { %5585 = vmatprep.subr.bf16.mxu1 %v6368_v49  ;;  %v6403_v49 = vld [vmem:[#allocation17 + $0x8] sm:$0xff]  }
 0xb6d   :  { %6202 = vmatpush1.bf16.msra.mxu0 %v11790_v58  ;;  %v6386_v58 = vld [vmem:[#allocation17 + $0x2d8] sm:$0xff]  }
 0xb6e   :  { %6204 = vmatprep.subr.bf16.mxu0 %v11791_v29  ;;  %5586 = vmatpush3.bf16.msra.mxu1 %v6370_v33  ;;  %v6385_v33 = vld [vmem:[#allocation17 + $0x290] sm:$0xff]   ;;  %v6410_v29 = vld [vmem:[#allocation17 + $0x58] sm:$0xff]  }
 0xb6f   :  { %5587 = vmatprep.subr.bf16.mxu1 %v6372_v25  ;;  %v6407_v25 = vld [vmem:[#allocation17 + $0x10] sm:$0xff]  }
 0xb71   :  { %6206 = vmatpush1.bf16.msra.mxu0 %v11792_v35  ;;  %v6387_v35 = vld [vmem:[#allocation17 + $0x298] sm:$0xff]  }
 0xb72   :  { %6208 = vmatprep.subr.bf16.mxu0 %v11793_v30  ;;  %v6411_v30 = vld [vmem:[#allocation17 + $0x18] sm:$0xff]  }
 0xb75   :  { %6210 = vmatpush1.bf16.msra.mxu0 %v11794_v43  ;;  %v6388_v43 = vld [vmem:[#allocation17 + $0x2e0] sm:$0xff]  }
 0xb76   :  { %6212 = vmatprep.subr.bf16.mxu0 %v11795_v12  ;;  %v6414_v12 = vld [vmem:[#allocation17 + $0x60] sm:$0xff]  }
 0xb79   :  { %6214 = vmatpush1.bf16.msra.mxu0 %v11796_v60  ;;  %v6389_v60 = vld [vmem:[#allocation17 + $0x2a0] sm:$0xff]  }
 0xb7a   :  { %6216 = vmatprep.subr.bf16.mxu0 %v11797_v3  ;;  %v6415_v3 = vld [vmem:[#allocation17 + $0x20] sm:$0xff]  }
 0xb7d   :  { %6218 = vmatpush1.bf16.msra.mxu0 %v11798_v41  ;;  %v6390_v41 = vld [vmem:[#allocation17 + $0x2e8] sm:$0xff]  }
 0xb7e   :  { %3608 = vmatprep.subr.mxu0 %v11799_v24  ;;  %v6418_v24 = vld [vmem:[#allocation17 + $0x68] sm:$0xff]  }
 0xb81   :  { %3609 = vmatpush1.msra.mxu0 %v11800_v51  ;;  %v4038_v51 = vld [vmem:[#allocation8 + $0x8] sm:$0xff] }
 0xb82   :  { %3633 = vmatmul.mubr.f32.vlgmr.msra.gmra.mrb[188].mxu0 %v10572_v45  ;;  %6260 = vmatprep.subr.bf16.mxu0 %v11751_v2  ;;  %v11802_v2 = vld [vmem:[#allocation48_spill] sm:$0xff] }
 0xb83   :  { %6262 = vmatpush1.bf16.msra.mxu0 %v11801_v62  ;;  %5445 = vmatprep.mubr.msk.f32.mxu0 %vm2835_vm8, %v3493_v5  ;;  %v4058_v5 = vcombine.high %v10629_v8, %v10629_v8  ;;  %v6391_v62 = vld [vmem:[#allocation17 + $0x2a8] sm:$0xff]  }
 0xb84   :  { %6264 = vmatprep.subr.bf16.mxu0 %v11753_v59  ;;  %v11803_v59 = vld [vmem:[#allocation71_spill] sm:$0xff] }
 0xb85   :  { %v4086_v53 = vpack.c.bf16 %v4058_v5, %v4058_v5  ;;  %v6447_v5 = vld [vmem:[#allocation17 + $0x120] sm:$0xff]  }
 0xb87   :  { %6266 = vmatpush1.bf16.msra.mxu0 %v11754_v17  ;;  %v6353_v17 = vld [vmem:[#allocation17 + $0x348] sm:$0xff]  }
 0xb88   :  { %6268 = vmatprep.subr.bf16.mxu0 %v11755_v26  ;;  %v11804_v26 = vld [vmem:[#allocation132_spill] sm:$0xff] }
 0xb8b   :  { %6270 = vmatpush1.bf16.msra.mxu0 %v11756_v39  ;;  %v6374_v39 = vld [vmem:[#allocation17 + $0x230] sm:$0xff]  }
 0xb8c   :  { %6272 = vmatprep.subr.bf16.mxu0 %v11757_v23  ;;  %5588 = vmatpush3.bf16.msra.mxu1 %v6374_v39  ;;  %v6361_v23 = vld [vmem:[#allocation17 + $0x358] sm:$0xff]  }
 0xb8d   :  { %v6426_v39 = vld [vmem:[#allocation17 + $0x78] sm:$0xff]  }
 0xb8f   :  { %6274 = vmatpush1.bf16.msra.mxu0 %v11758_v6  ;;  %v6380_v6 = vld [vmem:[#allocation17 + $0x2c0] sm:$0xff]  }
 0xb90   :  { %6276 = vmatprep.subr.bf16.mxu0 %v11759_v54  ;;  %v6349_v54 = vld [vmem:[#allocation17 + $0x340] sm:$0xff]  }
 0xb93   :  { %6278 = vmatpush1.bf16.msra.mxu0 %v11760_v32  ;;  %v6365_v32 = vld [vmem:[#allocation17 + $0x360] sm:$0xff]  }
 0xb94   :  { %6280 = vmatprep.subr.bf16.mxu0 %v11761_v47  ;;  %v6367_v47 = vld [vmem:[#allocation17 + $0x320] sm:$0xff]  }
 0xb97   :  { %6282 = vmatpush1.bf16.msra.mxu0 %v11762_v61  ;;  %v6351_v61 = vld [vmem:[#allocation17 + $0x300] sm:$0xff]  }
 0xb98   :  { %6284 = vmatprep.subr.bf16.mxu0 %v10301_v28  ;;  %v6355_v28 = vld [vmem:[#allocation17 + $0x308] sm:$0xff]  }
 0xb9b   :  { %6286 = vmatpush1.bf16.msra.mxu0 %v11802_v2  ;;  %v6419_v2 = vld [vmem:[#allocation17 + $0x28] sm:$0xff]  }
 0xb9c   :  { %6288 = vmatprep.subr.bf16.mxu0 %v11803_v59  ;;  %v10633_v59 = vmax.f32 %v4038_v51, 0.0 }
 0xb9f   :  { %6290 = vmatpush1.bf16.msra.mxu0 %v11804_v26  ;;  %v6392_v26 = vld [vmem:[#allocation17 + $0x2f0] sm:$0xff]  }
 0xba0   :  { %6292 = vmatprep.subr.bf16.mxu0 %v10359_v56  ;;  %v6357_v56 = vld [vmem:[#allocation17 + $0x350] sm:$0xff]  }
 0xba3   :  { %6294 = vmatpush1.bf16.msra.mxu0 %v10354_v55  ;;  %v6376_v55 = vld [vmem:[#allocation17 + $0x278] sm:$0xff]  }
 0xba4   :  { %6296 = vmatprep.subr.bf16.mxu0 %v10376_v10  ;;  %v6378_v10 = vld [vmem:[#allocation17 + $0x238] sm:$0xff]   ;;  %5589 = vmatprep.subr.bf16.mxu1 %v6376_v55 }
 0xba5   :  { %5590 = vmatpush3.bf16.msra.mxu1 %v6378_v10  ;;  %v6395_v55 = vld [vmem:[#allocation17 + $0x2b8] sm:$0xff]  }
 0xba6   :  { %5597 = vmatprep.subr.bf16.mxu1 %v6380_v6  ;;  %v6427_v10 = vld [vmem:[#allocation17 + $0x38] sm:$0xff]   ;;  %v6430_v6 = vld [vmem:[#allocation17 + $0x140] sm:$0xff]  }
 0xba7   :  { %6298 = vmatpush1.bf16.msra.mxu0 %v10374_v38  ;;  %v6359_v38 = vld [vmem:[#allocation17 + $0x310] sm:$0xff]  }
 0xba8   :  { %3750 = vmatprep.subr.mxu0 %v10499_v11  ;;  %v6369_v11 = vld [vmem:[#allocation17 + $0x368] sm:$0xff]  }
 0xbab   :  { %3751 = vmatpush1.msra.mxu0 %v10505_v22  ;;  %v6363_v22 = vld [vmem:[#allocation17 + $0x318] sm:$0xff]  }
 0xbac   :  { %3775 = vmatmul.mubr.f32.vlgmr.msra.gmra.mrb[190].mxu0 %v10572_v45  ;;  %5619 = vmatprep.subr.bf16.mxu0 %v6349_v54  ;;  %v6422_v54 = vld [vmem:[#allocation17 + $0x70] sm:$0xff]  }
 0xbad   :  { %5620 = vmatpush3.bf16.msra.mxu0 %v6351_v61  ;;  %v6393_v61 = vld [vmem:[#allocation17 + $0x2b0] sm:$0xff]  }
 0xbae   :  { %5621 = vmatprep.subr.bf16.mxu0 %v6353_v17  ;;  %v6423_v17 = vld [vmem:[#allocation17 + $0x30] sm:$0xff]  }
 0xbb1   :  { %5622 = vmatpush3.bf16.msra.mxu0 %v6355_v28  ;;  %v10637_v28 = vrot.slane %v10633_v59, %v11805_v27 }
 0xbb2   :  { %5623 = vmatprep.subr.bf16.mxu0 %v6357_v56  ;;  %v6394_v56 = vld [vmem:[#allocation17 + $0x2f8] sm:$0xff]  }
 0xbb5   :  { %5624 = vmatpush3.bf16.msra.mxu0 %v6359_v38  ;;  %v4075_v38 = vcombine.high %v10637_v28, %v10637_v28 }
 0xbb6   :  { %5625 = vmatprep.subr.bf16.mxu0 %v6361_v23  ;;  %v6396_v23 = vld [vmem:[#allocation17 + $0x3c0] sm:$0xff]  }
 0xbb9   :  { %5626 = vmatpush3.bf16.msra.mxu0 %v6363_v22  ;;  %v4085_v22 = vpack.c.bf16 %v10629_v8, %v10629_v8  ;;  %v6442_v8 = vld [vmem:[#allocation17 + $0x158] sm:$0xff]  }
 0xbba   :  { %5627 = vmatprep.subr.bf16.mxu0 %v6365_v32  ;;  %v6431_v32 = vld [vmem:[#allocation17 + $0x100] sm:$0xff]  }
 0xbbd   :  { %5628 = vmatpush3.bf16.msra.mxu0 %v6367_v47  ;;  %v4090_v47 = vpack.c.bf16 %v4075_v38, %v4075_v38  ;;  %v6448_v38 = vld [vmem:[#allocation17 + $0xe8] sm:$0xff]  }
 0xbbe   :  { %5629 = vmatprep.subr.bf16.mxu0 %v6369_v11  ;;  %v6434_v11 = vld [vmem:[#allocation17 + $0x148] sm:$0xff]  }
 0xbc1   :  { %5630 = vmatpush3.bf16.msra.mxu0 %v6371_v48  ;;  %v6435_v48 = vld [vmem:[#allocation17 + $0x108] sm:$0xff]  }
 0xbc2   :  { %5631 = vmatprep.subr.bf16.mxu0 %v6373_v63  ;;  %v6438_v63 = vld [vmem:[#allocation17 + $0x150] sm:$0xff]  }
 0xbc5   :  { %5632 = vmatpush3.bf16.msra.mxu0 %v6375_v34 }
 0xbc6   :  { %5633 = vmatprep.subr.bf16.mxu0 %v6377_v46 }
 0xbc9   :  { %5634 = vmatpush3.bf16.msra.mxu0 %v6379_v18 }
 0xbca   :  { %5663 = vmatprep.subr.bf16.mxu0 %v6398_v7 }
 0xc2b   :  { %v3563_v16 = vpop.f32.mrb[186].mxu0  ;;  %v3705_v0 = vpop.f32.mrb[178].mxu1 }
 0xc2c   :  { %v4093_v13 = vmax.f32 %v3563_v16, 0.0  ;;  %v4097_v50 = vmax.f32 %v3705_v0, 0.0  ;;  %v3565_v44 = vpop.f32.mrb[187].mxu0  ;;  %v3707_v19 = vpop.f32.mrb[179].mxu1  ;;  %v6397_v0 = vld [vmem:[#allocation17 + $0x380] sm:$0xff]  }
 0xc2d   :  { %v4094_v20 = vmax.f32 %v3565_v44, 0.0  ;;  %v4098_v36 = vmax.f32 %v3707_v19, 0.0  ;;  %v6443_v44 = vld [vmem:[#allocation17 + $0x118] sm:$0xff]   ;;  %v6446_v19 = vld [vmem:[#allocation17 + $0x160] sm:$0xff]  }
 0xc2e   :  { %v4101_v42 = vpack.c.bf16 %v4093_v13, %v4093_v13  ;;  %v4105_v4 = vpack.c.bf16 %v4097_v50, %v4097_v50  ;;  %v6400_v50 = vld [vmem:[#allocation17 + $0x3c8] sm:$0xff]  }
 0xc2f   :  { %v4102_v45 = vpack.c.bf16 %v4094_v20, %v4094_v20  ;;  %v4106_v37 = vpack.c.bf16 %v4098_v36, %v4098_v36  ;;  %v6401_v20 = vld [vmem:[#allocation17 + $0x388] sm:$0xff]   ;;  %v6404_v36 = vld [vmem:[#allocation17 + $0x3d0] sm:$0xff]  }
 0xc31   :  { %4525 = vmatprep.mubr.bf16.mxu1 %v4102_v45  ;;  %4605 = vmatprep.mubr.bf16.mxu0 %v4106_v37  ;;  %v6450_v45 = vld [vmem:[#allocation17 + $0x168] sm:$0xff]   ;;  %v6405_v37 = vld [vmem:[#allocation17 + $0x390] sm:$0xff]  }
 0xc32   :  { %4526 = vmatmul.mubr.bf16.vlgmr.msra.gmra.mrb[180].mxu1 %v4101_v42  ;;  %4606 = vmatmul.mubr.bf16.vlgmr.msra.gmra.mrb[192].mxu0 %v4105_v4  ;;  %v6454_v42 = vld [vmem:[#allocation17 + $0x170] sm:$0xff]   ;;  %v6409_v4 = vld [vmem:[#allocation17 + $0x398] sm:$0xff]  }
 0xc33   :  { %5598 = vmatpush3.bf16.msra.mxu1 %v6381_v21  ;;  %5664 = vmatpush3.bf16.msra.mxu0 %v6399_v57  ;;  %v6408_v21 = vld [vmem:[#allocation17 + $0x3d8] sm:$0xff]   ;;  %v6451_v57 = vld [vmem:[#allocation17 + $0x128] sm:$0xff]  }
 0xc34   :  { %5599 = vmatprep.subr.bf16.mxu1 %v6382_v14  ;;  %5665 = vmatprep.subr.bf16.mxu0 %v6402_v15  ;;  %v6412_v14 = vld [vmem:[#allocation17 + $0x3e0] sm:$0xff]   ;;  %v6455_v15 = vld [vmem:[#allocation17 + $0x130] sm:$0xff]  }
 0xc35   :  { %5069 = vmatprep.mubr.bf16.mxu0 %v4086_v53  ;;  %v6458_v53 = vld [vmem:[#allocation17 + $0x178] sm:$0xff]  }
 0xc37   :  { %5600 = vmatpush3.bf16.msra.mxu1 %v6383_v31  ;;  %5666 = vmatpush3.bf16.msra.mxu0 %v6403_v49  ;;  %v6413_v31 = vld [vmem:[#allocation17 + $0x3a0] sm:$0xff]   ;;  %v6416_v49 = vld [vmem:[#allocation17 + $0x3e8] sm:$0xff]  }
 0xc38   :  { %5601 = vmatprep.subr.bf16.mxu1 %v6384_v1  ;;  %5667 = vmatprep.subr.bf16.mxu0 %v6406_v40  ;;  %v6459_v1 = vld [vmem:[#allocation17 + $0x138] sm:$0xff]   ;;  %v6417_v40 = vld [vmem:[#allocation17 + $0x3a8] sm:$0xff]  }
 0xc3b   :  { %5602 = vmatpush3.bf16.msra.mxu1 %v6385_v33  ;;  %5668 = vmatpush3.bf16.msra.mxu0 %v6407_v25  ;;  %v6420_v33 = vld [vmem:[#allocation17 + $0x3f0] sm:$0xff]   ;;  %v4089_v25 = vpack.c.bf16 %v10637_v28, %v10637_v28 }
 0xc3c   :  { %5603 = vmatprep.subr.bf16.mxu1 %v6386_v58  ;;  %5669 = vmatprep.subr.bf16.mxu0 %v6410_v29  ;;  %v6421_v58 = vld [vmem:[#allocation17 + $0x3b0] sm:$0xff]   ;;  %v6424_v29 = vld [vmem:[#allocation17 + $0x3f8] sm:$0xff]  }
 0xc3d   :  { %v6437_v28 = vld [vmem:[#allocation17 + $0x90] sm:$0xff]  }
 0xc3f   :  { %5604 = vmatpush3.bf16.msra.mxu1 %v6387_v35  ;;  %5670 = vmatpush3.bf16.msra.mxu0 %v6411_v30  ;;  %v6425_v35 = vld [vmem:[#allocation17 + $0x3b8] sm:$0xff]   ;;  %v6428_v30 = vld [vmem:[#allocation17 + $0xc0] sm:$0xff]  }
 0xc40   :  { %5605 = vmatprep.subr.bf16.mxu1 %v6388_v43  ;;  %5671 = vmatprep.subr.bf16.mxu0 %v6414_v12  ;;  %v4043_v43 = vcombine.high %v10625_v9, %v10625_v9  ;;  %v6436_v9 = vld [vmem:[#allocation17 + $0xd0] sm:$0xff]  }
 0xc42   :  { %v4057_v12 = vrot.slane %v4043_v43, %v11805_v27 }
 0xc43   :  { %5606 = vmatpush3.bf16.msra.mxu1 %v6389_v60  ;;  %5672 = vmatpush3.bf16.msra.mxu0 %v6415_v3 }
 0xc44   :  { %5607 = vmatprep.subr.bf16.mxu1 %v6390_v41  ;;  %5673 = vmatprep.subr.bf16.mxu0 %v6418_v24  ;;  %v4059_v3 = vcombine.high %v4057_v12, %v4057_v12 }
 0xc47   :  { %5608 = vmatpush3.bf16.msra.mxu1 %v6391_v62  ;;  %5674 = vmatpush3.bf16.msra.mxu0 %v6419_v2  ;;  %v6429_v2 = vld [vmem:[#allocation17 + $0x80] sm:$0xff]  }
 0xc48   :  { %5609 = vmatprep.subr.bf16.mxu1 %v6392_v26  ;;  %5675 = vmatprep.subr.bf16.mxu0 %v6422_v54  ;;  %v4088_v26 = vpack.c.bf16 %v4059_v3, %v4059_v3 }
 0xc4b   :  { %5610 = vmatpush3.bf16.msra.mxu1 %v6393_v61  ;;  %5676 = vmatpush3.bf16.msra.mxu0 %v6423_v17  ;;  %v6432_v61 = vld [vmem:[#allocation17 + $0xc8] sm:$0xff]  }
 0xc4c   :  { %5611 = vmatprep.subr.bf16.mxu1 %v6394_v56  ;;  %5677 = vmatprep.subr.bf16.mxu0 %v6426_v39  ;;  %v6433_v17 = vld [vmem:[#allocation17 + $0x88] sm:$0xff]   ;;  %v6440_v56 = vld [vmem:[#allocation17 + $0xd8] sm:$0xff]  }
 0xc4d   :  { %v6441_v39 = vld [vmem:[#allocation17 + $0x98] sm:$0xff]  }
 0xc4f   :  { %5612 = vmatpush3.bf16.msra.mxu1 %v6395_v55  ;;  %5678 = vmatpush3.bf16.msra.mxu0 %v6427_v10  ;;  %v6444_v55 = vld [vmem:[#allocation17 + $0xe0] sm:$0xff]  }
 0xc50   :  { %5641 = vmatprep.subr.bf16.mxu1 %v6396_v23  ;;  %5707 = vmatprep.subr.bf16.mxu0 %v6430_v6  ;;  %v6445_v10 = vld [vmem:[#allocation17 + $0xa0] sm:$0xff]   ;;  %v6449_v23 = vld [vmem:[#allocation17 + $0xa8] sm:$0xff]   ;;  %v4060_v6 = vcombine.high %v10633_v59, %v10633_v59 }
 0xc51   :  { %v6463_v59 = vld [vmem:[#allocation17 + $0x188] sm:$0xff]  }
 0xc52   :  { %5070 = vmatmul.mubr.bf16.vlgmr.msra.gmra.mrb[196].mxu0 %v4085_v22  ;;  %v6452_v22 = vld [vmem:[#allocation17 + $0xf0] sm:$0xff]  }
 0xc53   :  { %5708 = vmatpush3.bf16.msra.mxu0 %v6431_v32  ;;  %5149 = vmatprep.mubr.bf16.mxu0 %v4090_v47  ;;  %v6453_v32 = vld [vmem:[#allocation17 + $0xb0] sm:$0xff]   ;;  %v4074_v47 = vrot.slane %v4060_v6, %v11805_v27 }
 0xc54   :  { %5709 = vmatprep.subr.bf16.mxu0 %v6434_v11  ;;  %v6456_v11 = vld [vmem:[#allocation17 + $0xf8] sm:$0xff]   ;;  %v6465_v27 = vld [vmem:[#allocation17 + $0x190] sm:$0xff]  }
 0xc55   :  { %v3634_v34 = vpop.f32.mrb[188].mxu0 }
 0xc56   :  { %v4095_v46 = vmax.f32 %v3634_v34, 0.0  ;;  %v3636_v18 = vpop.f32.mrb[189].mxu0  ;;  %v6460_v34 = vld [vmem:[#allocation17 + $0x1c0] sm:$0xff]  }
 0xc57   :  { %v4096_v7 = vmax.f32 %v3636_v18, 0.0  ;;  %5710 = vmatpush3.bf16.msra.mxu0 %v6435_v48  ;;  %v6457_v48 = vld [vmem:[#allocation17 + $0xb8] sm:$0xff]   ;;  %v6461_v18 = vld [vmem:[#allocation17 + $0x180] sm:$0xff]  }
 0xc58   :  { %5711 = vmatprep.subr.bf16.mxu0 %v6438_v63  ;;  %v4103_v13 = vpack.c.bf16 %v4095_v46, %v4095_v46  ;;  %v4076_v63 = vcombine.high %v4074_v47, %v4074_v47  ;;  %v4087_v46 = vpack.c.bf16 %v4057_v12, %v4057_v12 }
 0xc59   :  { %v4104_v16 = vpack.c.bf16 %v4096_v7, %v4096_v7 }
 0xc5a   :  { %v4092_v7 = vpack.c.bf16 %v4076_v63, %v4076_v63 }
 0xc5b   :  { %4565 = vmatprep.mubr.bf16.mxu1 %v4104_v16  ;;  %5712 = vmatpush3.bf16.msra.mxu0 %v6439_v52  ;;  %v6462_v52 = vld [vmem:[#allocation17 + $0x1c8] sm:$0xff]   ;;  %v6466_v16 = vld [vmem:[#allocation17 + $0x1d8] sm:$0xff]  }
 0xc5c   :  { %4566 = vmatmul.mubr.bf16.vlgmr.msra.gmra.mrb[184].mxu1 %v4103_v13  ;;  %5713 = vmatprep.subr.bf16.mxu0 %v6442_v8  ;;  %v6464_v8 = vld [vmem:[#allocation17 + $0x1d0] sm:$0xff]   ;;  %v6468_v13 = vld [vmem:[#allocation17 + $0x1e0] sm:$0xff]  }
 0xc5d   :  { %5642 = vmatpush3.bf16.msra.mxu1 %v6397_v0  ;;  %v6467_v0 = vld [vmem:[#allocation17 + $0x198] sm:$0xff]  }
 0xc5e   :  { %5643 = vmatprep.subr.bf16.mxu1 %v6400_v50  ;;  %v6469_v50 = vld [vmem:[#allocation17 + $0x1a0] sm:$0xff]  }
 0xc5f   :  { %5714 = vmatpush3.bf16.msra.mxu0 %v6443_v44  ;;  %v6470_v44 = vld [vmem:[#allocation17 + $0x1e8] sm:$0xff]  }
 0xc60   :  { %5715 = vmatprep.subr.bf16.mxu0 %v6446_v19  ;;  %v6471_v19 = vld [vmem:[#allocation17 + $0x1a8] sm:$0xff]  }
 0xc61   :  { %5644 = vmatpush3.bf16.msra.mxu1 %v6401_v20  ;;  %v6472_v20 = vld [vmem:[#allocation17 + $0x1f0] sm:$0xff]  }
 0xc62   :  { %5645 = vmatprep.subr.bf16.mxu1 %v6404_v36  ;;  %v6473_v36 = vld [vmem:[#allocation17 + $0x1b0] sm:$0xff]  }
 0xc63   :  { %5716 = vmatpush3.bf16.msra.mxu0 %v6447_v5  ;;  %v6474_v5 = vld [vmem:[#allocation17 + $0x1f8] sm:$0xff]  }
 0xc64   :  { %5717 = vmatprep.subr.bf16.mxu0 %v6450_v45  ;;  %v6475_v45 = vld [vmem:[#allocation17 + $0x1b8] sm:$0xff]  }
 0xc65   :  { %5646 = vmatpush3.bf16.msra.mxu1 %v6405_v37  ;;  %v4091_v37 = vpack.c.bf16 %v4074_v47, %v4074_v47 }
 0xc66   :  { %5647 = vmatprep.subr.bf16.mxu1 %v6408_v21 }
 0xc67   :  { %5718 = vmatpush3.bf16.msra.mxu0 %v6451_v57 }
 0xc68   :  { %5719 = vmatprep.subr.bf16.mxu0 %v6454_v42 }
 0xc69   :  { %5648 = vmatpush3.bf16.msra.mxu1 %v6409_v4 }
 0xc6a   :  { %5649 = vmatprep.subr.bf16.mxu1 %v6412_v14 }
 0xc6b   :  { %5720 = vmatpush3.bf16.msra.mxu0 %v6455_v15 }
 0xc6c   :  { %5721 = vmatprep.subr.bf16.mxu0 %v6458_v53 }
 0xc6d   :  { %5650 = vmatpush3.bf16.msra.mxu1 %v6413_v31 }
 0xc6e   :  { %5651 = vmatprep.subr.bf16.mxu1 %v6416_v49 }
 0xc6f   :  { %5722 = vmatpush3.bf16.msra.mxu0 %v6459_v1 }
 0xc71   :  { %5652 = vmatpush3.bf16.msra.mxu1 %v6417_v40 }
 0xc72   :  { %5653 = vmatprep.subr.bf16.mxu1 %v6420_v33  ;;  %5150 = vmatmul.mubr.bf16.vlgmr.msra.gmra.mrb[200].mxu0 %v4089_v25 }
 0xc75   :  { %5654 = vmatpush3.bf16.msra.mxu1 %v6421_v58 }
 0xc76   :  { %5655 = vmatprep.subr.bf16.mxu1 %v6424_v29 }
 0xc79   :  { %5656 = vmatpush3.bf16.msra.mxu1 %v6425_v35 }
 0xc7a   :  { %5685 = vmatprep.subr.bf16.mxu1 %v6428_v30 }
 0xc7f   :  { %v3776_v60 = vpop.f32.mrb[190].mxu0 }
 0xc80   :  { %v4099_v41 = vmax.f32 %v3776_v60, 0.0  ;;  %v3778_v24 = vpop.f32.mrb[191].mxu0 }
 0xc81   :  { %v4100_v51 = vmax.f32 %v3778_v24, 0.0 }
 0xc82   :  { %v4107_v54 = vpack.c.bf16 %v4099_v41, %v4099_v41 }
 0xc83   :  { %v4108_v62 = vpack.c.bf16 %v4100_v51, %v4100_v51 }
 0xc85   :  { %4645 = vmatprep.mubr.bf16.mxu1 %v4108_v62 }
 0xc86   :  { %4646 = vmatmul.mubr.bf16.vlgmr.msra.gmra.mrb[188].mxu1 %v4107_v54 }
 0xc87   :  { %5686 = vmatpush3.bf16.msra.mxu1 %v6429_v2  ;;  %5109 = vmatprep.mubr.bf16.mxu1 %v4088_v26 }
 0xc88   :  { %5687 = vmatprep.subr.bf16.mxu1 %v6432_v61 }
 0xc8b   :  { %5688 = vmatpush3.bf16.msra.mxu1 %v6433_v17 }
 0xc8c   :  { %5689 = vmatprep.subr.bf16.mxu1 %v6436_v9 }
 0xc8f   :  { %5690 = vmatpush3.bf16.msra.mxu1 %v6437_v28 }
 0xc90   :  { %5691 = vmatprep.subr.bf16.mxu1 %v6440_v56 }
 0xc93   :  { %5692 = vmatpush3.bf16.msra.mxu1 %v6441_v39 }
 0xc94   :  { %5693 = vmatprep.subr.bf16.mxu1 %v6444_v55 }
 0xc97   :  { %5694 = vmatpush3.bf16.msra.mxu1 %v6445_v10 }
 0xc98   :  { %5695 = vmatprep.subr.bf16.mxu1 %v6448_v38 }
 0xc9b   :  { %5696 = vmatpush3.bf16.msra.mxu1 %v6449_v23 }
 0xc9c   :  { %5697 = vmatprep.subr.bf16.mxu1 %v6452_v22 }
 0xc9f   :  { %5698 = vmatpush3.bf16.msra.mxu1 %v6453_v32 }
 0xca0   :  { %5699 = vmatprep.subr.bf16.mxu1 %v6456_v11 }
 0xca3   :  { %5700 = vmatpush3.bf16.msra.mxu1 %v6457_v48 }
 0xca4   :  { %5729 = vmatprep.subr.bf16.mxu1 %v6460_v34 }
 0xca6   :  { %5110 = vmatmul.mubr.bf16.vlgmr.msra.gmra.mrb[192].mxu1 %v4087_v46  ;;  %v5574_v46 = vld [vmem:[#allocation18] ss:$0 sm:$0xff] }
 0xca7   :  { %5730 = vmatpush3.bf16.msra.mxu1 %v6461_v18  ;;  %5189 = vmatprep.mubr.bf16.mxu1 %v4092_v7 }
 0xca8   :  { %5731 = vmatprep.subr.bf16.mxu1 %v6462_v52 }
 0xcab   :  { %5732 = vmatpush3.bf16.msra.mxu1 %v6463_v59 }
 0xcac   :  { %5733 = vmatprep.subr.bf16.mxu1 %v6464_v8 }
 0xcaf   :  { %5734 = vmatpush3.bf16.msra.mxu1 %v6465_v27 }
 0xcb0   :  { %5735 = vmatprep.subr.bf16.mxu1 %v6466_v16 }
 0xcb3   :  { %5736 = vmatpush3.bf16.msra.mxu1 %v6467_v0 }
 0xcb4   :  { %5737 = vmatprep.subr.bf16.mxu1 %v6468_v13 }
 0xcb7   :  { %5738 = vmatpush3.bf16.msra.mxu1 %v6469_v50 }
 0xcb8   :  { %5739 = vmatprep.subr.bf16.mxu1 %v6470_v44 }
 0xcbb   :  { %5740 = vmatpush3.bf16.msra.mxu1 %v6471_v19 }
 0xcbc   :  { %5741 = vmatprep.subr.bf16.mxu1 %v6472_v20 }
 0xcbf   :  { %5742 = vmatpush3.bf16.msra.mxu1 %v6473_v36 }
 0xcc0   :  { %5743 = vmatprep.subr.bf16.mxu1 %v6474_v5 }
 0xcc3   :  { %5744 = vmatpush3.bf16.msra.mxu1 %v6475_v45 }
 0xcc6   :  { %5190 = vmatmul.mubr.bf16.vlgmr.msra.gmra.mrb[196].mxu1 %v4091_v37 }
 0xd05   :  { %v5591_v21 = vpop.f32.mrb[180].mxu1  ;;  %v5635_v57 = vpop.f32.mrb[192].mxu0 }
 0xd06   :  { %v5592_v42 = vpop.f32.mrb[181].mxu1  ;;  %v5636_v4 = vpop.f32.mrb[193].mxu0 }
 0xd07   :  { %v5593_v14 = vadd.f32 %v5592_v42, %v5591_v21  ;;  %v5637_v15 = vadd.f32 %v5636_v4, %v5635_v57  ;;  %v5594_v53 = vpop.f32.mrb[182].mxu1  ;;  %v5638_v31 = vpop.f32.mrb[194].mxu0 }
 0xd08   :  { %v5595_v49 = vpop.f32.mrb[183].mxu1  ;;  %v5639_v1 = vpop.f32.mrb[195].mxu0 }
 0xd25   :  { %v5679_v40 = vpop.f32.mrb[196].mxu0 }
 0xd26   :  { %v5680_v33 = vpop.f32.mrb[197].mxu0 }
 0xd27   :  { %v5681_v25 = vadd.f32 %v5680_v33, %v5679_v40  ;;  %v5682_v58 = vpop.f32.mrb[198].mxu0 }
 0xd28   :  { %v5683_v29 = vpop.f32.mrb[199].mxu0 }
 0xd2f   :  { %v5613_v35 = vpop.f32.mrb[184].mxu1 }
 0xd30   :  { %v5614_v30 = vpop.f32.mrb[185].mxu1 }
 0xd31   :  { %v5615_v43 = vadd.f32 %v5614_v30, %v5613_v35  ;;  %v5616_v12 = vpop.f32.mrb[186].mxu1 }
 0xd32   :  { %v5617_v60 = vpop.f32.mrb[187].mxu1 }
 0xd33   :  { %v4568_v3 = vadd.f32 %v5615_v43, %v5593_v14 }
 0xd35   :  { %v4608_v41 = vadd.f32 %v5637_v15, %v4568_v3 }
 0xd45   :  { %v5723_v24 = vpop.f32.mrb[200].mxu0 }
 0xd46   :  { %v5724_v51 = vpop.f32.mrb[201].mxu0 }
 0xd47   :  { %v5725_v62 = vadd.f32 %v5724_v51, %v5723_v24  ;;  %v5726_v2 = vpop.f32.mrb[202].mxu0 }
 0xd48   :  { %v5727_v26 = vpop.f32.mrb[203].mxu0 }
 0xd59   :  { %v5657_v54 = vpop.f32.mrb[188].mxu1 }
 0xd5a   :  { %v5658_v61 = vpop.f32.mrb[189].mxu1 }
 0xd5b   :  { %v5659_v17 = vadd.f32 %v5658_v61, %v5657_v54  ;;  %v5660_v9 = vpop.f32.mrb[190].mxu1 }
 0xd5c   :  { %v5661_v28 = vpop.f32.mrb[191].mxu1 }
 0xd5d   :  { %v4648_v56 = vadd.f32 %v5659_v17, %v4608_v41 }
 0xd5f   :  { %v5072_v39 = vadd.f32 %v5681_v25, %v4648_v56 }
 0xd79   :  { %v5701_v55 = vpop.f32.mrb[192].mxu1 }
 0xd7a   :  { %v5702_v10 = vpop.f32.mrb[193].mxu1 }
 0xd7b   :  { %v5703_v38 = vadd.f32 %v5702_v10, %v5701_v55  ;;  %v5704_v23 = vpop.f32.mrb[194].mxu1 }
 0xd7c   :  { %v5705_v6 = vpop.f32.mrb[195].mxu1 }
 0xd7d   :  { %v5112_v22 = vadd.f32 %v5703_v38, %v5072_v39 }
 0xd7f   :  { %v5152_v32 = vadd.f32 %v5725_v62, %v5112_v22 }
 0xd99   :  { %v5745_v47 = vpop.f32.mrb[196].mxu1 }
 0xd9a   :  { %v5746_v11 = vpop.f32.mrb[197].mxu1 }
 0xd9b   :  { %v5747_v48 = vadd.f32 %v5746_v11, %v5745_v47  ;;  %v5748_v63 = vpop.f32.mrb[198].mxu1 }
 0xd9c   :  { %v5749_v34 = vpop.f32.mrb[199].mxu1 }
 0xd9d   :  { %v5192_v18 = vadd.f32 %v5747_v48, %v5152_v32 }
 0xd9f   :  { %v5204_v7 = vadd.f32 %v5574_v46, %v5192_v18 }
 0xda1   :  { %5205 = vst [vmem:[#allocation20] sm:$0x3] %v5204_v7 }
 0xda2   :  { %6788 = shalt.err (!%p6785_p0)
}
 0xda3   :  { %s6789_s12 = scalar_lea.hbm %s10674_s11, 32 }
 0xda4   :  { %p6790_p1 = scmp.ne.s32.totalorder %s10674_s11, %s6789_s12  ;;  %p6793_p2 = scmp.lt.u32.totalorder %s6789_s12, %s10674_s11 }
 0xda6   :  { %p6795_p3 = pnand %p6793_p2, %p6790_p1 }
 0xda8   :  { %6798 = shalt.err (!%p6795_p3)
}
 0xda9   :  { %5215 = dma.vmem_to_hbm [thread:$0]  %s5213_s25, 32, %s10674_s11, [#allocation5]  }
 0xdaa   :  { %6811 = dma.done.wait [#allocation5], 32  }
 0xdab   :  { %6812 = vsyncadd [#allocation5], 4294967264 }
 0xdac   :  { %5219 = vsyncpa [#allocation4], 1 }
 0xdad   :  { %5220 = vsyncpa [#allocation7], 1 }
 0xdae   :  { %5221 = vsyncpa [#allocation10], 1 }
 0xdaf   :  { %5222 = vsyncpa [#allocation13], 1 }
 0xdb0   :  { %5223 = vsyncpa [#allocation16], 1 }
 0xdb1   :  { %5224 = vsyncpa [#allocation19], 1 }
 0xdb2   :  { %5225 = vsyncpa [#allocation5], 1 }

</bundles_post_ra>
